<compile_context>
chip_gen: v7x
topology: tpu7x:2x2x1
jax: 0.10.0
libtpu: 0.0.40
codegen_flags: <defaults>
</compile_context>

<pallas_src>
import jax
import jax.numpy as jnp
from jax.experimental import pallas as pl
from jax.experimental.pallas import tpu as pltpu


def _leaky(x):
    # PyTorch nn.LeakyReLU default negative_slope = 0.01
    return jnp.where(x > 0, x, 0.01 * x)


# ----------------------------------------------------------------------------
# Fused DenseBlock kernel (one grid point = one batch image, all layers)
# ----------------------------------------------------------------------------
def _make_block_kernel(num_layers, cin, cin_pad, H, W, C4, G):
    M = H * W
    R = (H + 2) * W  # rows of the vertically padded shift planes

    def kernel(*refs):
        x_ref = refs[0]
        layer_refs = refs[1:1 + 6 * num_layers]
        o_ref = refs[1 + 6 * num_layers]       # (1, M, cin + L*G) f32
        feat_ref = refs[2 + 6 * num_layers]    # (M, cin_pad + L*G) bf16
        pad_ref = refs[3 + 6 * num_layers]     # (3, R, C4) bf16

        # Zero only the 1-pixel vertical borders of the shift planes; the
        # interior rows [W, W+M) are fully overwritten every layer.
        zb = jnp.zeros((3, W, C4), jnp.bfloat16)
        pad_ref[:, 0:W, :] = zb
        pad_ref[:, W + M:R, :] = zb

        # Input image in matmul-native (M, C) layout.  Passthrough channels go
        # straight to the output; a bf16 copy seeds the feature buffer.
        x2d = x_ref[0]                                   # (M, cin_pad) f32
        feat_ref[:, 0:cin_pad] = x2d.astype(jnp.bfloat16)
        o_ref[0, :, 0:cin] = x2d[:, 0:cin]

        # Horizontal-edge masks (x == 0 / x == W-1), built once per step.
        xcol = jax.lax.broadcasted_iota(jnp.int32, (M, 1), 0) % W
        not_left = (xcol != 0).astype(jnp.bfloat16)
        not_right = (xcol != (W - 1)).astype(jnp.bfloat16)

        for l in range(num_layers):
            (w1_ref, s1_ref, b1_ref,
             w2_ref, s2_ref, b2_ref) = layer_refs[6 * l:6 * l + 6]
            k_l = cin_pad + l * G

            # ---- 1x1 conv + folded BN + LeakyReLU: one matmul over the
            # channel-contiguous prefix [x, y_0, ..., y_{l-1}] of feat_ref.
            xin = feat_ref[:, 0:k_l]                     # (M, k_l) bf16
            h = jnp.dot(xin, w1_ref[...],
                        preferred_element_type=jnp.float32)
            h = _leaky(h * s1_ref[...] + b1_ref[...])    # (M, C4) f32
            hb = h.astype(jnp.bfloat16)

            # ---- 3x3 conv: write h into the center plane, derive the left/
            # right shifted planes from sublane-offset reads + edge masks,
            # then accumulate 9 matmuls whose taps are aligned slab slices.
            pad_ref[1, W:W + M, :] = hb
            h_left = pad_ref[1, W - 1:W - 1 + M, :] * not_left    # value at x-1
            h_right = pad_ref[1, W + 1:W + 1 + M, :] * not_right  # value at x+1
            pad_ref[0, W:W + M, :] = h_left
            pad_ref[2, W:W + M, :] = h_right

            acc = jnp.zeros((M, G), jnp.float32)
            for ky in range(3):
                for kx in range(3):
                    tap = pad_ref[kx, ky * W:ky * W + M, :]       # (M, C4) bf16
                    acc = acc + jnp.dot(tap, w2_ref[ky * 3 + kx],
                                        preferred_element_type=jnp.float32)
            y = _leaky(acc * s2_ref[...] + b2_ref[...])           # (M, G) f32

            o_ref[0, :, cin + l * G:cin + (l + 1) * G] = y
            if l + 1 < num_layers:
                feat_ref[:, k_l:k_l + G] = y.astype(jnp.bfloat16)

    return kernel


# ----------------------------------------------------------------------------
# DenseBlock forward (NHWC in, NHWC out), single fused pallas_call
# ----------------------------------------------------------------------------
def dense_block_forward(x_nhwc, layer_params):
    N, H, W, cin = x_nhwc.shape
    num_layers = len(layer_params)
    C4 = layer_params[0][0].shape[1]
    G = layer_params[0][3].shape[-1]
    cin_pad = ((cin + 7) // 8) * 8
    M = H * W
    c_out = cin + num_layers * G

    # matmul-native (N, M, C) layout; channel pad matched by zero weight rows
    x_packed = jnp.pad(x_nhwc, ((0, 0), (0, 0), (0, 0), (0, cin_pad - cin)))
    x_packed = x_packed.reshape(N, M, cin_pad)

    inputs = [x_packed]
    in_specs = [pl.BlockSpec((1, M, cin_pad), lambda b: (b, 0, 0))]
    for l, (w1, s1, b1, w2, s2, b2) in enumerate(layer_params):
        k_l = cin_pad + l * G
        # 1x1 weight rows: [x channels padded with zeros, then G per prev layer]
        w1p = jnp.concatenate(
            [jnp.pad(w1[:cin], ((0, cin_pad - cin), (0, 0))), w1[cin:]], axis=0)
        assert w1p.shape == (k_l, C4)
        inputs += [w1p.astype(jnp.bfloat16),
                   s1.reshape(1, C4), b1.reshape(1, C4),
                   w2.astype(jnp.bfloat16),
                   s2.reshape(1, G), b2.reshape(1, G)]
        in_specs += [pl.BlockSpec((k_l, C4), lambda b: (0, 0)),
                     pl.BlockSpec((1, C4), lambda b: (0, 0)),
                     pl.BlockSpec((1, C4), lambda b: (0, 0)),
                     pl.BlockSpec((9, C4, G), lambda b: (0, 0, 0)),
                     pl.BlockSpec((1, G), lambda b: (0, 0)),
                     pl.BlockSpec((1, G), lambda b: (0, 0))]

    kernel = _make_block_kernel(num_layers, cin, cin_pad, H, W, C4, G)

    out = pl.pallas_call(
        kernel,
        out_shape=jax.ShapeDtypeStruct((N, M, c_out), jnp.float32),
        grid=(N,),
        in_specs=in_specs,
        out_specs=pl.BlockSpec((1, M, c_out), lambda b: (b, 0, 0)),
        scratch_shapes=[
            pltpu.VMEM((M, cin_pad + num_layers * G), jnp.bfloat16),  # feature buf
            pltpu.VMEM((3, (H + 2) * W, C4), jnp.bfloat16),           # shift planes
        ],
        compiler_params=pltpu.CompilerParams(
            dimension_semantics=("parallel",),
            vmem_limit_bytes=32 * 1024 * 1024),
    )(*inputs)

    return out.reshape(N, H, W, c_out)


# ----------------------------------------------------------------------------
# Deterministic synthetic parameters (BN folded into scale/bias, eval mode)
# ----------------------------------------------------------------------------
def _fold_bn(gamma, beta, rmean, rvar, eps=1e-5):
    scale = gamma / jnp.sqrt(rvar + eps)
    bias = beta - rmean * scale
    return scale, bias


def init_layer_params(key, cin, growth):
    c4 = 4 * growth
    k = jax.random.split(key, 10)
    # conv1: PyTorch weight (c4, cin, 1, 1) -> matmul layout (cin, c4)
    w1 = jax.random.normal(k[0], (cin, c4), jnp.float32) / jnp.sqrt(cin)
    g1 = 1.0 + 0.1 * jax.random.normal(k[1], (c4,), jnp.float32)
    b1 = 0.1 * jax.random.normal(k[2], (c4,), jnp.float32)
    rm1 = 0.1 * jax.random.normal(k[3], (c4,), jnp.float32)
    rv1 = 0.5 + jnp.abs(jax.random.normal(k[4], (c4,), jnp.float32)) * 0.5
    s1, bb1 = _fold_bn(g1, b1, rm1, rv1)

    # conv2: PyTorch weight (growth, c4, 3, 3) -> tap layout (9, c4, growth)
    w2 = jax.random.normal(k[5], (9, c4, growth), jnp.float32) / jnp.sqrt(9 * c4)
    g2 = 1.0 + 0.1 * jax.random.normal(k[6], (growth,), jnp.float32)
    b2 = 0.1 * jax.random.normal(k[7], (growth,), jnp.float32)
    rm2 = 0.1 * jax.random.normal(k[8], (growth,), jnp.float32)
    rv2 = 0.5 + jnp.abs(jax.random.normal(k[9], (growth,), jnp.float32)) * 0.5
    s2, bb2 = _fold_bn(g2, b2, rm2, rv2)

    return (w1, s1, bb1, w2, s2, bb2)


# ----------------------------------------------------------------------------
# Pure-JAX reference (lax.conv, same bf16-operand / f32-accumulate precision)
# ----------------------------------------------------------------------------
def ref_dense_layer(x, params):
    w1, s1, b1, w2f, s2, b2 = params
    cin, c4 = w1.shape
    g = w2f.shape[-1]
    dn = ('NHWC', 'HWIO', 'NHWC')
    h = jax.lax.conv_general_dilated(
        x.astype(jnp.bfloat16), w1.reshape(1, 1, cin, c4).astype(jnp.bfloat16),
        (1, 1), 'VALID', dimension_numbers=dn,
        preferred_element_type=jnp.float32)
    h = _leaky(h * s1 + b1)
    y = jax.lax.conv_general_dilated(
        h.astype(jnp.bfloat16), w2f.reshape(3, 3, c4, g).astype(jnp.bfloat16),
        (1, 1), 'SAME', dimension_numbers=dn,
        preferred_element_type=jnp.float32)
    y = _leaky(y * s2 + b2)
    return jnp.concatenate([x, y], axis=-1)


def ref_dense_block(x, layer_params):
    out = x
    for p in layer_params:
        out = ref_dense_layer(out, p)
    return out


# ----------------------------------------------------------------------------
if __name__ == "__main__":
    # DenseBlock(num_layers=2, in_channels=4, grow_rate=8) on (2, 4, 16, 16).
    N, CIN, H, W = 2, 4, 16, 16
    NUM_LAYERS, GROWTH = 2, 8

    key = jax.random.PRNGKey(0)
    kx, kp = jax.random.split(key)
    x_nchw = jax.random.normal(kx, (N, CIN, H, W), jnp.float32)
    x_nhwc = jnp.transpose(x_nchw, (0, 2, 3, 1))  # layout: NCHW -> NHWC

    layer_params = []
    c = CIN
    for _ in range(NUM_LAYERS):
        kp, kl = jax.random.split(kp)
        layer_params.append(init_layer_params(kl, c, GROWTH))
        c += GROWTH
    layer_params = tuple(layer_params)

    fwd = jax.jit(dense_block_forward)
    out = jax.block_until_ready(fwd(x_nhwc, layer_params))
    assert out.shape == (N, H, W, CIN + NUM_LAYERS * GROWTH), out.shape

    ref = ref_dense_block(x_nhwc, layer_params)
    # Tolerance accounts for bf16 matmul operands (mirrored in the reference)
    # and differing f32 accumulation orders; real bugs produce O(0.1+) errors.
    max_err = float(jnp.max(jnp.abs(out - ref)))
    assert jnp.allclose(out, ref, atol=1e-2, rtol=1e-2), max_err

    print("KERNEL_OK")
</pallas_src>

<mosaic_0001>
module attributes {stable_mosaic.version = 11 : i64} {
  func.func @kernel(%arg0: i32, %arg1: memref<1x256x8xf32, #tpu.memory_space<vmem>>, %arg2: memref<8x32xbf16, #tpu.memory_space<vmem>>, %arg3: memref<1x32xf32, #tpu.memory_space<vmem>>, %arg4: memref<1x32xf32, #tpu.memory_space<vmem>>, %arg5: memref<9x32x8xbf16, #tpu.memory_space<vmem>>, %arg6: memref<1x8xf32, #tpu.memory_space<vmem>>, %arg7: memref<1x8xf32, #tpu.memory_space<vmem>>, %arg8: memref<16x32xbf16, #tpu.memory_space<vmem>>, %arg9: memref<1x32xf32, #tpu.memory_space<vmem>>, %arg10: memref<1x32xf32, #tpu.memory_space<vmem>>, %arg11: memref<9x32x8xbf16, #tpu.memory_space<vmem>>, %arg12: memref<1x8xf32, #tpu.memory_space<vmem>>, %arg13: memref<1x8xf32, #tpu.memory_space<vmem>>, %arg14: memref<1x256x20xf32, #tpu.memory_space<vmem>>, %arg15: memref<256x24xbf16, #tpu.memory_space<vmem>>, %arg16: memref<3x288x32xbf16, #tpu.memory_space<vmem>>) attributes {dimension_semantics = [#tpu.dimension_semantics<parallel>], iteration_bounds = array<i64: 2>, scalar_prefetch = 0 : i64, scratch_operands = 2 : i64, tpu.core_type = #tpu.core_type<tc>, window_params = [{transform_indices = @transform_0, window_bounds = array<i64: 1, 256, 8>}, {pipeline_mode = #tpu.pipeline_mode<synchronous>, transform_indices = @transform_1, window_bounds = array<i64: 8, 32>}, {pipeline_mode = #tpu.pipeline_mode<synchronous>, transform_indices = @transform_2, window_bounds = array<i64: 1, 32>}, {pipeline_mode = #tpu.pipeline_mode<synchronous>, transform_indices = @transform_3, window_bounds = array<i64: 1, 32>}, {pipeline_mode = #tpu.pipeline_mode<synchronous>, transform_indices = @transform_4, window_bounds = array<i64: 9, 32, 8>}, {pipeline_mode = #tpu.pipeline_mode<synchronous>, transform_indices = @transform_5, window_bounds = array<i64: 1, 8>}, {pipeline_mode = #tpu.pipeline_mode<synchronous>, transform_indices = @transform_6, window_bounds = array<i64: 1, 8>}, {pipeline_mode = #tpu.pipeline_mode<synchronous>, transform_indices = @transform_7, window_bounds = array<i64: 16, 32>}, {pipeline_mode = #tpu.pipeline_mode<synchronous>, transform_indices = @transform_8, window_bounds = array<i64: 1, 32>}, {pipeline_mode = #tpu.pipeline_mode<synchronous>, transform_indices = @transform_9, window_bounds = array<i64: 1, 32>}, {pipeline_mode = #tpu.pipeline_mode<synchronous>, transform_indices = @transform_10, window_bounds = array<i64: 9, 32, 8>}, {pipeline_mode = #tpu.pipeline_mode<synchronous>, transform_indices = @transform_11, window_bounds = array<i64: 1, 8>}, {pipeline_mode = #tpu.pipeline_mode<synchronous>, transform_indices = @transform_12, window_bounds = array<i64: 1, 8>}, {transform_indices = @transform_13, window_bounds = array<i64: 1, 256, 20>}]} {
    %cst = arith.constant 0.000000e+00 : bf16
    %0 = vector.broadcast %cst : bf16 to vector<3x16x32xbf16>
    %c0 = arith.constant 0 : index
    %c0_0 = arith.constant 0 : index
    %c0_1 = arith.constant 0 : index
    %1 = vector.load %arg16[%c0, %c0_0, %c0_1] : memref<3x288x32xbf16, #tpu.memory_space<vmem>>, vector<3x16x32xbf16>
    tpu.vector_store %arg16[%c0, %c0_0, %c0_1], %0 {strides = array<i32>} : memref<3x288x32xbf16, #tpu.memory_space<vmem>>, vector<3x16x32xbf16>,
    %c0_2 = arith.constant 0 : index
    %c272 = arith.constant 272 : index
    %c0_3 = arith.constant 0 : index
    %2 = vector.load %arg16[%c0_2, %c272, %c0_3] : memref<3x288x32xbf16, #tpu.memory_space<vmem>>, vector<3x16x32xbf16>
    tpu.vector_store %arg16[%c0_2, %c272, %c0_3], %0 {strides = array<i32>} : memref<3x288x32xbf16, #tpu.memory_space<vmem>>, vector<3x16x32xbf16>,
    %c0_4 = arith.constant 0 : index
    %c0_5 = arith.constant 0 : index
    %c0_6 = arith.constant 0 : index
    %3 = vector.load %arg1[%c0_4, %c0_5, %c0_6] : memref<1x256x8xf32, #tpu.memory_space<vmem>>, vector<1x256x8xf32>
    %4 = vector.shape_cast %3 : vector<1x256x8xf32> to vector<256x8xf32>
    %5 = arith.truncf %4 : vector<256x8xf32> to vector<256x8xbf16>
    %c0_7 = arith.constant 0 : index
    %c0_8 = arith.constant 0 : index
    %6 = vector.load %arg15[%c0_7, %c0_8] : memref<256x24xbf16, #tpu.memory_space<vmem>>, vector<256x8xbf16>
    tpu.vector_store %arg15[%c0_7, %c0_8], %5 {strides = array<i32>} : memref<256x24xbf16, #tpu.memory_space<vmem>>, vector<256x8xbf16>,
    %7 = vector.extract_strided_slice %4 {offsets = [0, 0], sizes = [256, 4], strides = [1, 1]} : vector<256x8xf32> to vector<256x4xf32>
    %c0_9 = arith.constant 0 : index
    %c0_10 = arith.constant 0 : index
    %c0_11 = arith.constant 0 : index
    %8 = vector.load %arg14[%c0_9, %c0_10, %c0_11] : memref<1x256x20xf32, #tpu.memory_space<vmem>>, vector<1x256x4xf32>
    %9 = vector.shape_cast %8 : vector<1x256x4xf32> to vector<256x4xf32>
    %10 = vector.shape_cast %7 : vector<256x4xf32> to vector<1x256x4xf32>
    tpu.vector_store %arg14[%c0_9, %c0_10, %c0_11], %10 {strides = array<i32>} : memref<1x256x20xf32, #tpu.memory_space<vmem>>, vector<1x256x4xf32>,
    %11 = tpu.iota {dimensions = array<i32: 0>} : vector<256x1xi32>
    %c16_i32 = arith.constant 16 : i32
    %c0_i32 = arith.constant 0 : i32
    %12 = arith.cmpi eq, %c16_i32, %c0_i32 : i32
    %c1_i32 = arith.constant 1 : i32
    %13 = arith.select %12, %c1_i32, %c16_i32 : i32
    %14 = vector.broadcast %13 : i32 to vector<256x1xi32>
    %15 = arith.remsi %11, %14 : vector<256x1xi32>
    %c0_i32_12 = arith.constant 0 : i32
    %16 = vector.broadcast %c0_i32_12 : i32 to vector<256x1xi32>
    %17 = arith.cmpi ne, %15, %16 : vector<256x1xi32>
    %c0_i32_13 = arith.constant 0 : i32
    %18 = vector.broadcast %c0_i32_13 : i32 to vector<256x1xi32>
    %19 = arith.cmpi slt, %15, %18 : vector<256x1xi32>
    %c0_i32_14 = arith.constant 0 : i32
    %20 = arith.cmpi slt, %13, %c0_i32_14 : i32
    %21 = vector.broadcast %20 : i1 to vector<256x1xi1>
    %22 = vector.broadcast %21 : vector<256x1xi1> to vector<256x1xi1>
    %23 = arith.xori %19, %22 : vector<256x1xi1>
    %24 = arith.andi %23, %17 : vector<256x1xi1>
    %25 = vector.broadcast %13 : i32 to vector<256x1xi32>
    %26 = arith.addi %15, %25 : vector<256x1xi32>
    %27 = arith.select %24, %26, %15 : vector<256x1xi1>, vector<256x1xi32>
    %c0_i32_15 = arith.constant 0 : i32
    %28 = vector.broadcast %c0_i32_15 : i32 to vector<256x1xi32>
    %29 = arith.cmpi ne, %27, %28 : vector<256x1xi32>
    %30 = arith.extui %29 : vector<256x1xi1> to vector<256x1xi32>
    %31 = arith.sitofp %30 : vector<256x1xi32> to vector<256x1xf32>
    %32 = arith.truncf %31 : vector<256x1xf32> to vector<256x1xbf16>
    %c15_i32 = arith.constant 15 : i32
    %33 = vector.broadcast %c15_i32 : i32 to vector<256x1xi32>
    %34 = arith.cmpi ne, %27, %33 : vector<256x1xi32>
    %35 = arith.extui %34 : vector<256x1xi1> to vector<256x1xi32>
    %36 = arith.sitofp %35 : vector<256x1xi32> to vector<256x1xf32>
    %37 = arith.truncf %36 : vector<256x1xf32> to vector<256x1xbf16>
    %c0_16 = arith.constant 0 : index
    %c0_17 = arith.constant 0 : index
    %38 = vector.load %arg15[%c0_16, %c0_17] : memref<256x24xbf16, #tpu.memory_space<vmem>>, vector<256x8xbf16>
    %c0_18 = arith.constant 0 : index
    %c0_19 = arith.constant 0 : index
    %39 = vector.load %arg2[%c0_18, %c0_19] : memref<8x32xbf16, #tpu.memory_space<vmem>>, vector<8x32xbf16>
    %cst_20 = arith.constant dense<0.000000e+00> : vector<256x32xf32>
    %40 = tpu.matmul %38, %39, %cst_20 {dimension_numbers = #tpu.dot_dimension_numbers<[1], [0], [0], [1], [0, 0, 1, 1], [], []>} : vector<256x8xbf16>, vector<8x32xbf16>, vector<256x32xf32> -> vector<256x32xf32>
    %c0_21 = arith.constant 0 : index
    %c0_22 = arith.constant 0 : index
    %41 = vector.load %arg3[%c0_21, %c0_22] : memref<1x32xf32, #tpu.memory_space<vmem>>, vector<1x32xf32>
    %42 = vector.broadcast %41 : vector<1x32xf32> to vector<256x32xf32>
    %43 = arith.mulf %40, %42 : vector<256x32xf32>
    %c0_23 = arith.constant 0 : index
    %c0_24 = arith.constant 0 : index
    %44 = vector.load %arg4[%c0_23, %c0_24] : memref<1x32xf32, #tpu.memory_space<vmem>>, vector<1x32xf32>
    %45 = vector.broadcast %44 : vector<1x32xf32> to vector<256x32xf32>
    %46 = arith.addf %43, %45 : vector<256x32xf32>
    %cst_25 = arith.constant 0.000000e+00 : f32
    %47 = vector.broadcast %cst_25 : f32 to vector<256x32xf32>
    %48 = arith.cmpf ogt, %46, %47 : vector<256x32xf32>
    %cst_26 = arith.constant 0.00999999977 : f32
    %49 = vector.broadcast %cst_26 : f32 to vector<256x32xf32>
    %50 = arith.mulf %49, %46 : vector<256x32xf32>
    %51 = arith.select %48, %46, %50 : vector<256x32xi1>, vector<256x32xf32>
    %52 = arith.truncf %51 : vector<256x32xf32> to vector<256x32xbf16>
    %c1 = arith.constant 1 : index
    %c16 = arith.constant 16 : index
    %c0_27 = arith.constant 0 : index
    %53 = vector.load %arg16[%c1, %c16, %c0_27] : memref<3x288x32xbf16, #tpu.memory_space<vmem>>, vector<1x256x32xbf16>
    %54 = vector.shape_cast %53 : vector<1x256x32xbf16> to vector<256x32xbf16>
    %55 = vector.shape_cast %52 : vector<256x32xbf16> to vector<1x256x32xbf16>
    tpu.vector_store %arg16[%c1, %c16, %c0_27], %55 {strides = array<i32>} : memref<3x288x32xbf16, #tpu.memory_space<vmem>>, vector<1x256x32xbf16>,
    %c1_28 = arith.constant 1 : index
    %c15 = arith.constant 15 : index
    %c0_29 = arith.constant 0 : index
    %56 = vector.load %arg16[%c1_28, %c15, %c0_29] : memref<3x288x32xbf16, #tpu.memory_space<vmem>>, vector<1x256x32xbf16>
    %57 = vector.shape_cast %56 : vector<1x256x32xbf16> to vector<256x32xbf16>
    %58 = vector.broadcast %32 : vector<256x1xbf16> to vector<256x32xbf16>
    %59 = arith.mulf %57, %58 : vector<256x32xbf16>
    %c1_30 = arith.constant 1 : index
    %c17 = arith.constant 17 : index
    %c0_31 = arith.constant 0 : index
    %60 = vector.load %arg16[%c1_30, %c17, %c0_31] : memref<3x288x32xbf16, #tpu.memory_space<vmem>>, vector<1x256x32xbf16>
    %61 = vector.shape_cast %60 : vector<1x256x32xbf16> to vector<256x32xbf16>
    %62 = vector.broadcast %37 : vector<256x1xbf16> to vector<256x32xbf16>
    %63 = arith.mulf %61, %62 : vector<256x32xbf16>
    %c0_32 = arith.constant 0 : index
    %c16_33 = arith.constant 16 : index
    %c0_34 = arith.constant 0 : index
    %64 = vector.load %arg16[%c0_32, %c16_33, %c0_34] : memref<3x288x32xbf16, #tpu.memory_space<vmem>>, vector<1x256x32xbf16>
    %65 = vector.shape_cast %64 : vector<1x256x32xbf16> to vector<256x32xbf16>
    %66 = vector.shape_cast %59 : vector<256x32xbf16> to vector<1x256x32xbf16>
    tpu.vector_store %arg16[%c0_32, %c16_33, %c0_34], %66 {strides = array<i32>} : memref<3x288x32xbf16, #tpu.memory_space<vmem>>, vector<1x256x32xbf16>,
    %c2 = arith.constant 2 : index
    %c16_35 = arith.constant 16 : index
    %c0_36 = arith.constant 0 : index
    %67 = vector.load %arg16[%c2, %c16_35, %c0_36] : memref<3x288x32xbf16, #tpu.memory_space<vmem>>, vector<1x256x32xbf16>
    %68 = vector.shape_cast %67 : vector<1x256x32xbf16> to vector<256x32xbf16>
    %69 = vector.shape_cast %63 : vector<256x32xbf16> to vector<1x256x32xbf16>
    tpu.vector_store %arg16[%c2, %c16_35, %c0_36], %69 {strides = array<i32>} : memref<3x288x32xbf16, #tpu.memory_space<vmem>>, vector<1x256x32xbf16>,
    %cst_37 = arith.constant 0.000000e+00 : f32
    %70 = vector.broadcast %cst_37 : f32 to vector<256x8xf32>
    %c0_38 = arith.constant 0 : index
    %c0_39 = arith.constant 0 : index
    %c0_40 = arith.constant 0 : index
    %71 = vector.load %arg16[%c0_38, %c0_39, %c0_40] : memref<3x288x32xbf16, #tpu.memory_space<vmem>>, vector<1x256x32xbf16>
    %72 = vector.shape_cast %71 : vector<1x256x32xbf16> to vector<256x32xbf16>
    %c0_41 = arith.constant 0 : index
    %c0_42 = arith.constant 0 : index
    %c0_43 = arith.constant 0 : index
    %73 = vector.load %arg5[%c0_41, %c0_42, %c0_43] : memref<9x32x8xbf16, #tpu.memory_space<vmem>>, vector<1x32x8xbf16>
    %74 = vector.shape_cast %73 : vector<1x32x8xbf16> to vector<32x8xbf16>
    %cst_44 = arith.constant dense<0.000000e+00> : vector<256x8xf32>
    %75 = tpu.matmul %72, %74, %cst_44 {dimension_numbers = #tpu.dot_dimension_numbers<[1], [0], [0], [1], [0, 0, 1, 1], [], []>} : vector<256x32xbf16>, vector<32x8xbf16>, vector<256x8xf32> -> vector<256x8xf32>
    %76 = arith.addf %70, %75 : vector<256x8xf32>
    %c1_45 = arith.constant 1 : index
    %c0_46 = arith.constant 0 : index
    %c0_47 = arith.constant 0 : index
    %77 = vector.load %arg16[%c1_45, %c0_46, %c0_47] : memref<3x288x32xbf16, #tpu.memory_space<vmem>>, vector<1x256x32xbf16>
    %78 = vector.shape_cast %77 : vector<1x256x32xbf16> to vector<256x32xbf16>
    %c1_48 = arith.constant 1 : index
    %c0_49 = arith.constant 0 : index
    %c0_50 = arith.constant 0 : index
    %79 = vector.load %arg5[%c1_48, %c0_49, %c0_50] : memref<9x32x8xbf16, #tpu.memory_space<vmem>>, vector<1x32x8xbf16>
    %80 = vector.shape_cast %79 : vector<1x32x8xbf16> to vector<32x8xbf16>
    %cst_51 = arith.constant dense<0.000000e+00> : vector<256x8xf32>
    %81 = tpu.matmul %78, %80, %cst_51 {dimension_numbers = #tpu.dot_dimension_numbers<[1], [0], [0], [1], [0, 0, 1, 1], [], []>} : vector<256x32xbf16>, vector<32x8xbf16>, vector<256x8xf32> -> vector<256x8xf32>
    %82 = arith.addf %76, %81 : vector<256x8xf32>
    %c2_52 = arith.constant 2 : index
    %c0_53 = arith.constant 0 : index
    %c0_54 = arith.constant 0 : index
    %83 = vector.load %arg16[%c2_52, %c0_53, %c0_54] : memref<3x288x32xbf16, #tpu.memory_space<vmem>>, vector<1x256x32xbf16>
    %84 = vector.shape_cast %83 : vector<1x256x32xbf16> to vector<256x32xbf16>
    %c2_55 = arith.constant 2 : index
    %c0_56 = arith.constant 0 : index
    %c0_57 = arith.constant 0 : index
    %85 = vector.load %arg5[%c2_55, %c0_56, %c0_57] : memref<9x32x8xbf16, #tpu.memory_space<vmem>>, vector<1x32x8xbf16>
    %86 = vector.shape_cast %85 : vector<1x32x8xbf16> to vector<32x8xbf16>
    %cst_58 = arith.constant dense<0.000000e+00> : vector<256x8xf32>
    %87 = tpu.matmul %84, %86, %cst_58 {dimension_numbers = #tpu.dot_dimension_numbers<[1], [0], [0], [1], [0, 0, 1, 1], [], []>} : vector<256x32xbf16>, vector<32x8xbf16>, vector<256x8xf32> -> vector<256x8xf32>
    %88 = arith.addf %82, %87 : vector<256x8xf32>
    %c0_59 = arith.constant 0 : index
    %c16_60 = arith.constant 16 : index
    %c0_61 = arith.constant 0 : index
    %89 = vector.load %arg16[%c0_59, %c16_60, %c0_61] : memref<3x288x32xbf16, #tpu.memory_space<vmem>>, vector<1x256x32xbf16>
    %90 = vector.shape_cast %89 : vector<1x256x32xbf16> to vector<256x32xbf16>
    %c3 = arith.constant 3 : index
    %c0_62 = arith.constant 0 : index
    %c0_63 = arith.constant 0 : index
    %91 = vector.load %arg5[%c3, %c0_62, %c0_63] : memref<9x32x8xbf16, #tpu.memory_space<vmem>>, vector<1x32x8xbf16>
    %92 = vector.shape_cast %91 : vector<1x32x8xbf16> to vector<32x8xbf16>
    %cst_64 = arith.constant dense<0.000000e+00> : vector<256x8xf32>
    %93 = tpu.matmul %90, %92, %cst_64 {dimension_numbers = #tpu.dot_dimension_numbers<[1], [0], [0], [1], [0, 0, 1, 1], [], []>} : vector<256x32xbf16>, vector<32x8xbf16>, vector<256x8xf32> -> vector<256x8xf32>
    %94 = arith.addf %88, %93 : vector<256x8xf32>
    %c1_65 = arith.constant 1 : index
    %c16_66 = arith.constant 16 : index
    %c0_67 = arith.constant 0 : index
    %95 = vector.load %arg16[%c1_65, %c16_66, %c0_67] : memref<3x288x32xbf16, #tpu.memory_space<vmem>>, vector<1x256x32xbf16>
    %96 = vector.shape_cast %95 : vector<1x256x32xbf16> to vector<256x32xbf16>
    %c4 = arith.constant 4 : index
    %c0_68 = arith.constant 0 : index
    %c0_69 = arith.constant 0 : index
    %97 = vector.load %arg5[%c4, %c0_68, %c0_69] : memref<9x32x8xbf16, #tpu.memory_space<vmem>>, vector<1x32x8xbf16>
    %98 = vector.shape_cast %97 : vector<1x32x8xbf16> to vector<32x8xbf16>
    %cst_70 = arith.constant dense<0.000000e+00> : vector<256x8xf32>
    %99 = tpu.matmul %96, %98, %cst_70 {dimension_numbers = #tpu.dot_dimension_numbers<[1], [0], [0], [1], [0, 0, 1, 1], [], []>} : vector<256x32xbf16>, vector<32x8xbf16>, vector<256x8xf32> -> vector<256x8xf32>
    %100 = arith.addf %94, %99 : vector<256x8xf32>
    %c2_71 = arith.constant 2 : index
    %c16_72 = arith.constant 16 : index
    %c0_73 = arith.constant 0 : index
    %101 = vector.load %arg16[%c2_71, %c16_72, %c0_73] : memref<3x288x32xbf16, #tpu.memory_space<vmem>>, vector<1x256x32xbf16>
    %102 = vector.shape_cast %101 : vector<1x256x32xbf16> to vector<256x32xbf16>
    %c5 = arith.constant 5 : index
    %c0_74 = arith.constant 0 : index
    %c0_75 = arith.constant 0 : index
    %103 = vector.load %arg5[%c5, %c0_74, %c0_75] : memref<9x32x8xbf16, #tpu.memory_space<vmem>>, vector<1x32x8xbf16>
    %104 = vector.shape_cast %103 : vector<1x32x8xbf16> to vector<32x8xbf16>
    %cst_76 = arith.constant dense<0.000000e+00> : vector<256x8xf32>
    %105 = tpu.matmul %102, %104, %cst_76 {dimension_numbers = #tpu.dot_dimension_numbers<[1], [0], [0], [1], [0, 0, 1, 1], [], []>} : vector<256x32xbf16>, vector<32x8xbf16>, vector<256x8xf32> -> vector<256x8xf32>
    %106 = arith.addf %100, %105 : vector<256x8xf32>
    %c0_77 = arith.constant 0 : index
    %c32 = arith.constant 32 : index
    %c0_78 = arith.constant 0 : index
    %107 = vector.load %arg16[%c0_77, %c32, %c0_78] : memref<3x288x32xbf16, #tpu.memory_space<vmem>>, vector<1x256x32xbf16>
    %108 = vector.shape_cast %107 : vector<1x256x32xbf16> to vector<256x32xbf16>
    %c6 = arith.constant 6 : index
    %c0_79 = arith.constant 0 : index
    %c0_80 = arith.constant 0 : index
    %109 = vector.load %arg5[%c6, %c0_79, %c0_80] : memref<9x32x8xbf16, #tpu.memory_space<vmem>>, vector<1x32x8xbf16>
    %110 = vector.shape_cast %109 : vector<1x32x8xbf16> to vector<32x8xbf16>
    %cst_81 = arith.constant dense<0.000000e+00> : vector<256x8xf32>
    %111 = tpu.matmul %108, %110, %cst_81 {dimension_numbers = #tpu.dot_dimension_numbers<[1], [0], [0], [1], [0, 0, 1, 1], [], []>} : vector<256x32xbf16>, vector<32x8xbf16>, vector<256x8xf32> -> vector<256x8xf32>
    %112 = arith.addf %106, %111 : vector<256x8xf32>
    %c1_82 = arith.constant 1 : index
    %c32_83 = arith.constant 32 : index
    %c0_84 = arith.constant 0 : index
    %113 = vector.load %arg16[%c1_82, %c32_83, %c0_84] : memref<3x288x32xbf16, #tpu.memory_space<vmem>>, vector<1x256x32xbf16>
    %114 = vector.shape_cast %113 : vector<1x256x32xbf16> to vector<256x32xbf16>
    %c7 = arith.constant 7 : index
    %c0_85 = arith.constant 0 : index
    %c0_86 = arith.constant 0 : index
    %115 = vector.load %arg5[%c7, %c0_85, %c0_86] : memref<9x32x8xbf16, #tpu.memory_space<vmem>>, vector<1x32x8xbf16>
    %116 = vector.shape_cast %115 : vector<1x32x8xbf16> to vector<32x8xbf16>
    %cst_87 = arith.constant dense<0.000000e+00> : vector<256x8xf32>
    %117 = tpu.matmul %114, %116, %cst_87 {dimension_numbers = #tpu.dot_dimension_numbers<[1], [0], [0], [1], [0, 0, 1, 1], [], []>} : vector<256x32xbf16>, vector<32x8xbf16>, vector<256x8xf32> -> vector<256x8xf32>
    %118 = arith.addf %112, %117 : vector<256x8xf32>
    %c2_88 = arith.constant 2 : index
    %c32_89 = arith.constant 32 : index
    %c0_90 = arith.constant 0 : index
    %119 = vector.load %arg16[%c2_88, %c32_89, %c0_90] : memref<3x288x32xbf16, #tpu.memory_space<vmem>>, vector<1x256x32xbf16>
    %120 = vector.shape_cast %119 : vector<1x256x32xbf16> to vector<256x32xbf16>
    %c8 = arith.constant 8 : index
    %c0_91 = arith.constant 0 : index
    %c0_92 = arith.constant 0 : index
    %121 = vector.load %arg5[%c8, %c0_91, %c0_92] : memref<9x32x8xbf16, #tpu.memory_space<vmem>>, vector<1x32x8xbf16>
    %122 = vector.shape_cast %121 : vector<1x32x8xbf16> to vector<32x8xbf16>
    %cst_93 = arith.constant dense<0.000000e+00> : vector<256x8xf32>
    %123 = tpu.matmul %120, %122, %cst_93 {dimension_numbers = #tpu.dot_dimension_numbers<[1], [0], [0], [1], [0, 0, 1, 1], [], []>} : vector<256x32xbf16>, vector<32x8xbf16>, vector<256x8xf32> -> vector<256x8xf32>
    %124 = arith.addf %118, %123 : vector<256x8xf32>
    %c0_94 = arith.constant 0 : index
    %c0_95 = arith.constant 0 : index
    %125 = vector.load %arg6[%c0_94, %c0_95] : memref<1x8xf32, #tpu.memory_space<vmem>>, vector<1x8xf32>
    %126 = vector.broadcast %125 : vector<1x8xf32> to vector<256x8xf32>
    %127 = arith.mulf %124, %126 : vector<256x8xf32>
    %c0_96 = arith.constant 0 : index
    %c0_97 = arith.constant 0 : index
    %128 = vector.load %arg7[%c0_96, %c0_97] : memref<1x8xf32, #tpu.memory_space<vmem>>, vector<1x8xf32>
    %129 = vector.broadcast %128 : vector<1x8xf32> to vector<256x8xf32>
    %130 = arith.addf %127, %129 : vector<256x8xf32>
    %cst_98 = arith.constant 0.000000e+00 : f32
    %131 = vector.broadcast %cst_98 : f32 to vector<256x8xf32>
    %132 = arith.cmpf ogt, %130, %131 : vector<256x8xf32>
    %cst_99 = arith.constant 0.00999999977 : f32
    %133 = vector.broadcast %cst_99 : f32 to vector<256x8xf32>
    %134 = arith.mulf %133, %130 : vector<256x8xf32>
    %135 = arith.select %132, %130, %134 : vector<256x8xi1>, vector<256x8xf32>
    %c0_100 = arith.constant 0 : index
    %c0_101 = arith.constant 0 : index
    %c4_102 = arith.constant 4 : index
    %136 = vector.load %arg14[%c0_100, %c0_101, %c4_102] : memref<1x256x20xf32, #tpu.memory_space<vmem>>, vector<1x256x8xf32>
    %137 = vector.shape_cast %136 : vector<1x256x8xf32> to vector<256x8xf32>
    %138 = vector.shape_cast %135 : vector<256x8xf32> to vector<1x256x8xf32>
    tpu.vector_store %arg14[%c0_100, %c0_101, %c4_102], %138 {strides = array<i32>} : memref<1x256x20xf32, #tpu.memory_space<vmem>>, vector<1x256x8xf32>,
    %139 = arith.truncf %135 : vector<256x8xf32> to vector<256x8xbf16>
    %c0_103 = arith.constant 0 : index
    %c8_104 = arith.constant 8 : index
    %140 = vector.load %arg15[%c0_103, %c8_104] : memref<256x24xbf16, #tpu.memory_space<vmem>>, vector<256x8xbf16>
    tpu.vector_store %arg15[%c0_103, %c8_104], %139 {strides = array<i32>} : memref<256x24xbf16, #tpu.memory_space<vmem>>, vector<256x8xbf16>,
    %c0_105 = arith.constant 0 : index
    %c0_106 = arith.constant 0 : index
    %141 = vector.load %arg15[%c0_105, %c0_106] : memref<256x24xbf16, #tpu.memory_space<vmem>>, vector<256x16xbf16>
    %c0_107 = arith.constant 0 : index
    %c0_108 = arith.constant 0 : index
    %142 = vector.load %arg8[%c0_107, %c0_108] : memref<16x32xbf16, #tpu.memory_space<vmem>>, vector<16x32xbf16>
    %cst_109 = arith.constant dense<0.000000e+00> : vector<256x32xf32>
    %143 = tpu.matmul %141, %142, %cst_109 {dimension_numbers = #tpu.dot_dimension_numbers<[1], [0], [0], [1], [0, 0, 1, 1], [], []>} : vector<256x16xbf16>, vector<16x32xbf16>, vector<256x32xf32> -> vector<256x32xf32>
    %c0_110 = arith.constant 0 : index
    %c0_111 = arith.constant 0 : index
    %144 = vector.load %arg9[%c0_110, %c0_111] : memref<1x32xf32, #tpu.memory_space<vmem>>, vector<1x32xf32>
    %145 = vector.broadcast %144 : vector<1x32xf32> to vector<256x32xf32>
    %146 = arith.mulf %143, %145 : vector<256x32xf32>
    %c0_112 = arith.constant 0 : index
    %c0_113 = arith.constant 0 : index
    %147 = vector.load %arg10[%c0_112, %c0_113] : memref<1x32xf32, #tpu.memory_space<vmem>>, vector<1x32xf32>
    %148 = vector.broadcast %147 : vector<1x32xf32> to vector<256x32xf32>
    %149 = arith.addf %146, %148 : vector<256x32xf32>
    %cst_114 = arith.constant 0.000000e+00 : f32
    %150 = vector.broadcast %cst_114 : f32 to vector<256x32xf32>
    %151 = arith.cmpf ogt, %149, %150 : vector<256x32xf32>
    %cst_115 = arith.constant 0.00999999977 : f32
    %152 = vector.broadcast %cst_115 : f32 to vector<256x32xf32>
    %153 = arith.mulf %152, %149 : vector<256x32xf32>
    %154 = arith.select %151, %149, %153 : vector<256x32xi1>, vector<256x32xf32>
    %155 = arith.truncf %154 : vector<256x32xf32> to vector<256x32xbf16>
    %c1_116 = arith.constant 1 : index
    %c16_117 = arith.constant 16 : index
    %c0_118 = arith.constant 0 : index
    %156 = vector.load %arg16[%c1_116, %c16_117, %c0_118] : memref<3x288x32xbf16, #tpu.memory_space<vmem>>, vector<1x256x32xbf16>
    %157 = vector.shape_cast %156 : vector<1x256x32xbf16> to vector<256x32xbf16>
    %158 = vector.shape_cast %155 : vector<256x32xbf16> to vector<1x256x32xbf16>
    tpu.vector_store %arg16[%c1_116, %c16_117, %c0_118], %158 {strides = array<i32>} : memref<3x288x32xbf16, #tpu.memory_space<vmem>>, vector<1x256x32xbf16>,
    %c1_119 = arith.constant 1 : index
    %c15_120 = arith.constant 15 : index
    %c0_121 = arith.constant 0 : index
    %159 = vector.load %arg16[%c1_119, %c15_120, %c0_121] : memref<3x288x32xbf16, #tpu.memory_space<vmem>>, vector<1x256x32xbf16>
    %160 = vector.shape_cast %159 : vector<1x256x32xbf16> to vector<256x32xbf16>
    %161 = vector.broadcast %32 : vector<256x1xbf16> to vector<256x32xbf16>
    %162 = arith.mulf %160, %161 : vector<256x32xbf16>
    %c1_122 = arith.constant 1 : index
    %c17_123 = arith.constant 17 : index
    %c0_124 = arith.constant 0 : index
    %163 = vector.load %arg16[%c1_122, %c17_123, %c0_124] : memref<3x288x32xbf16, #tpu.memory_space<vmem>>, vector<1x256x32xbf16>
    %164 = vector.shape_cast %163 : vector<1x256x32xbf16> to vector<256x32xbf16>
    %165 = vector.broadcast %37 : vector<256x1xbf16> to vector<256x32xbf16>
    %166 = arith.mulf %164, %165 : vector<256x32xbf16>
    %c0_125 = arith.constant 0 : index
    %c16_126 = arith.constant 16 : index
    %c0_127 = arith.constant 0 : index
    %167 = vector.load %arg16[%c0_125, %c16_126, %c0_127] : memref<3x288x32xbf16, #tpu.memory_space<vmem>>, vector<1x256x32xbf16>
    %168 = vector.shape_cast %167 : vector<1x256x32xbf16> to vector<256x32xbf16>
    %169 = vector.shape_cast %162 : vector<256x32xbf16> to vector<1x256x32xbf16>
    tpu.vector_store %arg16[%c0_125, %c16_126, %c0_127], %169 {strides = array<i32>} : memref<3x288x32xbf16, #tpu.memory_space<vmem>>, vector<1x256x32xbf16>,
    %c2_128 = arith.constant 2 : index
    %c16_129 = arith.constant 16 : index
    %c0_130 = arith.constant 0 : index
    %170 = vector.load %arg16[%c2_128, %c16_129, %c0_130] : memref<3x288x32xbf16, #tpu.memory_space<vmem>>, vector<1x256x32xbf16>
    %171 = vector.shape_cast %170 : vector<1x256x32xbf16> to vector<256x32xbf16>
    %172 = vector.shape_cast %166 : vector<256x32xbf16> to vector<1x256x32xbf16>
    tpu.vector_store %arg16[%c2_128, %c16_129, %c0_130], %172 {strides = array<i32>} : memref<3x288x32xbf16, #tpu.memory_space<vmem>>, vector<1x256x32xbf16>,
    %cst_131 = arith.constant 0.000000e+00 : f32
    %173 = vector.broadcast %cst_131 : f32 to vector<256x8xf32>
    %c0_132 = arith.constant 0 : index
    %c0_133 = arith.constant 0 : index
    %c0_134 = arith.constant 0 : index
    %174 = vector.load %arg16[%c0_132, %c0_133, %c0_134] : memref<3x288x32xbf16, #tpu.memory_space<vmem>>, vector<1x256x32xbf16>
    %175 = vector.shape_cast %174 : vector<1x256x32xbf16> to vector<256x32xbf16>
    %c0_135 = arith.constant 0 : index
    %c0_136 = arith.constant 0 : index
    %c0_137 = arith.constant 0 : index
    %176 = vector.load %arg11[%c0_135, %c0_136, %c0_137] : memref<9x32x8xbf16, #tpu.memory_space<vmem>>, vector<1x32x8xbf16>
    %177 = vector.shape_cast %176 : vector<1x32x8xbf16> to vector<32x8xbf16>
    %cst_138 = arith.constant dense<0.000000e+00> : vector<256x8xf32>
    %178 = tpu.matmul %175, %177, %cst_138 {dimension_numbers = #tpu.dot_dimension_numbers<[1], [0], [0], [1], [0, 0, 1, 1], [], []>} : vector<256x32xbf16>, vector<32x8xbf16>, vector<256x8xf32> -> vector<256x8xf32>
    %179 = arith.addf %173, %178 : vector<256x8xf32>
    %c1_139 = arith.constant 1 : index
    %c0_140 = arith.constant 0 : index
    %c0_141 = arith.constant 0 : index
    %180 = vector.load %arg16[%c1_139, %c0_140, %c0_141] : memref<3x288x32xbf16, #tpu.memory_space<vmem>>, vector<1x256x32xbf16>
    %181 = vector.shape_cast %180 : vector<1x256x32xbf16> to vector<256x32xbf16>
    %c1_142 = arith.constant 1 : index
    %c0_143 = arith.constant 0 : index
    %c0_144 = arith.constant 0 : index
    %182 = vector.load %arg11[%c1_142, %c0_143, %c0_144] : memref<9x32x8xbf16, #tpu.memory_space<vmem>>, vector<1x32x8xbf16>
    %183 = vector.shape_cast %182 : vector<1x32x8xbf16> to vector<32x8xbf16>
    %cst_145 = arith.constant dense<0.000000e+00> : vector<256x8xf32>
    %184 = tpu.matmul %181, %183, %cst_145 {dimension_numbers = #tpu.dot_dimension_numbers<[1], [0], [0], [1], [0, 0, 1, 1], [], []>} : vector<256x32xbf16>, vector<32x8xbf16>, vector<256x8xf32> -> vector<256x8xf32>
    %185 = arith.addf %179, %184 : vector<256x8xf32>
    %c2_146 = arith.constant 2 : index
    %c0_147 = arith.constant 0 : index
    %c0_148 = arith.constant 0 : index
    %186 = vector.load %arg16[%c2_146, %c0_147, %c0_148] : memref<3x288x32xbf16, #tpu.memory_space<vmem>>, vector<1x256x32xbf16>
    %187 = vector.shape_cast %186 : vector<1x256x32xbf16> to vector<256x32xbf16>
    %c2_149 = arith.constant 2 : index
    %c0_150 = arith.constant 0 : index
    %c0_151 = arith.constant 0 : index
    %188 = vector.load %arg11[%c2_149, %c0_150, %c0_151] : memref<9x32x8xbf16, #tpu.memory_space<vmem>>, vector<1x32x8xbf16>
    %189 = vector.shape_cast %188 : vector<1x32x8xbf16> to vector<32x8xbf16>
    %cst_152 = arith.constant dense<0.000000e+00> : vector<256x8xf32>
    %190 = tpu.matmul %187, %189, %cst_152 {dimension_numbers = #tpu.dot_dimension_numbers<[1], [0], [0], [1], [0, 0, 1, 1], [], []>} : vector<256x32xbf16>, vector<32x8xbf16>, vector<256x8xf32> -> vector<256x8xf32>
    %191 = arith.addf %185, %190 : vector<256x8xf32>
    %c0_153 = arith.constant 0 : index
    %c16_154 = arith.constant 16 : index
    %c0_155 = arith.constant 0 : index
    %192 = vector.load %arg16[%c0_153, %c16_154, %c0_155] : memref<3x288x32xbf16, #tpu.memory_space<vmem>>, vector<1x256x32xbf16>
    %193 = vector.shape_cast %192 : vector<1x256x32xbf16> to vector<256x32xbf16>
    %c3_156 = arith.constant 3 : index
    %c0_157 = arith.constant 0 : index
    %c0_158 = arith.constant 0 : index
    %194 = vector.load %arg11[%c3_156, %c0_157, %c0_158] : memref<9x32x8xbf16, #tpu.memory_space<vmem>>, vector<1x32x8xbf16>
    %195 = vector.shape_cast %194 : vector<1x32x8xbf16> to vector<32x8xbf16>
    %cst_159 = arith.constant dense<0.000000e+00> : vector<256x8xf32>
    %196 = tpu.matmul %193, %195, %cst_159 {dimension_numbers = #tpu.dot_dimension_numbers<[1], [0], [0], [1], [0, 0, 1, 1], [], []>} : vector<256x32xbf16>, vector<32x8xbf16>, vector<256x8xf32> -> vector<256x8xf32>
    %197 = arith.addf %191, %196 : vector<256x8xf32>
    %c1_160 = arith.constant 1 : index
    %c16_161 = arith.constant 16 : index
    %c0_162 = arith.constant 0 : index
    %198 = vector.load %arg16[%c1_160, %c16_161, %c0_162] : memref<3x288x32xbf16, #tpu.memory_space<vmem>>, vector<1x256x32xbf16>
    %199 = vector.shape_cast %198 : vector<1x256x32xbf16> to vector<256x32xbf16>
    %c4_163 = arith.constant 4 : index
    %c0_164 = arith.constant 0 : index
    %c0_165 = arith.constant 0 : index
    %200 = vector.load %arg11[%c4_163, %c0_164, %c0_165] : memref<9x32x8xbf16, #tpu.memory_space<vmem>>, vector<1x32x8xbf16>
    %201 = vector.shape_cast %200 : vector<1x32x8xbf16> to vector<32x8xbf16>
    %cst_166 = arith.constant dense<0.000000e+00> : vector<256x8xf32>
    %202 = tpu.matmul %199, %201, %cst_166 {dimension_numbers = #tpu.dot_dimension_numbers<[1], [0], [0], [1], [0, 0, 1, 1], [], []>} : vector<256x32xbf16>, vector<32x8xbf16>, vector<256x8xf32> -> vector<256x8xf32>
    %203 = arith.addf %197, %202 : vector<256x8xf32>
    %c2_167 = arith.constant 2 : index
    %c16_168 = arith.constant 16 : index
    %c0_169 = arith.constant 0 : index
    %204 = vector.load %arg16[%c2_167, %c16_168, %c0_169] : memref<3x288x32xbf16, #tpu.memory_space<vmem>>, vector<1x256x32xbf16>
    %205 = vector.shape_cast %204 : vector<1x256x32xbf16> to vector<256x32xbf16>
    %c5_170 = arith.constant 5 : index
    %c0_171 = arith.constant 0 : index
    %c0_172 = arith.constant 0 : index
    %206 = vector.load %arg11[%c5_170, %c0_171, %c0_172] : memref<9x32x8xbf16, #tpu.memory_space<vmem>>, vector<1x32x8xbf16>
    %207 = vector.shape_cast %206 : vector<1x32x8xbf16> to vector<32x8xbf16>
    %cst_173 = arith.constant dense<0.000000e+00> : vector<256x8xf32>
    %208 = tpu.matmul %205, %207, %cst_173 {dimension_numbers = #tpu.dot_dimension_numbers<[1], [0], [0], [1], [0, 0, 1, 1], [], []>} : vector<256x32xbf16>, vector<32x8xbf16>, vector<256x8xf32> -> vector<256x8xf32>
    %209 = arith.addf %203, %208 : vector<256x8xf32>
    %c0_174 = arith.constant 0 : index
    %c32_175 = arith.constant 32 : index
    %c0_176 = arith.constant 0 : index
    %210 = vector.load %arg16[%c0_174, %c32_175, %c0_176] : memref<3x288x32xbf16, #tpu.memory_space<vmem>>, vector<1x256x32xbf16>
    %211 = vector.shape_cast %210 : vector<1x256x32xbf16> to vector<256x32xbf16>
    %c6_177 = arith.constant 6 : index
    %c0_178 = arith.constant 0 : index
    %c0_179 = arith.constant 0 : index
    %212 = vector.load %arg11[%c6_177, %c0_178, %c0_179] : memref<9x32x8xbf16, #tpu.memory_space<vmem>>, vector<1x32x8xbf16>
    %213 = vector.shape_cast %212 : vector<1x32x8xbf16> to vector<32x8xbf16>
    %cst_180 = arith.constant dense<0.000000e+00> : vector<256x8xf32>
    %214 = tpu.matmul %211, %213, %cst_180 {dimension_numbers = #tpu.dot_dimension_numbers<[1], [0], [0], [1], [0, 0, 1, 1], [], []>} : vector<256x32xbf16>, vector<32x8xbf16>, vector<256x8xf32> -> vector<256x8xf32>
    %215 = arith.addf %209, %214 : vector<256x8xf32>
    %c1_181 = arith.constant 1 : index
    %c32_182 = arith.constant 32 : index
    %c0_183 = arith.constant 0 : index
    %216 = vector.load %arg16[%c1_181, %c32_182, %c0_183] : memref<3x288x32xbf16, #tpu.memory_space<vmem>>, vector<1x256x32xbf16>
    %217 = vector.shape_cast %216 : vector<1x256x32xbf16> to vector<256x32xbf16>
    %c7_184 = arith.constant 7 : index
    %c0_185 = arith.constant 0 : index
    %c0_186 = arith.constant 0 : index
    %218 = vector.load %arg11[%c7_184, %c0_185, %c0_186] : memref<9x32x8xbf16, #tpu.memory_space<vmem>>, vector<1x32x8xbf16>
    %219 = vector.shape_cast %218 : vector<1x32x8xbf16> to vector<32x8xbf16>
    %cst_187 = arith.constant dense<0.000000e+00> : vector<256x8xf32>
    %220 = tpu.matmul %217, %219, %cst_187 {dimension_numbers = #tpu.dot_dimension_numbers<[1], [0], [0], [1], [0, 0, 1, 1], [], []>} : vector<256x32xbf16>, vector<32x8xbf16>, vector<256x8xf32> -> vector<256x8xf32>
    %221 = arith.addf %215, %220 : vector<256x8xf32>
    %c2_188 = arith.constant 2 : index
    %c32_189 = arith.constant 32 : index
    %c0_190 = arith.constant 0 : index
    %222 = vector.load %arg16[%c2_188, %c32_189, %c0_190] : memref<3x288x32xbf16, #tpu.memory_space<vmem>>, vector<1x256x32xbf16>
    %223 = vector.shape_cast %222 : vector<1x256x32xbf16> to vector<256x32xbf16>
    %c8_191 = arith.constant 8 : index
    %c0_192 = arith.constant 0 : index
    %c0_193 = arith.constant 0 : index
    %224 = vector.load %arg11[%c8_191, %c0_192, %c0_193] : memref<9x32x8xbf16, #tpu.memory_space<vmem>>, vector<1x32x8xbf16>
    %225 = vector.shape_cast %224 : vector<1x32x8xbf16> to vector<32x8xbf16>
    %cst_194 = arith.constant dense<0.000000e+00> : vector<256x8xf32>
    %226 = tpu.matmul %223, %225, %cst_194 {dimension_numbers = #tpu.dot_dimension_numbers<[1], [0], [0], [1], [0, 0, 1, 1], [], []>} : vector<256x32xbf16>, vector<32x8xbf16>, vector<256x8xf32> -> vector<256x8xf32>
    %227 = arith.addf %221, %226 : vector<256x8xf32>
    %c0_195 = arith.constant 0 : index
    %c0_196 = arith.constant 0 : index
    %228 = vector.load %arg12[%c0_195, %c0_196] : memref<1x8xf32, #tpu.memory_space<vmem>>, vector<1x8xf32>
    %229 = vector.broadcast %228 : vector<1x8xf32> to vector<256x8xf32>
    %230 = arith.mulf %227, %229 : vector<256x8xf32>
    %c0_197 = arith.constant 0 : index
    %c0_198 = arith.constant 0 : index
    %231 = vector.load %arg13[%c0_197, %c0_198] : memref<1x8xf32, #tpu.memory_space<vmem>>, vector<1x8xf32>
    %232 = vector.broadcast %231 : vector<1x8xf32> to vector<256x8xf32>
    %233 = arith.addf %230, %232 : vector<256x8xf32>
    %cst_199 = arith.constant 0.000000e+00 : f32
    %234 = vector.broadcast %cst_199 : f32 to vector<256x8xf32>
    %235 = arith.cmpf ogt, %233, %234 : vector<256x8xf32>
    %cst_200 = arith.constant 0.00999999977 : f32
    %236 = vector.broadcast %cst_200 : f32 to vector<256x8xf32>
    %237 = arith.mulf %236, %233 : vector<256x8xf32>
    %238 = arith.select %235, %233, %237 : vector<256x8xi1>, vector<256x8xf32>
    %c0_201 = arith.constant 0 : index
    %c0_202 = arith.constant 0 : index
    %c12 = arith.constant 12 : index
    %239 = vector.load %arg14[%c0_201, %c0_202, %c12] : memref<1x256x20xf32, #tpu.memory_space<vmem>>, vector<1x256x8xf32>
    %240 = vector.shape_cast %239 : vector<1x256x8xf32> to vector<256x8xf32>
    %241 = vector.shape_cast %238 : vector<256x8xf32> to vector<1x256x8xf32>
    tpu.vector_store %arg14[%c0_201, %c0_202, %c12], %241 {strides = array<i32>} : memref<1x256x20xf32, #tpu.memory_space<vmem>>, vector<1x256x8xf32>,
    return
  }
  func.func @transform_0(%arg0: i32) -> (i32, i32, i32) {
    %c0_i32 = arith.constant 0 : i32
    %c0_i32_0 = arith.constant 0 : i32
    %c0_i32_1 = arith.constant 0 : i32
    return %arg0, %c0_i32, %c0_i32_0 : i32, i32, i32
  }
  func.func @transform_1(%arg0: i32) -> (i32, i32) {
    %c0_i32 = arith.constant 0 : i32
    %c0_i32_0 = arith.constant 0 : i32
    %c0_i32_1 = arith.constant 0 : i32
    return %c0_i32, %c0_i32_0 : i32, i32
  }
  func.func @transform_2(%arg0: i32) -> (i32, i32) {
    %c0_i32 = arith.constant 0 : i32
    %c0_i32_0 = arith.constant 0 : i32
    %c0_i32_1 = arith.constant 0 : i32
    return %c0_i32, %c0_i32_0 : i32, i32
  }
  func.func @transform_3(%arg0: i32) -> (i32, i32) {
    %c0_i32 = arith.constant 0 : i32
    %c0_i32_0 = arith.constant 0 : i32
    %c0_i32_1 = arith.constant 0 : i32
    return %c0_i32, %c0_i32_0 : i32, i32
  }
  func.func @transform_4(%arg0: i32) -> (i32, i32, i32) {
    %c0_i32 = arith.constant 0 : i32
    %c0_i32_0 = arith.constant 0 : i32
    %c0_i32_1 = arith.constant 0 : i32
    %c0_i32_2 = arith.constant 0 : i32
    return %c0_i32, %c0_i32_0, %c0_i32_1 : i32, i32, i32
  }
  func.func @transform_5(%arg0: i32) -> (i32, i32) {
    %c0_i32 = arith.constant 0 : i32
    %c0_i32_0 = arith.constant 0 : i32
    %c0_i32_1 = arith.constant 0 : i32
    return %c0_i32, %c0_i32_0 : i32, i32
  }
  func.func @transform_6(%arg0: i32) -> (i32, i32) {
    %c0_i32 = arith.constant 0 : i32
    %c0_i32_0 = arith.constant 0 : i32
    %c0_i32_1 = arith.constant 0 : i32
    return %c0_i32, %c0_i32_0 : i32, i32
  }
  func.func @transform_7(%arg0: i32) -> (i32, i32) {
    %c0_i32 = arith.constant 0 : i32
    %c0_i32_0 = arith.constant 0 : i32
    %c0_i32_1 = arith.constant 0 : i32
    return %c0_i32, %c0_i32_0 : i32, i32
  }
  func.func @transform_8(%arg0: i32) -> (i32, i32) {
    %c0_i32 = arith.constant 0 : i32
    %c0_i32_0 = arith.constant 0 : i32
    %c0_i32_1 = arith.constant 0 : i32
    return %c0_i32, %c0_i32_0 : i32, i32
  }
  func.func @transform_9(%arg0: i32) -> (i32, i32) {
    %c0_i32 = arith.constant 0 : i32
    %c0_i32_0 = arith.constant 0 : i32
    %c0_i32_1 = arith.constant 0 : i32
    return %c0_i32, %c0_i32_0 : i32, i32
  }
  func.func @transform_10(%arg0: i32) -> (i32, i32, i32) {
    %c0_i32 = arith.constant 0 : i32
    %c0_i32_0 = arith.constant 0 : i32
    %c0_i32_1 = arith.constant 0 : i32
    %c0_i32_2 = arith.constant 0 : i32
    return %c0_i32, %c0_i32_0, %c0_i32_1 : i32, i32, i32
  }
  func.func @transform_11(%arg0: i32) -> (i32, i32) {
    %c0_i32 = arith.constant 0 : i32
    %c0_i32_0 = arith.constant 0 : i32
    %c0_i32_1 = arith.constant 0 : i32
    return %c0_i32, %c0_i32_0 : i32, i32
  }
  func.func @transform_12(%arg0: i32) -> (i32, i32) {
    %c0_i32 = arith.constant 0 : i32
    %c0_i32_0 = arith.constant 0 : i32
    %c0_i32_1 = arith.constant 0 : i32
    return %c0_i32, %c0_i32_0 : i32, i32
  }
  func.func @transform_13(%arg0: i32) -> (i32, i32, i32) {
    %c0_i32 = arith.constant 0 : i32
    %c0_i32_0 = arith.constant 0 : i32
    %c0_i32_1 = arith.constant 0 : i32
    return %arg0, %c0_i32, %c0_i32_0 : i32, i32, i32
  }
}

</mosaic_0001>

<bundles_post_ra>
// kernel: dense_block_forward.1
= control target key start
LH: loop header
LB: loop body
LE: loop exit
PB: predicated region body
PF: predicated region fallthrough
CT: control target
= control target key end

     0   :  { %s13650_s0 = inlined_call_operand.vmem [shape: f32[2,256,8], index: 0, kind: input, shape index: {}]   ;;  %s13651_s1 = inlined_call_operand.vmem [shape: bf16[8,32], index: 1, kind: input, shape index: {}]   ;;  %s13652_s2 = inlined_call_operand.vmem [shape: f32[1,32], index: 2, kind: input, shape index: {}]   ;;  %s13653_s3 = inlined_call_operand.vmem [shape: f32[1,32], index: 3, kind: input, shape index: {}]   ;;  %s13654_s4 = inlined_call_operand.vmem [shape: bf16[9,32,8], index: 4, kind: input, shape index: {}]   ;;  %s13655_s5 = inlined_call_operand.vmem [shape: f32[1,8], index: 5, kind: input, shape index: {}]   ;;  %s13656_s6 = inlined_call_operand.vmem [shape: f32[1,8], index: 6, kind: input, shape index: {}]   ;;  %s13657_s7 = inlined_call_operand.vmem [shape: bf16[16,32], index: 7, kind: input, shape index: {}]   ;;  %s13658_s8 = inlined_call_operand.vmem [shape: f32[1,32], index: 8, kind: input, shape index: {}]   ;;  %s13659_s9 = inlined_call_operand.vmem [shape: f32[1,32], index: 9, kind: input, shape index: {}]   ;;  %s13660_s10 = inlined_call_operand.vmem [shape: bf16[9,32,8], index: 10, kind: input, shape index: {}]   ;;  %s13661_s11 = inlined_call_operand.vmem [shape: f32[1,8], index: 11, kind: input, shape index: {}]   ;;  %s13662_s12 = inlined_call_operand.vmem [shape: f32[1,8], index: 12, kind: input, shape index: {}]   ;;  %s13663_s13 = inlined_call_operand.hbm [shape: f32[2,256,20], index: 13, kind: output, shape index: {}]  }
   0x1   :  { %13720 = sst [smem:[#allocation58_spill]] %s13650_s0 }
   0x2   :  { %13721 = sst [smem:[#allocation59_spill]] %s13651_s1 }
   0x3   :  { %18 = vsyncpa [#allocation5], 0 }
   0x4   :  { %20 = vsyncpa [#allocation5 + $0x1], 0  ;;  %s11046_s25 = smov 0   ;;  %s11048_s26 = smov 0  }
   0x5   :  { %s11050_s27 = smov 0   ;;  %s11052_s28 = smov 0  }
   0x6 LB: > { %s11067_s29 = sadd.s32 4294967295, %s10966_s28   ;;  %s8759_s30 = sadd.s32 4294967294, %s10966_s28   ;;  %s10966_s28 = sphi %s11052_s28, %s13839_s28   ;;  %s10962_s27 = sphi %s11050_s27, %s13838_s27   ;;  %s10958_s26 = sphi %s11048_s26, %s13837_s26   ;;  %s10954_s25 = sphi %s11046_s25, %s13836_s25  }
   0x7   : > { %s11071_s14 = sadd.s32 1, %s10966_s28   ;;  %s311_s15 = sadd.s32 1, %s10962_s27 }
   0x8   : > { %s308_s16 = ssub.s32 %s10966_s28, %s11071_s14  ;;  %p321_p0 = scmp.ne.s32.totalorder %s10962_s27, %s10958_s26 }
   0x9   : > { %p309_p1 = scmp.eq.s32.totalorder %s308_s16, 0  ;;  %p322_p2 = scmp.eq.s32.totalorder %s11067_s29, 1 }
   0xa   : > { %p327_p3 = scmp.ne.s32.totalorder %s10958_s26, %s10954_s25  ;;  %p328_p4 = scmp.eq.s32.totalorder %s8759_s30, 1 }
   0xb   : > { %s11082_s17 = scalar_select %p309_p1, %s10962_s27, %s311_s15  }
   0xc   : > { %p11084_p5 = por %p322_p2, %p321_p0  ;;  %p11088_p6 = por %p328_p4, %p327_p3 }
   0xd   : > { %p8762_p7 = scmp.ge.s32.totalorder %s10966_s28, 1  ;;  %p390_p8 = scmp.lt.s32.totalorder %s10966_s28, 3 }
   0xf   : > { %p391_p9 = pnand %p8762_p7, %p390_p8 }
  0x11   : > { %394 = sbr.rel (%p391_p9) target bundleno = 2306 (0x902), region = 72 }
  0x18   : > { %s13724_s1 = sld [smem:[#allocation59_spill]]  ;;  %vm1251_vm0 = vcmask 1043456   ;;  %p434_p10 = scmp.lt.s32.totalorder %s11067_s29, 1  ;;  %v11101_v1 = vld [vmem:[%s13654_s4 + $0x10] sm:$0xff]   ;;  %vm495_vm1 = vcmask 64512   ;;  %v10868_v42 = vld [vmem:[%s13654_s4 + $0x18] sm:$0xff]  }
  0x19   : > { %s13725_s0 = sld [smem:[#allocation58_spill]]  ;;  %vm440_vm2 = vcmask 261120   ;;  %vm1640_vm11 = vsmask.f32 7424  ;;  %vm1803_vm12 = vsmask.f32 256 }
  0x1a   : > { %s435_s24 = scalar_select %p434_p10, %s11067_s29, 1 }
  0x1b   : > { %s431_s15 = sand.u32 1, %s10958_s26   ;;  %s10972_s21 = smov 4  }
  0x1c   : > { %s9232_s30 = sshll.u32 %s435_s24, 8  ;;  %s8763_s16 = sshll.u32 %s431_s15, 8 }
  0x1d   : > { %s10973_s24 = smov 12  }
  0x1e   : > { %v1202_v0 = vld [vmem:[%s13724_s1] sm:$0xf] }
  0x1f   : > { %10820 = vmatprep.subr.msk.bf16.mxu1 %vm1251_vm0, %v1202_v0  ;;  %v1253_v2 = vsel %vm1251_vm0, %v1202_v0, 0  ;;  %s11108_s20 = scalar_lea.vmem %s13725_s0, %s9232_s30  ;;  %s13719_s30 = smov 8  }
  0x20   : > { %9593 = vmatpush3.bf16.msra.mxu1 %v1253_v2  ;;  %v11111_v3 = vld [vmem:[%s11108_s20] sm:$0xff]  ;;  %v11114_v4 = vld [vmem:[%s11108_s20 + $0x8] sm:$0xff]  ;;  %v11117_v5 = vld [vmem:[%s11108_s20 + $0x10] sm:$0xff] }
  0x21   : > { %9626 = vmatprep.subr.bf16.mxu1 %v11101_v1  ;;  %13726 = vst [vmem:[#allocation7_spill] sm:$0xff] %v11111_v3  ;;  %13727 = vst [vmem:[#allocation8_spill] sm:$0xff] %v11114_v4  ;;  %v479_v6 = vpack.c.bf16 %v11114_v4, %v11111_v3  ;;  %v11122_v7 = vld [vmem:[%s11108_s20 + $0x18] sm:$0xff]  ;;  %v11125_v8 = vld [vmem:[%s11108_s20 + $0x20] sm:$0xff] }
  0x22   : > { %13728 = vst [vmem:[#allocation9_spill] sm:$0xff] %v11117_v5  ;;  %13729 = vst [vmem:[#allocation10_spill] sm:$0xff] %v11122_v7  ;;  %v11128_v9 = vld [vmem:[%s11108_s20 + $0x28] sm:$0xff]  ;;  %v480_v10 = vpack.c.bf16 %v11122_v7, %v11117_v5  ;;  %v11135_v12 = vld [vmem:[%s11108_s20 + $0x30] sm:$0xff] }
  0x23   : > { %13730 = vst [vmem:[#allocation11_spill] sm:$0xff] %v11125_v8  ;;  %13731 = vst [vmem:[#allocation12_spill] sm:$0xff] %v11128_v9  ;;  %v481_v11 = vpack.c.bf16 %v11128_v9, %v11125_v8  ;;  %v11138_v13 = vld [vmem:[%s11108_s20 + $0x38] sm:$0xff]  ;;  %v11141_v14 = vld [vmem:[%s11108_s20 + $0x40] sm:$0xff] }
  0x24   : > { %13732 = vst [vmem:[#allocation13_spill] sm:$0xff] %v11135_v12  ;;  %13733 = vst [vmem:[#allocation14_spill] sm:$0xff] %v11138_v13  ;;  %v482_v15 = vpack.c.bf16 %v11138_v13, %v11135_v12  ;;  %v11147_v16 = vld [vmem:[%s11108_s20 + $0x48] sm:$0xff]  ;;  %v11150_v17 = vld [vmem:[%s11108_s20 + $0x50] sm:$0xff] }
  0x25   : > { %13734 = vst [vmem:[#allocation15_spill] sm:$0xff] %v11141_v14  ;;  %496 = vst.msk [vmem:[#allocation2] sm:$0xff] %vm495_vm1, %v479_v6  ;;  %v11153_v18 = vld [vmem:[%s11108_s20 + $0x58] sm:$0xff]  ;;  %v483_v19 = vpack.c.bf16 %v11147_v16, %v11141_v14  ;;  %v11162_v21 = vld [vmem:[%s11108_s20 + $0x60] sm:$0xff] }
  0x26   : > { %13735 = vst [vmem:[#allocation16_spill] sm:$0xff] %v11147_v16  ;;  %13736 = vst [vmem:[#allocation17_spill] sm:$0xff] %v11150_v17  ;;  %v484_v20 = vpack.c.bf16 %v11153_v18, %v11150_v17  ;;  %v11165_v22 = vld [vmem:[%s11108_s20 + $0x68] sm:$0xff]  ;;  %v11168_v23 = vld [vmem:[%s11108_s20 + $0x70] sm:$0xff] }
  0x27   : > { %13737 = vst [vmem:[#allocation18_spill] sm:$0xff] %v11153_v18  ;;  %497 = vst.msk [vmem:[#allocation2 + $0x8] sm:$0xff] %vm495_vm1, %v480_v10  ;;  %v485_v24 = vpack.c.bf16 %v11165_v22, %v11162_v21  ;;  %v11174_v25 = vld [vmem:[%s11108_s20 + $0x78] sm:$0xff]  ;;  %v11177_v26 = vld [vmem:[%s11108_s20 + $0x80] sm:$0xff]  ;;  %v10968_v10 = vmov 0  }
  0x28   : > { %498 = vst.msk [vmem:[#allocation2 + $0x10] sm:$0xff] %vm495_vm1, %v481_v11  ;;  %13738 = vst [vmem:[#allocation19_spill] sm:$0xff] %v11162_v21  ;;  %v11180_v27 = vld [vmem:[%s11108_s20 + $0x88] sm:$0xff]  ;;  %v486_v28 = vpack.c.bf16 %v11174_v25, %v11168_v23  ;;  %v11189_v30 = vld [vmem:[%s11108_s20 + $0x90] sm:$0xff] }
  0x29   : > { %13739 = vst [vmem:[#allocation20_spill] sm:$0xff] %v11165_v22  ;;  %13740 = vst [vmem:[#allocation21_spill] sm:$0xff] %v11168_v23  ;;  %v487_v29 = vpack.c.bf16 %v11180_v27, %v11177_v26  ;;  %v11192_v31 = vld [vmem:[%s11108_s20 + $0x98] sm:$0xff]  ;;  %v11195_v32 = vld [vmem:[%s11108_s20 + $0xa0] sm:$0xff] }
  0x2a   : > { %499 = vst.msk [vmem:[#allocation2 + $0x18] sm:$0xff] %vm495_vm1, %v482_v15  ;;  %13741 = vst [vmem:[#allocation22_spill] sm:$0xff] %v11174_v25  ;;  %v488_v33 = vpack.c.bf16 %v11192_v31, %v11189_v30  ;;  %v11201_v34 = vld [vmem:[%s11108_s20 + $0xa8] sm:$0xff]  ;;  %v11204_v35 = vld [vmem:[%s11108_s20 + $0xb0] sm:$0xff]  ;;  %v545_v15 = vlaneseq }
  0x2b   : > { %13742 = vst [vmem:[#allocation23_spill] sm:$0xff] %v11177_v26  ;;  %13743 = vst [vmem:[#allocation24_spill] sm:$0xff] %v11180_v27  ;;  %v11207_v36 = vld [vmem:[%s11108_s20 + $0xb8] sm:$0xff]  ;;  %v489_v37 = vpack.c.bf16 %v11201_v34, %v11195_v32  ;;  %v11216_v39 = vld [vmem:[%s11108_s20 + $0xc0] sm:$0xff] }
  0x2c   : > { %500 = vst.msk [vmem:[#allocation2 + $0x20] sm:$0xff] %vm495_vm1, %v483_v19  ;;  %501 = vst.msk [vmem:[#allocation2 + $0x28] sm:$0xff] %vm495_vm1, %v484_v20  ;;  %v490_v38 = vpack.c.bf16 %v11207_v36, %v11204_v35  ;;  %v11219_v40 = vld [vmem:[%s11108_s20 + $0xc8] sm:$0xff]  ;;  %v11222_v41 = vld [vmem:[%s11108_s20 + $0xd0] sm:$0xff]  ;;  %v11281_v19 = vshrl.u32 %v545_v15, 7 }
  0x2d   : > { %13744 = vst [vmem:[#allocation25_spill] sm:$0xff] %v11189_v30  ;;  %13745 = vst [vmem:[#allocation26_spill] sm:$0xff] %v11192_v31  ;;  %v491_v43 = vpack.c.bf16 %v11219_v40, %v11216_v39  ;;  %v11231_v44 = vld [vmem:[%s11108_s20 + $0xd8] sm:$0xff]  ;;  %v11234_v45 = vld [vmem:[%s11108_s20 + $0xe0] sm:$0xff] }
  0x2e   : > { %13746 = vst [vmem:[#allocation27_spill] sm:$0xff] %v11195_v32  ;;  %502 = vst.msk [vmem:[#allocation2 + $0x30] sm:$0xff] %vm495_vm1, %v485_v24  ;;  %v11237_v46 = vld [vmem:[%s11108_s20 + $0xe8] sm:$0xff]  ;;  %v1186_v47 = vld [vmem:[#allocation2] sm:$0xff]  ;;  %v492_v48 = vpack.c.bf16 %v11231_v44, %v11222_v41  ;;  %v548_v20 = vadd.s32 16, %v11281_v19 }
  0x2f   : > { %13747 = vst [vmem:[#allocation28_spill] sm:$0xff] %v11201_v34  ;;  %13748 = vst [vmem:[#allocation29_spill] sm:$0xff] %v11204_v35  ;;  %v493_v49 = vpack.c.bf16 %v11237_v46, %v11234_v45  ;;  %v11246_v50 = vld [vmem:[%s11108_s20 + $0xf0] sm:$0xff]  ;;  %v11249_v51 = vld [vmem:[%s11108_s20 + $0xf8] sm:$0xff]  ;;  %9594 = vmatprep.mubr.msk.bf16.mxu1 %vm495_vm1, %v1186_v47  ;;  %v13667_v47 = vmov 0.0   ;;  %s12485_s20 = scalar_lea.vmem [#allocation4], %s8763_s16 }
  0x30   : > { %13749 = vst [vmem:[#allocation30_spill] sm:$0xff] %v11207_v36  ;;  %503 = vst.msk [vmem:[#allocation2 + $0x38] sm:$0xff] %vm495_vm1, %v486_v28  ;;  %v1187_v52 = vld [vmem:[#allocation2 + $0x8] sm:$0xff]  ;;  %v1188_v53 = vld [vmem:[#allocation2 + $0x10] sm:$0xff]  ;;  %v494_v54 = vpack.c.bf16 %v11249_v51, %v11246_v50  ;;  %v549_v28 = vadd.s32 24, %v11281_v19  ;;  %s9233_s16 = sshll.u32 %s11067_s29, 12 }
  0x31   : > { %504 = vst.msk [vmem:[#allocation2 + $0x40] sm:$0xff] %vm495_vm1, %v487_v29  ;;  %13750 = vst [vmem:[#allocation31_spill] sm:$0xff] %v11216_v39  ;;  %9595 = vmatmul.mubr.msk.bf16.vlgmr.msra.gmra.mrb[0].mxu1 %vm495_vm1, %v1187_v52  ;;  %v1189_v55 = vld [vmem:[#allocation2 + $0x18] sm:$0xff]  ;;  %v11287_v24 = vld [vmem:[%s13654_s4] sm:$0xff]   ;;  %v596_v29 = vand.u32 15, %v548_v20  ;;  %v13678_v52 = vmov 1.0   ;;  %s13598_s23 = scalar_lea.hbm %s13663_s13, %s9233_s16 }
  0x32   : > { %13751 = vst [vmem:[#allocation32_spill] sm:$0xff] %v11219_v40  ;;  %13752 = vst [vmem:[#allocation33_spill] sm:$0xff] %v11222_v41  ;;  %9598 = vmatprep.mubr.msk.bf16.mxu1 %vm495_vm1, %v1188_v53  ;;  %9627 = vmatpush3.bf16.msra.mxu1 %v11101_v1  ;;  %s13608_s29 = scalar_lea.sflag [#allocation5], %s431_s15  ;;  %s10974_s16 = smov [#allocation4]  }
  0x33   : > { %505 = vst.msk [vmem:[#allocation2 + $0x48] sm:$0xff] %vm495_vm1, %v488_v33  ;;  %13753 = vst [vmem:[#allocation34_spill] sm:$0xff] %v11231_v44  ;;  %9628 = vmatprep.subr.bf16.mxu1 %v10868_v42  ;;  %v1190_v56 = vld [vmem:[#allocation2 + $0x20] sm:$0xff]  ;;  %v1191_v57 = vld [vmem:[#allocation2 + $0x28] sm:$0xff]  ;;  %v550_v33 = vadd.s32 32, %v11281_v19  ;;  %vm964_vm3 = vcmp.ne.s32.totalorder %v596_v29, 0 }
  0x34   : > { %13754 = vst [vmem:[#allocation35_spill] sm:$0xff] %v11234_v45  ;;  %13755 = vst [vmem:[#allocation36_spill] sm:$0xff] %v11237_v46 }
  0x35   : > { %506 = vst.msk [vmem:[#allocation2 + $0x50] sm:$0xff] %vm495_vm1, %v489_v37  ;;  %507 = vst.msk [vmem:[#allocation2 + $0x58] sm:$0xff] %vm495_vm1, %v490_v38  ;;  %v1192_v58 = vld [vmem:[#allocation2 + $0x30] sm:$0xff]  ;;  %v547_v37 = vadd.s32 8, %v11281_v19  ;;  %v603_v38 = vand.u32 15, %v549_v28  ;;  %v560_v28 = vadd.s32 112, %v11281_v19 }
  0x36   : > { %13756 = vst [vmem:[#allocation37_spill] sm:$0xff] %v11246_v50  ;;  %13757 = vst [vmem:[#allocation38_spill] sm:$0xff] %v11249_v51  ;;  %9629 = vmatpush3.bf16.msra.mxu1 %v10868_v42  ;;  %v610_v42 = vand.u32 15, %v550_v33 }
  0x37   : > { %508 = vst.msk [vmem:[#allocation2 + $0x60] sm:$0xff] %vm495_vm1, %v491_v43  ;;  %509 = vst.msk [vmem:[#allocation2 + $0x68] sm:$0xff] %vm495_vm1, %v492_v48  ;;  %v1193_v59 = vld [vmem:[#allocation2 + $0x38] sm:$0xff]  ;;  %9662 = vmatprep.subr.bf16.mxu1 %v11287_v24  ;;  %v589_v43 = vand.u32 15, %v547_v37  ;;  %v8767_v48 = vsel %vm964_vm3, 1.0, %v13667_v47  ;;  %vm1077_vm4 = vcmp.ne.s32.totalorder %v603_v38, 15 }
  0x38   : > { %510 = vst.msk [vmem:[#allocation2 + $0x70] sm:$0xff] %vm495_vm1, %v493_v49  ;;  %511 = vst.msk [vmem:[#allocation2 + $0x78] sm:$0xff] %vm495_vm1, %v494_v54  ;;  %v1194_v60 = vld [vmem:[#allocation2 + $0x40] sm:$0xff]  ;;  %v582_v49 = vand.u32 15, %v11281_v19  ;;  %vm966_vm5 = vcmp.ne.s32.totalorder %v610_v42, 0  ;;  %v1059_v53 = vpack.c.bf16 %v13678_v52, %v8767_v48  ;;  %v552_v54 = vadd.s32 48, %v11281_v19 }
  0x39   : > { %9599 = vmatmul.mubr.msk.bf16.gmra.mrb[4].mxu1 %vm495_vm1, %v1189_v55  ;;  %442 = vst.msk [vmem:[#allocation3 + $0x90] sm:$0xff] %vm440_vm2, %v10968_v10  ;;  %445 = vst.msk [vmem:[#allocation3 + $0x118] sm:$0xff] %vm440_vm2, %v10968_v10  ;;  %vm1075_vm6 = vcmp.ne.s32.totalorder %v589_v43, 15  ;;  %v8783_v55 = vsel %vm1077_vm4, 1.0, %v13667_v47  ;;  %v558_v38 = vadd.s32 96, %v11281_v19 }
  0x3a   : > { %9602 = vmatprep.mubr.msk.bf16.mxu1 %vm495_vm1, %v1190_v56  ;;  %v1195_v61 = vld [vmem:[#allocation2 + $0x48] sm:$0xff]  ;;  %441 = vst.msk [vmem:[#allocation3] sm:$0xff] %vm440_vm2, %v10968_v10  ;;  %443 = vst.msk [vmem:[#allocation3 + $0x120] sm:$0xff] %vm440_vm2, %v10968_v10  ;;  %v8768_v56 = vsel %vm966_vm5, 1.0, %v13667_v47  ;;  %vm962_vm7 = vcmp.ne.s32.totalorder %v582_v49, 0  ;;  %v562_v49 = vadd.s32 128, %v11281_v19 }
  0x3b   : > { %444 = vst.msk [vmem:[#allocation3 + $0x88] sm:$0xff] %vm440_vm2, %v10968_v10  ;;  %446 = vst.msk [vmem:[#allocation3 + $0x1a8] sm:$0xff] %vm440_vm2, %v10968_v10 }
  0x3c   : > { %v1196_v62 = vld [vmem:[#allocation2 + $0x50] sm:$0xff]  ;;  %v1197_v63 = vld [vmem:[#allocation2 + $0x58] sm:$0xff] }
  0x3e   : > { %v1198_v0 = vld [vmem:[#allocation2 + $0x60] sm:$0xff]  ;;  %v1199_v1 = vld [vmem:[#allocation2 + $0x68] sm:$0xff] }
  0x3f   : > { %v1200_v2 = vld [vmem:[#allocation2 + $0x70] sm:$0xff]  ;;  %v1201_v6 = vld [vmem:[#allocation2 + $0x78] sm:$0xff] }
  0x40   : > { %v2314_v11 = vld [vmem:[#allocation3 + $0x90] sm:$0xff] }
  0x41   : > { %9603 = vmatmul.mubr.msk.bf16.gmra.mrb[8].mxu1 %vm495_vm1, %v1191_v57  ;;  %v8782_v57 = vsel %vm1075_vm6, 1.0, %v13667_v47 }
  0x42   : > { %9606 = vmatprep.mubr.msk.bf16.mxu1 %vm495_vm1, %v1192_v58  ;;  %v1171_v58 = vpack.c.bf16 %v8783_v55, %v13678_v52  ;;  %v680_v55 = vand.u32 15, %v560_v28  ;;  %v566_v28 = vadd.s32 160, %v11281_v19 }
  0x44   : > { %v1815_v43 = vshll.u32 %v1171_v58, 16  ;;  %vm976_vm13 = vcmp.ne.s32.totalorder %v680_v55, 0 }
  0x49   : > { %9607 = vmatmul.mubr.msk.bf16.gmra.mrb[12].mxu1 %vm495_vm1, %v1193_v59  ;;  %v1649_v59 = vshll.u32 %v1059_v53, 16 }
  0x4a   : > { %9610 = vmatprep.mubr.msk.bf16.mxu1 %vm495_vm1, %v1194_v60  ;;  %v624_v60 = vand.u32 15, %v552_v54 }
  0x4c   : > { %vm968_vm8 = vcmp.ne.s32.totalorder %v624_v60, 0 }
  0x4d   : > { %v8769_v37 = vsel %vm968_vm8, 1.0, %v13667_v47 }
  0x51   : > { %9611 = vmatmul.mubr.msk.bf16.gmra.mrb[16].mxu1 %vm495_vm1, %v1195_v61  ;;  %v11302_v61 = vpack.c.bf16 %v13678_v52, %v8768_v56 }
  0x52   : > { %9614 = vmatprep.mubr.msk.bf16.mxu1 %vm495_vm1, %v1196_v62  ;;  %v8766_v62 = vsel %vm962_vm7, 1.0, %v13667_v47 }
  0x53   : > { %v1058_v10 = vpack.c.bf16 %v13678_v52, %v8766_v62  ;;  %v1657_v15 = vshll.u32 %v11302_v61, 16  ;;  %v666_v62 = vand.u32 15, %v558_v38  ;;  %v1623_v38 = vld [vmem:[#allocation3 + $0x90] sm:$0x80] }
  0x55   : > { %v1642_v48 = vshll.u32 %v1058_v10, 16  ;;  %v1645_v60 = vshrl.u32 %v1058_v10, 16  ;;  %vm974_vm14 = vcmp.ne.s32.totalorder %v666_v62, 0  ;;  %v722_v62 = vand.u32 15, %v566_v28 }
  0x56   : > { %v574_v28 = vadd.s32 224, %v11281_v19 }
  0x59   : > { %9615 = vmatmul.mubr.msk.bf16.gmra.mrb[20].mxu1 %vm495_vm1, %v1197_v63  ;;  %v554_v63 = vadd.s32 64, %v11281_v19 }
  0x5a   : > { %9618 = vmatprep.mubr.msk.bf16.mxu1 %vm495_vm1, %v1198_v0  ;;  %v1170_v0 = vpack.c.bf16 %v8782_v57, %v13678_v52 }
  0x5b   : > { %v638_v20 = vand.u32 15, %v554_v63 }
  0x5c   : > { %v1805_v29 = vshrl.u32 %v1170_v0, 16  ;;  %v1808_v57 = vshll.u32 %v1170_v0, 16 }
  0x5d   : > { %vm970_vm9 = vcmp.ne.s32.totalorder %v638_v20, 0 }
  0x5e   : > { %v1807_v56 = vrot.slane %v1805_v29, 7  ;;  %v8770_v63 = vsel %vm970_vm9, 1.0, %v13667_v47 }
  0x5f   : > { %v11333_v29 = vpack.c.bf16 %v13678_v52, %v8770_v63  ;;  %v572_v63 = vadd.s32 208, %v11281_v19 }
  0x60   : > { %v11329_v20 = vor.u32 %v1808_v57, %v1807_v56 }
  0x61   : > { %9619 = vmatmul.mubr.msk.bf16.gmra.mrb[24].mxu1 %vm495_vm1, %v1199_v1  ;;  %v556_v1 = vadd.s32 80, %v11281_v19 }
  0x62   : > { %9622 = vmatprep.mubr.msk.bf16.mxu1 %vm495_vm1, %v1200_v2  ;;  %v11308_v2 = vrot.slane %v1649_v59, 1  ;;  %v1061_v59 = vpack.c.bf16 %v13678_v52, %v8769_v37  ;;  %13759 = vst [vmem:[#allocation40_spill] sm:$0xff] %v11329_v20  ;;  %v568_v37 = vadd.s32 176, %v11281_v19 }
  0x63   : > { %v652_v33 = vand.u32 15, %v556_v1  ;;  %v564_v1 = vadd.s32 144, %v11281_v19 }
  0x64   : > { %v1665_v10 = vshll.u32 %v1061_v59, 16  ;;  %v1669_v57 = vshrl.u32 %v1061_v59, 16  ;;  %v736_v46 = vand.u32 15, %v568_v37 }
  0x65   : > { %vm972_vm10 = vcmp.ne.s32.totalorder %v652_v33, 0  ;;  %v1661_v33 = vshrl.u32 %v11302_v61, 16  ;;  %v8772_v61 = vsel %vm974_vm14, 1.0, %v13667_v47 }
  0x66   : > { %v1667_v51 = vrot.slane %v1665_v10, 1  ;;  %v1064_v10 = vpack.c.bf16 %v13678_v52, %v8772_v61  ;;  %vm984_vm3 = vcmp.ne.s32.totalorder %v736_v46, 0 }
  0x68   : > { %v1689_v44 = vshll.u32 %v1064_v10, 16 }
  0x69   : > { %9623 = vmatmul.mubr.msk.bf16.gmra.mrb[28].mxu1 %vm495_vm1, %v1201_v6  ;;  %v1812_v6 = vshrl.u32 %v1171_v58, 16  ;;  %v694_v58 = vand.u32 15, %v562_v49  ;;  %v708_v49 = vand.u32 15, %v564_v1  ;;  %v570_v1 = vadd.s32 192, %v11281_v19 }
  0x6a   : > { %9630 = vmatprep.mubr.msk.bf16.mxu1 %vm440_vm2, %v2314_v11  ;;  %v1653_v11 = vshrl.u32 %v1059_v53, 16  ;;  %v1659_v53 = vrot.slane %v1657_v15, 1  ;;  %v8771_v15 = vsel %vm972_vm10, 1.0, %v13667_v47  ;;  %vm982_vm1 = vcmp.ne.s32.totalorder %v722_v62, 0 }
  0x6b   : > { %v11315_v42 = vrot.slane %v1812_v6, 7  ;;  %vm978_vm15 = vcmp.ne.s32.totalorder %v694_v58, 0  ;;  %vm980_vm0 = vcmp.ne.s32.totalorder %v708_v49, 0  ;;  %v750_v49 = vand.u32 15, %v570_v1 }
  0x6c   : > { %v1655_v54 = vor.u32 %v1653_v11, %v11308_v2  ;;  %v11323_v11 = vrot.slane %v1642_v48, 1  ;;  %v8773_v48 = vsel %vm976_vm13, 1.0, %v13667_v47  ;;  %v1677_v62 = vshrl.u32 %v11333_v29, 16 }
  0x6d   : > { %v1817_v6 = vor.u32 %v1815_v43, %v11315_v42  ;;  %v1063_v43 = vpack.c.bf16 %v13678_v52, %v8771_v15  ;;  %v8774_v15 = vsel %vm978_vm15, 1.0, %v13667_v47  ;;  %v1065_v58 = vpack.c.bf16 %v13678_v52, %v8773_v48 }
  0x6e   : > { %13758 = vst [vmem:[#allocation39_spill] sm:$0xff] %v11323_v11  ;;  %v11327_v0 = vsel %vm1640_vm11, %v1655_v54, %v1659_v53  ;;  %v1647_v55 = vor.u32 %v1645_v60, %v11323_v11  ;;  %v1785_v50 = vmul.bf16 %v11323_v11, %v1623_v38  ;;  %v764_v38 = vand.u32 15, %v572_v63 }
  0x6f   : > { %v11340_v54 = vsel %vm1803_vm12, %v1807_v56, %v1817_v6  ;;  %v1673_v56 = vshll.u32 %v11333_v29, 16  ;;  %v1663_v6 = vor.u32 %v1661_v33, %v1659_v53  ;;  %v1681_v60 = vshll.u32 %v1063_v43, 16 }
  0x70   : > { %v11352_v59 = vsel %vm1640_vm11, %v1647_v55, %v11308_v2  ;;  %v1671_v47 = vor.u32 %v1669_v57, %v1667_v51  ;;  %v11357_v48 = vpack.c.bf16 %v13678_v52, %v8774_v15  ;;  %v11359_v37 = vshrl.u32 %v1785_v50, 16 }
  0x71   : > { %v1697_v11 = vshll.u32 %v1065_v58, 16  ;;  %v13760_v53 = vmov 0.0   ;;  %v1675_v45 = vrot.slane %v1673_v56, 1  ;;  %v11363_v2 = vsel %vm1640_vm11, %v1663_v6, %v1667_v51 }
  0x72   : > { %v8775_v33 = vsel %vm980_vm0, 1.0, %v13760_v53  ;;  %13761 = vst [vmem:[#allocation41_spill] sm:$0xff] %v11363_v2  ;;  %v1683_v55 = vrot.slane %v1681_v60, 1  ;;  %v1685_v61 = vshrl.u32 %v1063_v43, 16  ;;  %v8776_v57 = vsel %vm982_vm1, 1.0, %v13760_v53 }
  0x73   : > { %v778_v63 = vand.u32 15, %v574_v28  ;;  %vm988_vm4 = vcmp.ne.s32.totalorder %v764_v38, 0  ;;  %v1067_v50 = vpack.c.bf16 %v13678_v52, %v8775_v33  ;;  %v8777_v15 = vsel %vm984_vm3, 1.0, %v13760_v53 }
  0x74   : > { %v551_v1 = vadd.s32 40, %v11281_v19  ;;  %v1699_v46 = vrot.slane %v1697_v11, 1  ;;  %v1701_v56 = vshrl.u32 %v1065_v58, 16  ;;  %v1705_v51 = vshll.u32 %v11357_v48, 16 }
  0x75   : > { %vm986_vm5 = vcmp.ne.s32.totalorder %v750_v49, 0  ;;  %v1693_v6 = vshrl.u32 %v1064_v10, 16  ;;  %v1068_v43 = vpack.c.bf16 %v13678_v52, %v8776_v57  ;;  %v8779_v60 = vsel %vm988_vm4, 1.0, %v13760_v53 }
  0x76   : > { %v576_v28 = vadd.s32 240, %v11281_v19  ;;  %v1687_v38 = vor.u32 %v1685_v61, %v1683_v55  ;;  %v1691_v29 = vrot.slane %v1689_v44, 1  ;;  %v1069_v33 = vpack.c.bf16 %v13678_v52, %v8777_v15 }
  0x77   : > { %vm990_vm6 = vcmp.ne.s32.totalorder %v778_v63, 0  ;;  %v1713_v41 = vshll.u32 %v1067_v50, 16  ;;  %v8778_v40 = vsel %vm986_vm5, 1.0, %v13760_v53  ;;  %v617_v58 = vand.u32 15, %v551_v1 }
  0x78   : > { %v1679_v39 = vor.u32 %v1677_v62, %v1675_v45  ;;  %v1703_v49 = vor.u32 %v1701_v56, %v1699_v46  ;;  %v1707_v10 = vrot.slane %v1705_v51, 1  ;;  %v1071_v57 = vpack.c.bf16 %v13678_v52, %v8779_v60 }
  0x79   : > { %v1695_v36 = vor.u32 %v1693_v6, %v1691_v29  ;;  %v1721_v35 = vshll.u32 %v1068_v43, 16  ;;  %v8780_v34 = vsel %vm990_vm6, 1.0, %v13760_v53  ;;  %v792_v61 = vand.u32 15, %v576_v28 }
  0x7a   : > { %v11380_v44 = vsel %vm1640_vm11, %v1671_v47, %v1675_v45  ;;  %v11383_v63 = vsel %vm1640_vm11, %v1687_v38, %v1691_v29  ;;  %v1070_v15 = vpack.c.bf16 %v13678_v52, %v8778_v40  ;;  %v1729_v11 = vshll.u32 %v1069_v33, 16 }
  0x7b   : > { %13762 = vst [vmem:[#allocation42_spill] sm:$0xff] %v11380_v44  ;;  %v1715_v1 = vrot.slane %v1713_v41, 1  ;;  %v1717_v62 = vshrl.u32 %v1067_v50, 16  ;;  %v1709_v56 = vshrl.u32 %v11357_v48, 16  ;;  %vm1079_vm7 = vcmp.ne.s32.totalorder %v617_v58, 15 }
  0x7c   : > { %v11388_v51 = vsel %vm1640_vm11, %v1679_v39, %v1683_v55  ;;  %v11391_v6 = vsel %vm1640_vm11, %v1703_v49, %v1707_v10  ;;  %v11394_v45 = vpack.c.bf16 %v13678_v52, %v8780_v34  ;;  %v1745_v47 = vshll.u32 %v1071_v57, 16 }
  0x7d   : > { %13763 = vst [vmem:[#allocation43_spill] sm:$0xff] %v11388_v51  ;;  %13764 = vst [vmem:[#allocation44_spill] sm:$0xff] %v11391_v6  ;;  %v11397_v60 = vsel %vm1640_vm11, %v1695_v36, %v1699_v46  ;;  %v1723_v40 = vrot.slane %v1721_v35, 1  ;;  %vm992_vm8 = vcmp.ne.s32.totalorder %v792_v61, 0  ;;  %v553_v41 = vadd.s32 56, %v11281_v19 }
  0x7e   : > { %13765 = vst [vmem:[#allocation45_spill] sm:$0xff] %v11397_v60  ;;  %v1731_v50 = vrot.slane %v1729_v11, 1  ;;  %v1733_v48 = vshrl.u32 %v1069_v33, 16  ;;  %v1737_v28 = vshll.u32 %v1070_v15, 16  ;;  %v8784_v39 = vsel %vm1079_vm7, 1.0, %v13760_v53 }
  0x7f   : > { %v1719_v55 = vor.u32 %v1717_v62, %v1715_v1  ;;  %v1711_v38 = vor.u32 %v1709_v56, %v1707_v10  ;;  %v1725_v29 = vshrl.u32 %v1068_v43, 16  ;;  %v555_v58 = vadd.s32 72, %v11281_v19 }
  0x80   : > { %v1747_v34 = vrot.slane %v1745_v47, 1  ;;  %v1749_v49 = vshrl.u32 %v1071_v57, 16  ;;  %v1753_v52 = vshll.u32 %v11394_v45, 16  ;;  %v8781_v36 = vsel %vm992_vm8, 1.0, %v13760_v53 }
  0x81   : > { %v13766_v35 = vmov 1.0   ;;  %v631_v61 = vand.u32 15, %v553_v41  ;;  %v557_v11 = vadd.s32 88, %v11281_v19  ;;  %v561_v33 = vadd.s32 120, %v11281_v19 }
  0x82   : > { %v1172_v46 = vpack.c.bf16 %v8784_v39, %v13766_v35  ;;  %v1735_v32 = vor.u32 %v1733_v48, %v1731_v50  ;;  %v1739_v31 = vrot.slane %v1737_v28, 1  ;;  %v559_v10 = vadd.s32 104, %v11281_v19 }
  0x83   : > { %v565_v43 = vadd.s32 152, %v11281_v19  ;;  %v1741_v62 = vshrl.u32 %v1070_v15, 16  ;;  %v1073_v57 = vpack.c.bf16 %v13766_v35, %v8781_v36  ;;  %v645_v56 = vand.u32 15, %v555_v58 }
  0x84   : > { %v563_v47 = vadd.s32 136, %v11281_v19  ;;  %v11412_v30 = vsel %vm1640_vm11, %v1719_v55, %v1723_v40  ;;  %v1727_v41 = vor.u32 %v1725_v29, %v1723_v40  ;;  %v1751_v39 = vor.u32 %v1749_v49, %v1747_v34 }
  0x85   : > { %13767 = vst [vmem:[#allocation46_spill] sm:$0xff] %v11412_v30  ;;  %v1755_v27 = vrot.slane %v1753_v52, 1  ;;  %v1820_v26 = vshrl.u32 %v1172_v46, 16  ;;  %vm1081_vm9 = vcmp.ne.s32.totalorder %v631_v61, 15  ;;  %v659_v48 = vand.u32 15, %v557_v11 }
  0x86   : > { %v687_v28 = vand.u32 15, %v561_v33  ;;  %v11415_v25 = vsel %vm1640_vm11, %v1711_v38, %v1715_v1  ;;  %v11418_v15 = vsel %vm1640_vm11, %v1735_v32, %v1739_v31  ;;  %v673_v36 = vand.u32 15, %v559_v10 }
  0x87   : > { %13768 = vst [vmem:[#allocation47_spill] sm:$0xff] %v11415_v25  ;;  %v715_v58 = vand.u32 15, %v565_v43  ;;  %v1743_v23 = vor.u32 %v1741_v62, %v1739_v31  ;;  %v1761_v22 = vshll.u32 %v1073_v57, 16  ;;  %vm1083_vm10 = vcmp.ne.s32.totalorder %v645_v56, 15 }
  0x88   : > { %v701_v55 = vand.u32 15, %v563_v47  ;;  %v11421_v40 = vsel %vm1640_vm11, %v1727_v41, %v1731_v50  ;;  %v11424_v52 = vsel %vm1640_vm11, %v1751_v39, %v1755_v27  ;;  %v8785_v29 = vsel %vm1081_vm9, 1.0, %v13760_v53 }
  0x89   : > { %v569_v1 = vadd.s32 184, %v11281_v19  ;;  %v11428_v38 = vrot.slane %v1820_v26, 7  ;;  %vm1085_vm13 = vcmp.ne.s32.totalorder %v659_v48, 15  ;;  %vm1089_vm14 = vcmp.ne.s32.totalorder %v687_v28, 15 }
  0x8a   : > { %v567_v32 = vadd.s32 168, %v11281_v19  ;;  %v1823_v31 = vshll.u32 %v1172_v46, 16  ;;  %v8786_v49 = vsel %vm1083_vm10, 1.0, %v13760_v53  ;;  %vm1087_vm15 = vcmp.ne.s32.totalorder %v673_v36, 15 }
  0x8b   : > { %vm1093_vm0 = vcmp.ne.s32.totalorder %v715_v58, 15  ;;  %v11433_v50 = vsel %vm1640_vm11, %v1743_v23, %v1747_v34  ;;  %v11435_v61 = vrot.slane %v1761_v22, 1  ;;  %v11438_v11 = vpack.c.bf16 %v8785_v29, %v13766_v35 }
  0x8c   : > { %vm1091_vm1 = vcmp.ne.s32.totalorder %v701_v55, 15  ;;  %v1765_v26 = vshrl.u32 %v1073_v57, 16  ;;  %v8787_v33 = vsel %vm1085_vm13, 1.0, %v13760_v53  ;;  %v8789_v10 = vsel %vm1089_vm14, 1.0, %v13760_v53 }
  0x8d   : > { %v743_v43 = vand.u32 15, %v569_v1  ;;  %v1174_v46 = vpack.c.bf16 %v8786_v49, %v13766_v35  ;;  %v8788_v62 = vsel %vm1087_vm15, 1.0, %v13760_v53  ;;  %v8791_v56 = vsel %vm1093_vm0, 1.0, %v13760_v53 }
  0x8e   : > { %v729_v23 = vand.u32 15, %v567_v32  ;;  %v1757_v22 = vshrl.u32 %v11394_v45, 16  ;;  %v1825_v34 = vor.u32 %v1823_v31, %v11428_v38  ;;  %v8790_v47 = vsel %vm1091_vm1, 1.0, %v13760_v53 }
  0x8f   : > { %v573_v57 = vadd.s32 216, %v11281_v19  ;;  %v1828_v41 = vshrl.u32 %v11438_v11, 16  ;;  %v1175_v39 = vpack.c.bf16 %v8787_v33, %v13766_v35  ;;  %v1177_v48 = vpack.c.bf16 %v8789_v10, %v13766_v35 }
  0x90   : > { %v571_v28 = vadd.s32 200, %v11281_v19  ;;  %v1831_v36 = vshll.u32 %v11438_v11, 16  ;;  %v1176_v58 = vpack.c.bf16 %v8788_v62, %v13766_v35  ;;  %v1179_v45 = vpack.c.bf16 %v8791_v56, %v13766_v35 }
  0x91   : > { %vm1097_vm3 = vcmp.ne.s32.totalorder %v743_v43, 15  ;;  %v1836_v55 = vshrl.u32 %v1174_v46, 16  ;;  %v1178_v29 = vpack.c.bf16 %v8790_v47, %v13766_v35  ;;  %vm1095_vm4 = vcmp.ne.s32.totalorder %v729_v23, 15 }
  0x92   : > { %v577_v1 = vadd.s32 248, %v11281_v19  ;;  %v11459_v32 = vor.u32 %v1765_v26, %v11435_v61  ;;  %v1759_v31 = vor.u32 %v1757_v22, %v1755_v27  ;;  %v771_v49 = vand.u32 15, %v573_v57 }
  0x93   : > { %v575_v33 = vadd.s32 232, %v11281_v19  ;;  %v1844_v10 = vshrl.u32 %v1175_v39, 16  ;;  %v1860_v11 = vshrl.u32 %v1177_v48, 16  ;;  %v8793_v62 = vsel %vm1097_vm3, 1.0, %v13760_v53 }
  0x94   : > { %13769 = vst [vmem:[#allocation48_spill] sm:$0xff] %v11459_v32  ;;  %v757_v21 = vand.u32 15, %v571_v28  ;;  %v1830_v56 = vrot.slane %v1828_v41, 7  ;;  %v1852_v43 = vshrl.u32 %v1176_v58, 16  ;;  %v1876_v18 = vshrl.u32 %v1179_v45, 16 }
  0x95   : > { %v8792_v47 = vsel %vm1095_vm4, 1.0, %v13760_v53  ;;  %v1838_v23 = vrot.slane %v1836_v55, 7  ;;  %v1847_v17 = vshll.u32 %v1175_v39, 16  ;;  %v1868_v16 = vshrl.u32 %v1178_v29, 16 }
  0x96   : > { %v799_v14 = vand.u32 15, %v577_v1  ;;  %v1839_v26 = vshll.u32 %v1174_v46, 16  ;;  %v1181_v27 = vpack.c.bf16 %v8793_v62, %v13766_v35  ;;  %vm1101_vm5 = vcmp.ne.s32.totalorder %v771_v49, 15 }
  0x97   : > { %v785_v22 = vand.u32 15, %v575_v33  ;;  %v1846_v19 = vrot.slane %v1844_v10, 7  ;;  %v1862_v57 = vrot.slane %v1860_v11, 7  ;;  %v1180_v13 = vpack.c.bf16 %v8792_v47, %v13766_v35 }
  0x98   : > { %vm1099_vm6 = vcmp.ne.s32.totalorder %v757_v21, 15  ;;  %v1854_v28 = vrot.slane %v1852_v43, 7  ;;  %v1855_v41 = vshll.u32 %v1176_v58, 16  ;;  %v1863_v12 = vshll.u32 %v1177_v48, 16 }
  0x99   : > { %v11466_v9 = vrot.slane %v1876_v18, 7  ;;  %v1870_v8 = vrot.slane %v1868_v16, 7  ;;  %v1879_v55 = vshll.u32 %v1179_v45, 16  ;;  %v8795_v39 = vsel %vm1101_vm5, 1.0, %v13760_v53 }
  0x9a   : > { %vm1105_vm7 = vcmp.ne.s32.totalorder %v799_v14, 15  ;;  %v1871_v46 = vshll.u32 %v1178_v29, 16  ;;  %v1892_v1 = vshrl.u32 %v1181_v27, 16  ;;  %v8794_v49 = vsel %vm1099_vm6, 1.0, %v13760_v53 }
  0x9b   : > { %vm1103_vm8 = vcmp.ne.s32.totalorder %v785_v22, 15  ;;  %v11472_v33 = vsel %vm1640_vm11, %v1759_v31, %v11435_v61  ;;  %v11476_v21 = vsel %vm1803_vm12, %v11315_v42, %v1825_v34  ;;  %v1833_v18 = vor.u32 %v1831_v36, %v1830_v56  ;;  %v11489_v42 = vld [vmem:[%s13652_s2] ss:$0 sm:$0xff] }
  0x9c   : > { %v1884_v48 = vshrl.u32 %v1180_v13, 16  ;;  %v1841_v16 = vor.u32 %v1839_v26, %v1838_v23  ;;  %v1849_v58 = vor.u32 %v1847_v17, %v1846_v19  ;;  %v11479_v45 = vpack.c.bf16 %v8795_v39, %v13766_v35  ;;  %v11506_v26 = vld [vmem:[%s13653_s3] ss:$0 sm:$0xff] }
  0x9d   : > { %v8797_v14 = vsel %vm1105_vm7, 1.0, %v13760_v53  ;;  %v1857_v29 = vor.u32 %v1855_v41, %v1854_v28  ;;  %v1865_v10 = vor.u32 %v1863_v12, %v1862_v57  ;;  %v11483_v11 = vpack.c.bf16 %v8794_v49, %v13766_v35 }
  0x9e   : > { %v8796_v61 = vsel %vm1103_vm8, 1.0, %v13760_v53  ;;  %v1873_v34 = vor.u32 %v1871_v46, %v1870_v8  ;;  %v1881_v17 = vor.u32 %v1879_v55, %v11466_v9  ;;  %v11492_v36 = vrot.slane %v1892_v1, 7 }
  0x9f   : > { %v1895_v31 = vshll.u32 %v1181_v27, 16  ;;  %v11496_v62 = vsel %vm1803_vm12, %v11428_v38, %v1833_v18  ;;  %v11498_v12 = vrot.slane %v1884_v48, 7  ;;  %v1887_v43 = vshll.u32 %v1180_v13, 16 }
  0xa0   : > { %v11501_v53 = vpack.c.bf16 %v8797_v14, %v13766_v35  ;;  %v11509_v22 = vsel %vm1803_vm12, %v1830_v56, %v1841_v16  ;;  %v11512_v27 = vsel %vm1803_vm12, %v1838_v23, %v1849_v58  ;;  %v1908_v38 = vshrl.u32 %v11479_v45, 16 }
  0xa1   : > { %v1184_v41 = vpack.c.bf16 %v8796_v61, %v13766_v35  ;;  %v11518_v39 = vsel %vm1803_vm12, %v1846_v19, %v1857_v29  ;;  %v11521_v46 = vsel %vm1803_vm12, %v1854_v28, %v1865_v10  ;;  %v1900_v1 = vshrl.u32 %v11483_v11, 16 }
  0xa2   : > { %13770 = vst [vmem:[#allocation49_spill] sm:$0xff] %v11521_v46  ;;  %v11526_v23 = vsel %vm1803_vm12, %v1862_v57, %v1873_v34  ;;  %v11529_v18 = vsel %vm1803_vm12, %v1870_v8, %v1881_v17  ;;  %v1897_v35 = vor.u32 %v1895_v31, %v11492_v36  ;;  %v1889_v28 = vor.u32 %v1887_v43, %v11498_v12 }
  0xa3   : > { %13771 = vst [vmem:[#allocation50_spill] sm:$0xff] %v11526_v23  ;;  %13772 = vst [vmem:[#allocation51_spill] sm:$0xff] %v11529_v18  ;;  %v1924_v58 = vshrl.u32 %v11501_v53, 16  ;;  %v11538_v57 = vrot.slane %v1908_v38, 7  ;;  %v1916_v10 = vshrl.u32 %v1184_v41, 16  ;;  %v1902_v34 = vrot.slane %v1900_v1, 7 }
  0xa4   : > { %v1911_v17 = vshll.u32 %v11479_v45, 16  ;;  %v1903_v43 = vshll.u32 %v11483_v11, 16  ;;  %v1919_v5 = vshll.u32 %v1184_v41, 16 }
 0x104   : > { %v9596_v47 = vpop.f32.mrb[0].mxu1 }
 0x105   : > { %v1425_v13 = vmul.f32 %v9596_v47, %v11489_v42  ;;  %v1289_v55 = vpop.f32.mrb[1].mxu1 }
 0x106   : > { %v1423_v56 = vmul.f32 %v11489_v42, %v1289_v55  ;;  %v9597_v49 = vpop.f32.mrb[2].mxu1  ;;  %v11544_v55 = vrot.slane %v1924_v58, 7 }
 0x107   : > { %v1464_v48 = vadd.f32 %v11506_v26, %v1425_v13  ;;  %v1426_v19 = vmul.f32 %v9597_v49, %v11489_v42  ;;  %v1292_v16 = vpop.f32.mrb[3].mxu1  ;;  %v1918_v49 = vrot.slane %v1916_v10, 7 }
 0x108   : > { %v1462_v14 = vadd.f32 %v11506_v26, %v1423_v56  ;;  %v1424_v29 = vmul.f32 %v11489_v42, %v1292_v16 }
 0x109   : > { %v1528_v8 = vmul.f32 0.01, %v1464_v48  ;;  %v1465_v61 = vadd.f32 %v11506_v26, %v1426_v19  ;;  %vm1496_vm9 = vcmp.gt.f32.partialorder %v1464_v48, 0.0  ;;  %v1927_v19 = vshll.u32 %v11501_v53, 16 }
 0x10a   : > { %v1526_v31 = vmul.f32 0.01, %v1462_v14  ;;  %v1463_v47 = vadd.f32 %v11506_v26, %v1424_v29  ;;  %vm1494_vm10 = vcmp.gt.f32.partialorder %v1462_v14, 0.0  ;;  %v1913_v53 = vor.u32 %v1911_v17, %v11538_v57 }
 0x10b   : > { %vm1497_vm13 = vcmp.gt.f32.partialorder %v1465_v61, 0.0  ;;  %v1529_v13 = vmul.f32 0.01, %v1465_v61  ;;  %v1560_v1 = vsel %vm1496_vm9, %v1464_v48, %v1528_v8  ;;  %v1929_v8 = vor.u32 %v1927_v19, %v11544_v55 }
 0x10c   : > { %vm1495_vm14 = vcmp.gt.f32.partialorder %v1463_v47, 0.0  ;;  %v1527_v38 = vmul.f32 0.01, %v1463_v47  ;;  %v9600_v56 = vpop.f32.mrb[4].mxu1  ;;  %v1558_v29 = vsel %vm1494_vm10, %v1462_v14, %v1526_v31  ;;  %v1905_v14 = vor.u32 %v1903_v43, %v1902_v34 }
 0x10d   : > { %v1561_v16 = vsel %vm1497_vm13, %v1465_v61, %v1529_v13  ;;  %v1429_v45 = vmul.f32 %v9600_v56, %v11489_v42  ;;  %v1305_v7 = vpop.f32.mrb[5].mxu1  ;;  %v1921_v31 = vor.u32 %v1919_v5, %v1918_v49  ;;  %v11568_v43 = vsel %vm1803_vm12, %v1902_v34, %v1913_v53 }
 0x10e   : > { %v1591_v3 = vpack.c.bf16 %v1561_v16, %v1560_v1  ;;  %v1559_v11 = vsel %vm1495_vm14, %v1463_v47, %v1527_v38  ;;  %v1427_v4 = vmul.f32 %v11489_v42, %v1305_v7  ;;  %v9601_v18 = vpop.f32.mrb[6].mxu1  ;;  %13775 = vst [vmem:[#allocation54_spill] sm:$0xff] %v11568_v43  ;;  %v11572_v5 = vsel %vm1803_vm12, %v11492_v36, %v1905_v14 }
 0x10f   : > { %v1590_v58 = vpack.c.bf16 %v1559_v11, %v1558_v29  ;;  %v1468_v23 = vadd.f32 %v11506_v26, %v1429_v45  ;;  %v1430_v46 = vmul.f32 %v9601_v18, %v11489_v42  ;;  %v1308_v10 = vpop.f32.mrb[7].mxu1  ;;  %v11560_v18 = vsel %vm1803_vm12, %v11498_v12, %v1897_v35  ;;  %13776 = vst [vmem:[#allocation55_spill] sm:$0xff] %v11572_v5  ;;  %v11577_v35 = vld [vmem:[#allocation3 + $0x118] sm:$0x1] }
 0x110   : > { %1608 = vst.msk [vmem:[#allocation3 + $0xa0] sm:$0xff] %vm440_vm2, %v1591_v3  ;;  %v1466_v48 = vadd.f32 %v11506_v26, %v1427_v4  ;;  %v1428_v41 = vmul.f32 %v11489_v42, %v1308_v10  ;;  %13773 = vst [vmem:[#allocation52_spill] sm:$0xff] %v11560_v18  ;;  %v11565_v4 = vsel %vm1803_vm12, %v11466_v9, %v1889_v28  ;;  %v10870_v10 = vld [vmem:[%s13654_s4 + $0x8] sm:$0xff]  }
 0x111   : > { %1607 = vst.msk [vmem:[#allocation3 + $0x98] sm:$0xff] %vm440_vm2, %v1590_v58  ;;  %v1532_v7 = vmul.f32 0.01, %v1468_v23  ;;  %v1469_v61 = vadd.f32 %v11506_v26, %v1430_v46  ;;  %vm1500_vm15 = vcmp.gt.f32.partialorder %v1468_v23, 0.0  ;;  %13774 = vst [vmem:[#allocation53_spill] sm:$0xff] %v11565_v4  ;;  %v11575_v12 = vsel %vm1803_vm12, %v1918_v49, %v1929_v8 }
 0x112   : > { %v1530_v17 = vmul.f32 0.01, %v1466_v48  ;;  %v1467_v3 = vadd.f32 %v11506_v26, %v1428_v41  ;;  %vm1498_vm0 = vcmp.gt.f32.partialorder %v1466_v48, 0.0  ;;  %13777 = vst [vmem:[#allocation56_spill] sm:$0xff] %v11575_v12  ;;  %v11582_v34 = vsel %vm1803_vm12, %v11538_v57, %v1921_v31 }
 0x113   : > { %vm1501_vm1 = vcmp.gt.f32.partialorder %v1469_v61, 0.0  ;;  %v1533_v47 = vmul.f32 0.01, %v1469_v61  ;;  %v1564_v9 = vsel %vm1500_vm15, %v1468_v23, %v1532_v7  ;;  %13778 = vst [vmem:[#allocation57_spill] sm:$0xff] %v11582_v34 }
 0x114   : > { %vm1499_vm3 = vcmp.gt.f32.partialorder %v1467_v3, 0.0  ;;  %v1531_v46 = vmul.f32 0.01, %v1467_v3  ;;  %v9604_v13 = vpop.f32.mrb[8].mxu1  ;;  %v1562_v19 = vsel %vm1498_vm0, %v1466_v48, %v1530_v17 }
 0x115   : > { %v1565_v28 = vsel %vm1501_vm1, %v1469_v61, %v1533_v47  ;;  %v1433_v38 = vmul.f32 %v9604_v13, %v11489_v42  ;;  %v1321_v56 = vpop.f32.mrb[9].mxu1 }
 0x116   : > { %v1593_v1 = vpack.c.bf16 %v1565_v28, %v1564_v9  ;;  %v1563_v16 = vsel %vm1499_vm3, %v1467_v3, %v1531_v46  ;;  %v1431_v36 = vmul.f32 %v11489_v42, %v1321_v56  ;;  %v9605_v45 = vpop.f32.mrb[10].mxu1 }
 0x117   : > { %v1625_v29 = vld [vmem:[#allocation3 + $0xa0] sm:$0xff]  ;;  %v1592_v49 = vpack.c.bf16 %v1563_v16, %v1562_v19  ;;  %v1472_v11 = vadd.f32 %v11506_v26, %v1433_v38  ;;  %v1434_v23 = vmul.f32 %v9605_v45, %v11489_v42  ;;  %v1324_v58 = vpop.f32.mrb[11].mxu1 }
 0x118   : > { %v11593_v53 = vmul.bf16 %v11327_v0, %v1625_v29  ;;  %v11596_v48 = vmul.bf16 %v11340_v54, %v1625_v29  ;;  %v1624_v41 = vld [vmem:[#allocation3 + $0x98] sm:$0xff]  ;;  %1610 = vst.msk [vmem:[#allocation3 + $0xb0] sm:$0xff] %vm440_vm2, %v1593_v1  ;;  %v1470_v14 = vadd.f32 %v11506_v26, %v1431_v36  ;;  %v1432_v8 = vmul.f32 %v11489_v42, %v1324_v58  ;;  %v11616_v38 = vld [vmem:[%s13654_s4 + $0x20] sm:$0xff]  }
 0x119   : > { %v1786_v7 = vmul.bf16 %v11352_v59, %v1624_v41  ;;  %v11603_v61 = vmul.bf16 %v11329_v20, %v1624_v41  ;;  %1609 = vst.msk [vmem:[#allocation3 + $0xa8] sm:$0xff] %vm440_vm2, %v1592_v49  ;;  %vm1504_vm4 = vcmp.gt.f32.partialorder %v1472_v11, 0.0  ;;  %v1536_v31 = vmul.f32 0.01, %v1472_v11  ;;  %9631 = vmatmul.mubr.msk.bf16.vlgmr.msra.gmra.mrb[32].mxu1 %vm440_vm2, %v1624_v41 }
 0x11a   : > { %vm1502_vm5 = vcmp.gt.f32.partialorder %v1470_v14, 0.0  ;;  %v1534_v3 = vmul.f32 0.01, %v1470_v14  ;;  %v1473_v47 = vadd.f32 %v11506_v26, %v1434_v23  ;;  %9663 = vmatpush3.bf16.msra.mxu1 %v11287_v24  ;;  %9634 = vmatprep.mubr.msk.bf16.mxu1 %vm440_vm2, %v1625_v29  ;;  %v1471_v45 = vadd.f32 %v11506_v26, %v1432_v8 }
 0x11b   : > { %v1970_v46 = vshrl.u32 %v1786_v7, 16  ;;  %v1973_v13 = vshll.u32 %v1786_v7, 16  ;;  %v2132_v28 = vshll.u32 %v11603_v61, 16  ;;  %9664 = vmatprep.subr.bf16.mxu1 %v10870_v10  ;;  %v1568_v56 = vsel %vm1504_vm4, %v1472_v11, %v1536_v31 }
 0x11c   : > { %v1566_v19 = vsel %vm1502_vm5, %v1470_v14, %v1534_v3  ;;  %vm1505_vm6 = vcmp.gt.f32.partialorder %v1473_v47, 0.0  ;;  %v1537_v1 = vmul.f32 0.01, %v1473_v47  ;;  %v9608_v16 = vpop.f32.mrb[12].mxu1  ;;  %v1978_v11 = vshrl.u32 %v11593_v53, 16 }
 0x11d   : > { %v11618_v24 = vrot.slane %v1970_v46, 7  ;;  %v11620_v36 = vrot.slane %v2132_v28, 1  ;;  %v1437_v29 = vmul.f32 %v9608_v16, %v11489_v42  ;;  %v1337_v49 = vpop.f32.mrb[13].mxu1  ;;  %v1981_v14 = vshll.u32 %v11593_v53, 16 }
 0x11e   : > { %v1569_v23 = vsel %vm1505_vm6, %v1473_v47, %v1537_v1  ;;  %v1435_v58 = vmul.f32 %v11489_v42, %v1337_v49  ;;  %v9609_v41 = vpop.f32.mrb[14].mxu1  ;;  %9665 = vmatpush3.bf16.msra.mxu1 %v10870_v10  ;;  %vm1503_vm7 = vcmp.gt.f32.partialorder %v1471_v45, 0.0  ;;  %v1535_v3 = vmul.f32 0.01, %v1471_v45 }
 0x11f   : > { %v11627_v7 = vld [vmem:[#allocation3 + $0xb0] sm:$0xff]  ;;  %v1595_v31 = vpack.c.bf16 %v1569_v23, %v1568_v56  ;;  %v1476_v46 = vadd.f32 %v11506_v26, %v1437_v29  ;;  %v1340_v8 = vpop.f32.mrb[15].mxu1  ;;  %9698 = vmatprep.subr.bf16.mxu1 %v11616_v38  ;;  %v1438_v53 = vmul.f32 %v9609_v41, %v11489_v42  ;;  %v1975_v57 = vor.u32 %v1973_v13, %v11618_v24 }
 0x120   : > { %v11633_v47 = vmul.bf16 %v11380_v44, %v11627_v7  ;;  %v11635_v28 = vld [vmem:[#allocation3 + $0xa8] sm:$0xff]  ;;  %v1474_v10 = vadd.f32 %v11506_v26, %v1435_v58  ;;  %v1436_v1 = vmul.f32 %v11489_v42, %v1340_v8  ;;  %v1567_v16 = vsel %vm1503_vm7, %v1471_v45, %v1535_v3 }
 0x121   : > { %v11642_v56 = vmul.bf16 %v11363_v2, %v11635_v28  ;;  %1612 = vst.msk [vmem:[#allocation3 + $0xc0] sm:$0xff] %vm440_vm2, %v1595_v31  ;;  %vm1508_vm8 = vcmp.gt.f32.partialorder %v1476_v46, 0.0  ;;  %v1540_v29 = vmul.f32 0.01, %v1476_v46  ;;  %9635 = vmatmul.mubr.msk.bf16.gmra.mrb[36].mxu1 %vm440_vm2, %v11635_v28  ;;  %v1594_v49 = vpack.c.bf16 %v1567_v16, %v1566_v19 }
 0x122   : > { %vm1506_vm9 = vcmp.gt.f32.partialorder %v1474_v10, 0.0  ;;  %v1538_v23 = vmul.f32 0.01, %v1474_v10  ;;  %v1477_v58 = vadd.f32 %v11506_v26, %v1438_v53  ;;  %9638 = vmatprep.mubr.msk.bf16.mxu1 %vm440_vm2, %v11627_v7  ;;  %v1475_v8 = vadd.f32 %v11506_v26, %v1436_v1 }
 0x123   : > { %v1572_v41 = vsel %vm1508_vm8, %v1476_v46, %v1540_v29  ;;  %v11652_v31 = vrot.slane %v1978_v11, 7  ;;  %1611 = vst.msk [vmem:[#allocation3 + $0xb8] sm:$0xff] %vm440_vm2, %v1594_v49  ;;  %v1986_v16 = vshrl.u32 %v11642_v56, 16  ;;  %v13779_v46 = vrot.slane %v11359_v37, 7 }
 0x124   : > { %v1570_v45 = vsel %vm1506_vm9, %v1474_v10, %v1538_v23  ;;  %vm1509_vm10 = vcmp.gt.f32.partialorder %v1477_v58, 0.0  ;;  %v1541_v3 = vmul.f32 0.01, %v1477_v58  ;;  %v9612_v19 = vpop.f32.mrb[16].mxu1  ;;  %vm1507_vm13 = vcmp.gt.f32.partialorder %v1475_v8, 0.0 }
 0x125   : > { %v1539_v53 = vmul.f32 0.01, %v1475_v8  ;;  %v1441_v17 = vmul.f32 %v9612_v19, %v11489_v42  ;;  %v1353_v9 = vpop.f32.mrb[17].mxu1  ;;  %v1976_v1 = vsel %vm1803_vm12, %v13779_v46, %v1975_v57  ;;  %v1983_v10 = vor.u32 %v1981_v14, %v11652_v31 }
 0x126   : > { %v1573_v13 = vsel %vm1509_vm10, %v1477_v58, %v1541_v3  ;;  %v1439_v11 = vmul.f32 %v11489_v42, %v1353_v9  ;;  %v9613_v29 = vpop.f32.mrb[18].mxu1  ;;  %2113 = vst.msk [vmem:[#allocation3 + $0x8] sm:$0xff] %vm440_vm2, %v1976_v1  ;;  %v11663_v49 = vrot.slane %v1986_v16, 7 }
 0x127   : > { %v1597_v23 = vpack.c.bf16 %v1573_v13, %v1572_v41  ;;  %v1571_v20 = vsel %vm1507_vm13, %v1475_v8, %v1539_v53  ;;  %v1480_v2 = vadd.f32 %v11506_v26, %v1441_v17  ;;  %v1442_v19 = vmul.f32 %v9613_v29, %v11489_v42  ;;  %v1356_v44 = vpop.f32.mrb[19].mxu1 }
 0x128   : > { %v11667_v37 = vld [vmem:[#allocation3 + $0xc0] sm:$0xff]  ;;  %v1596_v57 = vpack.c.bf16 %v1571_v20, %v1570_v45  ;;  %v1478_v58 = vadd.f32 %v11506_v26, %v1439_v11  ;;  %v1440_v9 = vmul.f32 %v11489_v42, %v1356_v44  ;;  %v1984_v3 = vsel %vm1803_vm12, %v11618_v24, %v1983_v10 }
 0x129   : > { %v11675_v14 = vmul.bf16 %v11383_v63, %v11667_v37  ;;  %1614 = vst.msk [vmem:[#allocation3 + $0xd0] sm:$0xff] %vm440_vm2, %v1597_v23  ;;  %vm1512_vm14 = vcmp.gt.f32.partialorder %v1480_v2, 0.0  ;;  %v1544_v17 = vmul.f32 0.01, %v1480_v2  ;;  %v1481_v41 = vadd.f32 %v11506_v26, %v1442_v19  ;;  %2114 = vst.msk [vmem:[#allocation3 + $0x10] sm:$0xff] %vm440_vm2, %v1984_v3 }
 0x12a   : > { %1613 = vst.msk [vmem:[#allocation3 + $0xc8] sm:$0xff] %vm440_vm2, %v1596_v57  ;;  %vm1510_vm15 = vcmp.gt.f32.partialorder %v1478_v58, 0.0  ;;  %v1542_v20 = vmul.f32 0.01, %v1478_v58  ;;  %v1479_v44 = vadd.f32 %v11506_v26, %v1440_v9  ;;  %v1989_v24 = vshll.u32 %v11642_v56, 16  ;;  %v11683_v8 = vld [vmem:[#allocation3 + $0xb8] sm:$0xff] }
 0x12b   : > { %v1576_v45 = vsel %vm1512_vm14, %v1480_v2, %v1544_v17  ;;  %vm1513_vm0 = vcmp.gt.f32.partialorder %v1481_v41, 0.0  ;;  %v1545_v16 = vmul.f32 0.01, %v1481_v41  ;;  %v1994_v53 = vshrl.u32 %v11633_v47, 16  ;;  %9639 = vmatmul.mubr.msk.bf16.gmra.mrb[40].mxu1 %vm440_vm2, %v11683_v8 }
 0x12c   : > { %v11688_v46 = vmul.bf16 %v11388_v51, %v11683_v8  ;;  %v1574_v1 = vsel %vm1510_vm15, %v1478_v58, %v1542_v20  ;;  %vm1511_vm1 = vcmp.gt.f32.partialorder %v1479_v44, 0.0  ;;  %v1543_v13 = vmul.f32 0.01, %v1479_v44  ;;  %v9616_v11 = vpop.f32.mrb[20].mxu1  ;;  %9642 = vmatprep.mubr.msk.bf16.mxu1 %vm440_vm2, %v11667_v37 }
 0x12d   : > { %v1577_v29 = vsel %vm1513_vm0, %v1481_v41, %v1545_v16  ;;  %v1445_v2 = vmul.f32 %v9616_v11, %v11489_v42  ;;  %v1369_v56 = vpop.f32.mrb[21].mxu1  ;;  %v1991_v10 = vor.u32 %v1989_v24, %v11663_v49  ;;  %v11696_v23 = vrot.slane %v1994_v53, 7 }
 0x12e   : > { %v1599_v19 = vpack.c.bf16 %v1577_v29, %v1576_v45  ;;  %v1575_v57 = vsel %vm1511_vm1, %v1479_v44, %v1543_v13  ;;  %v1443_v58 = vmul.f32 %v11489_v42, %v1369_v56  ;;  %v9617_v9 = vpop.f32.mrb[22].mxu1  ;;  %v1997_v3 = vshll.u32 %v11633_v47, 16 }
 0x12f   : > { %v1598_v17 = vpack.c.bf16 %v1575_v57, %v1574_v1  ;;  %v1484_v41 = vadd.f32 %v11506_v26, %v1445_v2  ;;  %v1446_v20 = vmul.f32 %v9617_v9, %v11489_v42  ;;  %v1372_v16 = vpop.f32.mrb[23].mxu1  ;;  %v1992_v11 = vsel %vm1803_vm12, %v11652_v31, %v1991_v10 }
 0x130   : > { %v11704_v51 = vld [vmem:[#allocation3 + $0xd0] sm:$0xff]  ;;  %1616 = vst.msk [vmem:[#allocation3 + $0xe0] sm:$0xff] %vm440_vm2, %v1599_v19  ;;  %v1482_v44 = vadd.f32 %v11506_v26, %v1443_v58  ;;  %v1444_v24 = vmul.f32 %v11489_v42, %v1372_v16  ;;  %2115 = vst.msk [vmem:[#allocation3 + $0x18] sm:$0xff] %vm440_vm2, %v1992_v11  ;;  %v1999_v47 = vor.u32 %v1997_v3, %v11696_v23  ;;  %v2002_v45 = vshrl.u32 %v11688_v46, 16 }
 0x131   : > { %v11714_v53 = vmul.bf16 %v11391_v6, %v11704_v51  ;;  %v11716_v1 = vld [vmem:[#allocation3 + $0xc8] sm:$0xff]  ;;  %1615 = vst.msk [vmem:[#allocation3 + $0xd8] sm:$0xff] %vm440_vm2, %v1598_v17  ;;  %vm1516_vm3 = vcmp.gt.f32.partialorder %v1484_v41, 0.0  ;;  %v1548_v31 = vmul.f32 0.01, %v1484_v41  ;;  %v1485_v13 = vadd.f32 %v11506_v26, %v1446_v20 }
 0x132   : > { %v11722_v29 = vmul.bf16 %v11397_v60, %v11716_v1  ;;  %vm1514_vm4 = vcmp.gt.f32.partialorder %v1482_v44, 0.0  ;;  %v1546_v2 = vmul.f32 0.01, %v1482_v44  ;;  %v1483_v56 = vadd.f32 %v11506_v26, %v1444_v24 }
 0x133   : > { %v1580_v10 = vsel %vm1516_vm3, %v1484_v41, %v1548_v31  ;;  %vm1517_vm5 = vcmp.gt.f32.partialorder %v1485_v13, 0.0  ;;  %v1549_v19 = vmul.f32 0.01, %v1485_v13  ;;  %v2000_v57 = vsel %vm1803_vm12, %v11663_v49, %v1999_v47  ;;  %9643 = vmatmul.mubr.msk.bf16.gmra.mrb[44].mxu1 %vm440_vm2, %v11716_v1 }
 0x134   : > { %v1578_v58 = vsel %vm1514_vm4, %v1482_v44, %v1546_v2  ;;  %vm1515_vm6 = vcmp.gt.f32.partialorder %v1483_v56, 0.0  ;;  %v1547_v9 = vmul.f32 0.01, %v1483_v56  ;;  %v9620_v3 = vpop.f32.mrb[24].mxu1  ;;  %2116 = vst.msk [vmem:[#allocation3 + $0x20] sm:$0xff] %vm440_vm2, %v2000_v57  ;;  %v2004_v17 = vrot.slane %v2002_v45, 7  ;;  %9646 = vmatprep.mubr.msk.bf16.mxu1 %vm440_vm2, %v11704_v51 }
 0x135   : > { %v1581_v20 = vsel %vm1517_vm5, %v1485_v13, %v1549_v19  ;;  %v1449_v41 = vmul.f32 %v9620_v3, %v11489_v42  ;;  %v1385_v16 = vpop.f32.mrb[25].mxu1  ;;  %v2005_v11 = vshll.u32 %v11688_v46, 16  ;;  %v2010_v49 = vshrl.u32 %v11675_v14, 16 }
 0x136   : > { %v1601_v44 = vpack.c.bf16 %v1581_v20, %v1580_v10  ;;  %v1579_v24 = vsel %vm1515_vm6, %v1483_v56, %v1547_v9  ;;  %v1447_v47 = vmul.f32 %v11489_v42, %v1385_v16  ;;  %v9621_v31 = vpop.f32.mrb[26].mxu1  ;;  %v2013_v2 = vshll.u32 %v11675_v14, 16 }
 0x137   : > { %v11737_v57 = vld [vmem:[#allocation3 + $0xe0] sm:$0xff]  ;;  %v1600_v45 = vpack.c.bf16 %v1579_v24, %v1578_v58  ;;  %v1488_v13 = vadd.f32 %v11506_v26, %v1449_v41  ;;  %v1450_v19 = vmul.f32 %v9621_v31, %v11489_v42  ;;  %v1388_v3 = vpop.f32.mrb[27].mxu1  ;;  %v2007_v6 = vor.u32 %v2005_v11, %v2004_v17 }
 0x138   : > { %v11743_v46 = vmul.bf16 %v11412_v30, %v11737_v57  ;;  %v11745_v10 = vld [vmem:[#allocation3 + $0xd8] sm:$0xff]  ;;  %1618 = vst.msk [vmem:[#allocation3 + $0xf0] sm:$0xff] %vm440_vm2, %v1601_v44  ;;  %v1486_v56 = vadd.f32 %v11506_v26, %v1447_v47  ;;  %v1448_v14 = vmul.f32 %v11489_v42, %v1388_v3  ;;  %v2012_v9 = vrot.slane %v2010_v49, 7 }
 0x139   : > { %v11752_v58 = vmul.bf16 %v11415_v25, %v11745_v10  ;;  %1617 = vst.msk [vmem:[#allocation3 + $0xe8] sm:$0xff] %vm440_vm2, %v1600_v45  ;;  %vm1520_vm7 = vcmp.gt.f32.partialorder %v1488_v13, 0.0  ;;  %v1552_v20 = vmul.f32 0.01, %v1488_v13  ;;  %v1489_v41 = vadd.f32 %v11506_v26, %v1450_v19 }
 0x13a   : > { %vm1518_vm8 = vcmp.gt.f32.partialorder %v1486_v56, 0.0  ;;  %v1550_v16 = vmul.f32 0.01, %v1486_v56  ;;  %v1487_v11 = vadd.f32 %v11506_v26, %v1448_v14  ;;  %v2008_v44 = vsel %vm1803_vm12, %v11696_v23, %v2007_v6 }
 0x13b   : > { %v1584_v24 = vsel %vm1520_vm7, %v1488_v13, %v1552_v20  ;;  %vm1521_vm9 = vcmp.gt.f32.partialorder %v1489_v41, 0.0  ;;  %v1553_v49 = vmul.f32 0.01, %v1489_v41  ;;  %2117 = vst.msk [vmem:[#allocation3 + $0x28] sm:$0xff] %vm440_vm2, %v2008_v44  ;;  %v2015_v47 = vor.u32 %v2013_v2, %v2012_v9  ;;  %9647 = vmatmul.mubr.msk.bf16.gmra.mrb[48].mxu1 %vm440_vm2, %v11745_v10 }
 0x13c   : > { %v1582_v31 = vsel %vm1518_vm8, %v1486_v56, %v1550_v16  ;;  %vm1519_vm10 = vcmp.gt.f32.partialorder %v1487_v11, 0.0  ;;  %v1551_v45 = vmul.f32 0.01, %v1487_v11  ;;  %v9624_v19 = vpop.f32.mrb[28].mxu1  ;;  %v2018_v3 = vshrl.u32 %v11722_v29, 16  ;;  %9650 = vmatprep.mubr.msk.bf16.mxu1 %vm440_vm2, %v11737_v57 }
 0x13d   : > { %v1585_v30 = vsel %vm1521_vm9, %v1489_v41, %v1553_v49  ;;  %v1453_v6 = vmul.f32 %v9624_v19, %v11489_v42  ;;  %v1401_v23 = vpop.f32.mrb[29].mxu1  ;;  %v2016_v13 = vsel %vm1803_vm12, %v2004_v17, %v2015_v47  ;;  %v2021_v2 = vshll.u32 %v11722_v29, 16 }
 0x13e   : > { %v1603_v56 = vpack.c.bf16 %v1585_v30, %v1584_v24  ;;  %v1583_v14 = vsel %vm1519_vm10, %v1487_v11, %v1551_v45  ;;  %v1451_v20 = vmul.f32 %v11489_v42, %v1401_v23  ;;  %v9625_v16 = vpop.f32.mrb[30].mxu1  ;;  %2118 = vst.msk [vmem:[#allocation3 + $0x30] sm:$0xff] %vm440_vm2, %v2016_v13  ;;  %v2020_v44 = vrot.slane %v2018_v3, 7 }
 0x13f   : > { %v11770_v25 = vld [vmem:[#allocation3 + $0xf0] sm:$0xff]  ;;  %v1602_v41 = vpack.c.bf16 %v1583_v14, %v1582_v31  ;;  %v1492_v49 = vadd.f32 %v11506_v26, %v1453_v6  ;;  %v1454_v19 = vmul.f32 %v9625_v16, %v11489_v42  ;;  %v1404_v60 = vpop.f32.mrb[31].mxu1  ;;  %v2026_v17 = vshrl.u32 %v11714_v53, 16 }
 0x140   : > { %v11777_v30 = vmul.bf16 %v11418_v15, %v11770_v25  ;;  %v11779_v29 = vld [vmem:[#allocation3 + $0xe8] sm:$0xff]  ;;  %1620 = vst.msk [vmem:[#allocation3 + $0x100] sm:$0xff] %vm440_vm2, %v1603_v56  ;;  %v1490_v11 = vadd.f32 %v11506_v26, %v1451_v20  ;;  %v1452_v24 = vmul.f32 %v11489_v42, %v1404_v60  ;;  %v2023_v47 = vor.u32 %v2021_v2, %v2020_v44 }
 0x141   : > { %v1796_v31 = vmul.bf16 %v11421_v40, %v11779_v29  ;;  %1619 = vst.msk [vmem:[#allocation3 + $0xf8] sm:$0xff] %vm440_vm2, %v1602_v41  ;;  %vm1524_vm13 = vcmp.gt.f32.partialorder %v1492_v49, 0.0  ;;  %v1556_v45 = vmul.f32 0.01, %v1492_v49  ;;  %v1493_v3 = vadd.f32 %v11506_v26, %v1454_v19 }
 0x142   : > { %vm1522_vm14 = vcmp.gt.f32.partialorder %v1490_v11, 0.0  ;;  %v1554_v6 = vmul.f32 0.01, %v1490_v11  ;;  %v1491_v23 = vadd.f32 %v11506_v26, %v1452_v24  ;;  %v2024_v13 = vsel %vm1803_vm12, %v2012_v9, %v2023_v47 }
 0x143   : > { %v1588_v56 = vsel %vm1524_vm13, %v1492_v49, %v1556_v45  ;;  %vm1525_vm15 = vcmp.gt.f32.partialorder %v1493_v3, 0.0  ;;  %v1557_v14 = vmul.f32 0.01, %v1493_v3  ;;  %2119 = vst.msk [vmem:[#allocation3 + $0x38] sm:$0xff] %vm440_vm2, %v2024_v13  ;;  %v2028_v60 = vrot.slane %v2026_v17, 7  ;;  %9651 = vmatmul.mubr.msk.bf16.gmra.mrb[52].mxu1 %vm440_vm2, %v11779_v29 }
 0x144   : > { %v1586_v42 = vsel %vm1522_vm14, %v1490_v11, %v1554_v6  ;;  %vm1523_vm0 = vcmp.gt.f32.partialorder %v1491_v23, 0.0  ;;  %v1555_v2 = vmul.f32 0.01, %v1491_v23  ;;  %v2029_v20 = vshll.u32 %v11714_v53, 16  ;;  %9654 = vmatprep.mubr.msk.bf16.mxu1 %vm440_vm2, %v11770_v25 }
 0x145   : > { %v1589_v16 = vsel %vm1525_vm15, %v1493_v3, %v1557_v14  ;;  %v2034_v26 = vshrl.u32 %v11752_v58, 16  ;;  %v2037_v9 = vshll.u32 %v11752_v58, 16  ;;  %v2042_v41 = vshrl.u32 %v11743_v46, 16 }
 0x146   : > { %v1605_v49 = vpack.c.bf16 %v1589_v16, %v1588_v56  ;;  %v1587_v19 = vsel %vm1523_vm0, %v1491_v23, %v1555_v2  ;;  %v2031_v17 = vor.u32 %v2029_v20, %v2028_v60  ;;  %v2045_v11 = vshll.u32 %v11743_v46, 16 }
 0x147   : > { %v11800_v24 = vld [vmem:[#allocation3 + $0x100] sm:$0xff]  ;;  %v1604_v47 = vpack.c.bf16 %v1587_v19, %v1586_v42  ;;  %v2036_v45 = vrot.slane %v2034_v26, 7  ;;  %v2044_v53 = vrot.slane %v2042_v41, 7  ;;  %v2050_v3 = vshrl.u32 %v1796_v31, 16 }
 0x148   : > { %v1799_v6 = vmul.bf16 %v11424_v52, %v11800_v24  ;;  %v11804_v13 = vld [vmem:[#allocation3 + $0xf8] sm:$0xff]  ;;  %1622 = vst.msk [vmem:[#allocation3 + $0x110] sm:$0xff] %vm440_vm2, %v1605_v49  ;;  %v2032_v58 = vsel %vm1803_vm12, %v2020_v44, %v2031_v17  ;;  %v2053_v56 = vshll.u32 %v1796_v31, 16  ;;  %v2058_v23 = vshrl.u32 %v11777_v30, 16 }
 0x149   : > { %v1798_v46 = vmul.bf16 %v11433_v50, %v11804_v13  ;;  %1621 = vst.msk [vmem:[#allocation3 + $0x108] sm:$0xff] %vm440_vm2, %v1604_v47  ;;  %2120 = vst.msk [vmem:[#allocation3 + $0x40] sm:$0xff] %vm440_vm2, %v2032_v58  ;;  %v2039_v14 = vor.u32 %v2037_v9, %v2036_v45  ;;  %v2047_v42 = vor.u32 %v2045_v11, %v2044_v53  ;;  %v2052_v2 = vrot.slane %v2050_v3, 7 }
 0x14a   : > { %v2060_v20 = vrot.slane %v2058_v23, 7  ;;  %v2061_v16 = vshll.u32 %v11777_v30, 16  ;;  %v2074_v26 = vshrl.u32 %v1799_v6, 16  ;;  %v2077_v41 = vshll.u32 %v1799_v6, 16 }
 0x14b   : > { %v2040_v44 = vsel %vm1803_vm12, %v2028_v60, %v2039_v14  ;;  %v2048_v31 = vsel %vm1803_vm12, %v2036_v45, %v2047_v42  ;;  %v2055_v49 = vor.u32 %v2053_v56, %v2052_v2  ;;  %v2066_v19 = vshrl.u32 %v1798_v46, 16  ;;  %9655 = vmatmul.mubr.msk.bf16.gmra.mrb[56].mxu1 %vm440_vm2, %v11804_v13 }
 0x14c   : > { %2121 = vst.msk [vmem:[#allocation3 + $0x48] sm:$0xff] %vm440_vm2, %v2040_v44  ;;  %2122 = vst.msk [vmem:[#allocation3 + $0x50] sm:$0xff] %vm440_vm2, %v2048_v31  ;;  %v2063_v9 = vor.u32 %v2061_v16, %v2060_v20  ;;  %v2069_v17 = vshll.u32 %v1798_v46, 16  ;;  %v11820_v11 = vrot.slane %v2074_v26, 7  ;;  %v13780_v30 = vshrl.u32 %v11603_v61, 16  ;;  %9658 = vmatprep.mubr.msk.bf16.mxu1 %vm440_vm2, %v11800_v24 }
 0x14d   : > { %v2056_v60 = vsel %vm1803_vm12, %v2044_v53, %v2055_v49  ;;  %v2068_v45 = vrot.slane %v2066_v19, 7  ;;  %v13781_v3 = vshll.u32 %v11596_v48, 16  ;;  %v1950_v58 = vmul.bf16 %v11476_v21, %v11635_v28  ;;  %v2294_v19 = vld [vmem:[#allocation3] sm:$0xff] }
 0x14e   : > { %v2135_v47 = vor.u32 %v11620_v36, %v13780_v30  ;;  %2123 = vst.msk [vmem:[#allocation3 + $0x58] sm:$0xff] %vm440_vm2, %v2056_v60  ;;  %v2064_v56 = vsel %vm1803_vm12, %v2052_v2, %v2063_v9  ;;  %v2079_v61 = vor.u32 %v2077_v41, %v11820_v11  ;;  %v2141_v36 = vshrl.u32 %v11596_v48, 16 }
 0x14f   : > { %v2139_v6 = vrot.slane %v13781_v3, 1  ;;  %v1951_v23 = vmul.bf16 %v11496_v62, %v11627_v7  ;;  %v11838_v46 = vld [vmem:[#allocation3 + $0x110] sm:$0xff]  ;;  %2124 = vst.msk [vmem:[#allocation3 + $0x60] sm:$0xff] %vm440_vm2, %v2064_v56  ;;  %v2071_v53 = vor.u32 %v2069_v17, %v2068_v45  ;;  %v2145_v42 = vshll.u32 %v1950_v58, 16 }
 0x150   : > { %v2149_v28 = vshrl.u32 %v1950_v58, 16  ;;  %v11844_v16 = vmul.bf16 %v11459_v32, %v11838_v46  ;;  %v11846_v2 = vld [vmem:[#allocation3 + $0x108] sm:$0xff]  ;;  %v2080_v48 = vsel %vm1803_vm12, %v2068_v45, %v2079_v61  ;;  %v1952_v49 = vmul.bf16 %v11509_v22, %v11683_v8 }
 0x151   : > { %v2140_v14 = vsel %vm1640_vm11, %v2135_v47, %v2139_v6  ;;  %v2143_v7 = vor.u32 %v2141_v36, %v2139_v6  ;;  %v2153_v26 = vshll.u32 %v1951_v23, 16  ;;  %v1800_v41 = vmul.bf16 %v11472_v33, %v11846_v2  ;;  %2126 = vst.msk [vmem:[#allocation3 + $0x70] sm:$0xff] %vm440_vm2, %v2080_v48  ;;  %v12163_v32 = vld [vmem:[#allocation3 + $0x108] sm:$0xff] }
 0x152   : > { %2278 = vst.msk [vmem:[#allocation3 + $0x128] sm:$0xff] %vm440_vm2, %v2140_v14  ;;  %v2072_v44 = vsel %vm1803_vm12, %v2060_v20, %v2071_v53  ;;  %v2147_v31 = vrot.slane %v2145_v42, 1  ;;  %v2157_v17 = vshrl.u32 %v1951_v23, 16  ;;  %v1953_v30 = vmul.bf16 %v11512_v27, %v11667_v37  ;;  %v13782_v14 = vld [vmem:[#allocation49_spill] sm:$0xff] }
 0x153   : > { %2125 = vst.msk [vmem:[#allocation3 + $0x68] sm:$0xff] %vm440_vm2, %v2072_v44  ;;  %v2155_v9 = vrot.slane %v2153_v26, 1  ;;  %v1954_v47 = vmul.bf16 %v11518_v39, %v11716_v1  ;;  %v2082_v60 = vshrl.u32 %v1800_v41, 16  ;;  %v2085_v45 = vshll.u32 %v1800_v41, 16  ;;  %9659 = vmatmul.mubr.msk.bf16.gmra.mrb[60].mxu1 %vm440_vm2, %v11846_v2  ;;  %v13783_v26 = vld [vmem:[#allocation50_spill] sm:$0xff]  ;;  %v13784_v44 = vld [vmem:[#allocation51_spill] sm:$0xff] }
 0x154   : > { %v2148_v20 = vsel %vm1640_vm11, %v2143_v7, %v2147_v31  ;;  %v2151_v3 = vor.u32 %v2149_v28, %v2147_v31  ;;  %v2161_v6 = vshll.u32 %v1952_v49, 16  ;;  %v2165_v58 = vshrl.u32 %v1952_v49, 16  ;;  %9666 = vmatprep.mubr.msk.bf16.mxu1 %vm440_vm2, %v2294_v19 }
 0x155   : > { %2279 = vst.msk [vmem:[#allocation3 + $0x130] sm:$0xff] %vm440_vm2, %v2148_v20  ;;  %v2159_v8 = vor.u32 %v2157_v17, %v2155_v9  ;;  %v2169_v56 = vshll.u32 %v1953_v30, 16  ;;  %v11866_v37 = vrot.slane %v2082_v60, 7  ;;  %v2173_v61 = vshrl.u32 %v1953_v30, 16 }
 0x156   : > { %v2156_v1 = vsel %vm1640_vm11, %v2151_v3, %v2155_v9  ;;  %v2177_v36 = vshll.u32 %v1954_v47, 16  ;;  %v2163_v23 = vrot.slane %v2161_v6, 1  ;;  %v1955_v42 = vmul.bf16 %v13782_v14, %v11704_v51 }
 0x157   : > { %2280 = vst.msk [vmem:[#allocation3 + $0x138] sm:$0xff] %vm440_vm2, %v2156_v1  ;;  %v2171_v53 = vrot.slane %v2169_v56, 1  ;;  %v2181_v28 = vshrl.u32 %v1954_v47, 16  ;;  %v2087_v48 = vor.u32 %v2085_v45, %v11866_v37  ;;  %v1956_v41 = vmul.bf16 %v13783_v26, %v11745_v10  ;;  %v10872_v10 = vld [vmem:[%s13654_s4 + $0x28] sm:$0xff]   ;;  %v11895_v1 = vld [vmem:[#allocation3 + $0x10] sm:$0xff] }
 0x158   : > { %v2179_v7 = vrot.slane %v2177_v36, 1  ;;  %v1957_v31 = vmul.bf16 %v13784_v44, %v11737_v57  ;;  %v2164_v49 = vsel %vm1640_vm11, %v2159_v8, %v2163_v23  ;;  %v2167_v19 = vor.u32 %v2165_v58, %v2163_v23  ;;  %v11887_v8 = vld [vmem:[#allocation3 + $0x8] sm:$0xff] }
 0x159   : > { %v2175_v9 = vor.u32 %v2173_v61, %v2171_v53  ;;  %v2185_v17 = vshll.u32 %v1955_v42, 16  ;;  %v2088_v30 = vsel %vm1803_vm12, %v11820_v11, %v2087_v48  ;;  %2281 = vst.msk [vmem:[#allocation3 + $0x140] sm:$0xff] %vm440_vm2, %v2164_v49  ;;  %v2189_v47 = vshrl.u32 %v1955_v42, 16  ;;  %v3876_v44 = vld [vmem:[#allocation3 + $0x28] sm:$0xff] }
 0x15a   : > { %v2183_v51 = vor.u32 %v2181_v28, %v2179_v7  ;;  %v2193_v60 = vshll.u32 %v1956_v41, 16  ;;  %2127 = vst.msk [vmem:[#allocation3 + $0x78] sm:$0xff] %vm440_vm2, %v2088_v30  ;;  %v2172_v57 = vsel %vm1640_vm11, %v2167_v19, %v2171_v53  ;;  %v2197_v3 = vshrl.u32 %v1956_v41, 16 }
 0x15b   : > { %v2180_v45 = vsel %vm1640_vm11, %v2175_v9, %v2179_v7  ;;  %v2187_v20 = vrot.slane %v2185_v17, 1  ;;  %2282 = vst.msk [vmem:[#allocation3 + $0x148] sm:$0xff] %vm440_vm2, %v2172_v57  ;;  %v2201_v6 = vshll.u32 %v1957_v31, 16  ;;  %v1958_v58 = vmul.bf16 %v11565_v4, %v11779_v29  ;;  %9667 = vmatmul.mubr.msk.bf16.vlgmr.msra.gmra.mrb[32].mxu1 %vm440_vm2, %v11887_v8  ;;  %v11909_v7 = vld [vmem:[%s13654_s4 + $0x30] sm:$0xff]   ;;  %v10883_v4 = vld [vmem:[%s13654_s4 + $0x80] sm:$0xff]  }
 0x15c   : > { %2283 = vst.msk [vmem:[#allocation3 + $0x150] sm:$0xff] %vm440_vm2, %v2180_v45  ;;  %v2195_v11 = vrot.slane %v2193_v60, 1  ;;  %v2205_v56 = vshrl.u32 %v1957_v31, 16  ;;  %v1959_v23 = vmul.bf16 %v11560_v18, %v11770_v25  ;;  %v1960_v53 = vmul.bf16 %v11572_v5, %v11804_v13  ;;  %9699 = vmatpush3.bf16.msra.mxu1 %v11616_v38  ;;  %9670 = vmatprep.mubr.msk.bf16.mxu1 %vm440_vm2, %v11895_v1  ;;  %v3874_v5 = vld [vmem:[#allocation3 + $0x18] sm:$0xff]  ;;  %v3875_v18 = vld [vmem:[#allocation3 + $0x20] sm:$0xff] }
 0x15d   : > { %v2188_v61 = vsel %vm1640_vm11, %v2183_v51, %v2187_v20  ;;  %v2191_v36 = vor.u32 %v2189_v47, %v2187_v20  ;;  %v2203_v42 = vrot.slane %v2201_v6, 1  ;;  %v2209_v28 = vshll.u32 %v1958_v58, 16  ;;  %9700 = vmatprep.subr.bf16.mxu1 %v10872_v10 }
 0x15e   : > { %2284 = vst.msk [vmem:[#allocation3 + $0x158] sm:$0xff] %vm440_vm2, %v2188_v61  ;;  %v2199_v29 = vor.u32 %v2197_v3, %v2195_v11  ;;  %v2213_v48 = vshrl.u32 %v1958_v58, 16  ;;  %v2217_v13 = vshll.u32 %v1959_v23, 16  ;;  %v2221_v41 = vshrl.u32 %v1959_v23, 16 }
 0x15f   : > { %v2196_v25 = vsel %vm1640_vm11, %v2191_v36, %v2195_v11  ;;  %v2225_v38 = vshll.u32 %v1960_v53, 16  ;;  %v2207_v49 = vor.u32 %v2205_v56, %v2203_v42  ;;  %v2211_v19 = vrot.slane %v2209_v28, 1 }
 0x160   : > { %2285 = vst.msk [vmem:[#allocation3 + $0x160] sm:$0xff] %vm440_vm2, %v2196_v25  ;;  %v2204_v31 = vsel %vm1640_vm11, %v2199_v29, %v2203_v42  ;;  %v1961_v9 = vmul.bf16 %v11568_v43, %v11800_v24  ;;  %v2219_v17 = vrot.slane %v2217_v13, 1  ;;  %v2229_v51 = vshrl.u32 %v1960_v53, 16  ;;  %9701 = vmatpush3.bf16.msra.mxu1 %v10872_v10  ;;  %v10881_v43 = vld [vmem:[%s13654_s4 + $0x70] sm:$0xff]  }
 0x161   : > { %2286 = vst.msk [vmem:[#allocation3 + $0x168] sm:$0xff] %vm440_vm2, %v2204_v31  ;;  %v2227_v30 = vrot.slane %v2225_v38, 1  ;;  %v1962_v47 = vmul.bf16 %v11582_v34, %v11846_v2  ;;  %v2212_v60 = vsel %vm1640_vm11, %v2207_v49, %v2211_v19  ;;  %v2215_v57 = vor.u32 %v2213_v48, %v2211_v19  ;;  %9734 = vmatprep.subr.bf16.mxu1 %v11909_v7  ;;  %v11927_v2 = vld [vmem:[#allocation3 + $0x18] sm:$0xff]  ;;  %v10880_v34 = vld [vmem:[%s13654_s4 + $0x68] sm:$0xff]  }
 0x162   : > { %v2233_v45 = vshll.u32 %v1961_v9, 16  ;;  %v13785_v20 = vmul.bf16 %v11544_v55, %v11577_v35  ;;  %2287 = vst.msk [vmem:[#allocation3 + $0x170] sm:$0xff] %vm440_vm2, %v2212_v60  ;;  %v2223_v24 = vor.u32 %v2221_v41, %v2219_v17  ;;  %v1963_v58 = vmul.bf16 %v11575_v12, %v11838_v46  ;;  %v11933_v35 = vld [vmem:[#allocation3 + $0x20] sm:$0xff]  ;;  %v11960_v60 = vld [vmem:[#allocation3 + $0x38] sm:$0xff]  ;;  %v12167_v12 = vld [vmem:[#allocation3 + $0x110] sm:$0xff] }
 0x163   : > { %v2231_v11 = vor.u32 %v2229_v51, %v2227_v30  ;;  %v2241_v6 = vshll.u32 %v1962_v47, 16  ;;  %v2220_v10 = vsel %vm1640_vm11, %v2215_v57, %v2219_v17  ;;  %v2237_v61 = vshrl.u32 %v1961_v9, 16  ;;  %9671 = vmatmul.mubr.msk.bf16.gmra.mrb[36].mxu1 %vm440_vm2, %v11927_v2  ;;  %v11951_v51 = vld [vmem:[#allocation3 + $0x28] sm:$0xff] }
 0x164   : > { %v2257_v3 = vshll.u32 %v13785_v20, 16  ;;  %v2235_v56 = vrot.slane %v2233_v45, 1  ;;  %v2090_v36 = vshrl.u32 %v11844_v16, 16  ;;  %2288 = vst.msk [vmem:[#allocation3 + $0x178] sm:$0xff] %vm440_vm2, %v2220_v10  ;;  %v2228_v23 = vsel %vm1640_vm11, %v2223_v24, %v2227_v30  ;;  %9674 = vmatprep.mubr.msk.bf16.mxu1 %vm440_vm2, %v11933_v35  ;;  %v11968_v57 = vld [vmem:[#allocation3 + $0x48] sm:$0xff]  ;;  %v11972_v45 = vld [vmem:[#allocation3 + $0x50] sm:$0xff] }
 0x165   : > { %v2243_v53 = vrot.slane %v2241_v6, 1  ;;  %v2245_v29 = vshrl.u32 %v1962_v47, 16  ;;  %v2249_v46 = vshll.u32 %v1963_v58, 16  ;;  %2289 = vst.msk [vmem:[#allocation3 + $0x180] sm:$0xff] %vm440_vm2, %v2228_v23  ;;  %v2093_v25 = vshll.u32 %v11844_v16, 16  ;;  %v11956_v47 = vld [vmem:[#allocation3 + $0x30] sm:$0xff] }
 0x166   : > { %v2236_v42 = vsel %vm1640_vm11, %v2231_v11, %v2235_v56  ;;  %v2239_v28 = vor.u32 %v2237_v61, %v2235_v56  ;;  %v2092_v48 = vrot.slane %v2090_v36, 7  ;;  %v2253_v38 = vshrl.u32 %v1963_v58, 16  ;;  %v11976_v20 = vld [vmem:[#allocation3 + $0x58] sm:$0xff]  ;;  %v11984_v24 = vld [vmem:[#allocation3 + $0x68] sm:$0xff]  ;;  %v11988_v11 = vld [vmem:[#allocation3 + $0x70] sm:$0xff] }
 0x167   : > { %2290 = vst.msk [vmem:[#allocation3 + $0x188] sm:$0xff] %vm440_vm2, %v2236_v42  ;;  %v2247_v13 = vor.u32 %v2245_v29, %v2243_v53  ;;  %v2251_v41 = vrot.slane %v2249_v46, 1  ;;  %v2259_v31 = vrot.slane %v2257_v3, 1  ;;  %v11980_v3 = vld [vmem:[#allocation3 + $0x60] sm:$0xff]  ;;  %v11992_v58 = vld [vmem:[#allocation3 + $0x78] sm:$0xff]  ;;  %v12000_v56 = vld [vmem:[#allocation3 + $0x128] sm:$0xff] }
 0x168   : > { %v2244_v49 = vsel %vm1640_vm11, %v2239_v28, %v2243_v53  ;;  %v2095_v19 = vor.u32 %v2093_v25, %v2092_v48  ;;  %v2777_v6 = vld [vmem:[#allocation3 + $0x120] sm:$0xff]  ;;  %v10874_v10 = vld [vmem:[%s13654_s4 + $0x38] sm:$0xff]   ;;  %v12004_v61 = vld [vmem:[#allocation3 + $0x130] sm:$0xff] }
 0x169   : > { %2291 = vst.msk [vmem:[#allocation3 + $0x190] sm:$0xff] %vm440_vm2, %v2244_v49  ;;  %v2252_v9 = vsel %vm1640_vm11, %v2247_v13, %v2251_v41  ;;  %v2255_v17 = vor.u32 %v2253_v38, %v2251_v41  ;;  %v10875_v36 = vld [vmem:[%s13654_s4 + $0x40] sm:$0xff]   ;;  %v12012_v23 = vld [vmem:[#allocation3 + $0x138] sm:$0xff]  ;;  %v12024_v29 = vld [vmem:[#allocation3 + $0x150] sm:$0xff] }
 0x16a   : > { %2292 = vst.msk [vmem:[#allocation3 + $0x198] sm:$0xff] %vm440_vm2, %v2252_v9  ;;  %v2096_v30 = vsel %vm1803_vm12, %v11866_v37, %v2095_v19  ;;  %v11964_v37 = vld [vmem:[#allocation3 + $0x40] sm:$0xff]  ;;  %v12028_v46 = vld [vmem:[#allocation3 + $0x158] sm:$0xff]  ;;  %v12036_v28 = vld [vmem:[#allocation3 + $0x168] sm:$0xff] }
 0x16b   : > { %2128 = vst.msk [vmem:[#allocation3 + $0x80] sm:$0xff] %vm440_vm2, %v2096_v30  ;;  %v2260_v16 = vsel %vm1640_vm11, %v2255_v17, %v2259_v31  ;;  %9675 = vmatmul.mubr.msk.bf16.gmra.mrb[40].mxu1 %vm440_vm2, %v11951_v51  ;;  %v12016_v53 = vld [vmem:[#allocation3 + $0x140] sm:$0xff]  ;;  %v12040_v48 = vld [vmem:[#allocation3 + $0x170] sm:$0xff]  ;;  %v12044_v25 = vld [vmem:[#allocation3 + $0x178] sm:$0xff] }
 0x16c   : > { %2293 = vst.msk [vmem:[#allocation3 + $0x1a0] sm:$0xff] %vm440_vm2, %v2260_v16  ;;  %9678 = vmatprep.mubr.msk.bf16.mxu1 %vm440_vm2, %v11956_v47  ;;  %v12032_v42 = vld [vmem:[#allocation3 + $0x160] sm:$0xff]  ;;  %v10876_v49 = vld [vmem:[%s13654_s4 + $0x48] sm:$0xff]   ;;  %v10877_v19 = vld [vmem:[%s13654_s4 + $0x50] sm:$0xff]  }
 0x16d   : > { %v12048_v13 = vld [vmem:[#allocation3 + $0x180] sm:$0xff]  ;;  %v12112_v9 = vld [vmem:[#allocation3 + $0xa8] sm:$0xff]  ;;  %v12119_v30 = vld [vmem:[#allocation3 + $0xb0] sm:$0xff] }
 0x16e   : > { %v12052_v41 = vld [vmem:[#allocation3 + $0x188] sm:$0xff]  ;;  %v10879_v17 = vld [vmem:[%s13654_s4 + $0x60] sm:$0xff]   ;;  %v12123_v16 = vld [vmem:[#allocation3 + $0xb8] sm:$0xff] }
 0x170   : > { %v12056_v38 = vld [vmem:[#allocation3 + $0x190] sm:$0xff] }
 0x171   : > { %v12060_v31 = vld [vmem:[#allocation3 + $0x198] sm:$0xff] }
 0x173   : > { %9679 = vmatmul.mubr.msk.bf16.gmra.mrb[44].mxu1 %vm440_vm2, %v11960_v60 }
 0x174   : > { %9682 = vmatprep.mubr.msk.bf16.mxu1 %vm440_vm2, %v11964_v37 }
 0x17b   : > { %9683 = vmatmul.mubr.msk.bf16.gmra.mrb[48].mxu1 %vm440_vm2, %v11968_v57 }
 0x17c   : > { %9686 = vmatprep.mubr.msk.bf16.mxu1 %vm440_vm2, %v11972_v45 }
 0x183   : > { %9687 = vmatmul.mubr.msk.bf16.gmra.mrb[52].mxu1 %vm440_vm2, %v11976_v20 }
 0x184   : > { %9690 = vmatprep.mubr.msk.bf16.mxu1 %vm440_vm2, %v11980_v3 }
 0x18b   : > { %9691 = vmatmul.mubr.msk.bf16.gmra.mrb[56].mxu1 %vm440_vm2, %v11984_v24 }
 0x18c   : > { %9694 = vmatprep.mubr.msk.bf16.mxu1 %vm440_vm2, %v11988_v11 }
 0x193   : > { %9695 = vmatmul.mubr.msk.bf16.gmra.mrb[60].mxu1 %vm440_vm2, %v11992_v58 }
 0x194   : > { %9702 = vmatprep.mubr.msk.bf16.mxu1 %vm440_vm2, %v2777_v6  ;;  %v12135_v6 = vld [vmem:[#allocation3 + $0xd0] sm:$0xff] }
 0x19b   : > { %9703 = vmatmul.mubr.msk.bf16.vlgmr.msra.gmra.mrb[32].mxu1 %vm440_vm2, %v12000_v56 }
 0x19c   : > { %9735 = vmatpush3.bf16.msra.mxu1 %v11909_v7  ;;  %9706 = vmatprep.mubr.msk.bf16.mxu1 %vm440_vm2, %v12004_v61  ;;  %v12020_v7 = vld [vmem:[#allocation3 + $0x148] sm:$0xff] }
 0x19d   : > { %9736 = vmatprep.subr.bf16.mxu1 %v10874_v10 }
 0x1a0   : > { %9737 = vmatpush3.bf16.msra.mxu1 %v10874_v10  ;;  %v12139_v10 = vld [vmem:[#allocation3 + $0xd8] sm:$0xff] }
 0x1a1   : > { %9770 = vmatprep.subr.bf16.mxu1 %v10875_v36 }
 0x1a3   : > { %9707 = vmatmul.mubr.msk.bf16.gmra.mrb[36].mxu1 %vm440_vm2, %v12012_v23 }
 0x1a4   : > { %9710 = vmatprep.mubr.msk.bf16.mxu1 %vm440_vm2, %v12016_v53 }
 0x1ab   : > { %9711 = vmatmul.mubr.msk.bf16.gmra.mrb[40].mxu1 %vm440_vm2, %v12020_v7 }
 0x1ac   : > { %9714 = vmatprep.mubr.msk.bf16.mxu1 %vm440_vm2, %v12024_v29 }
 0x1b3   : > { %9715 = vmatmul.mubr.msk.bf16.gmra.mrb[44].mxu1 %vm440_vm2, %v12028_v46 }
 0x1b4   : > { %9718 = vmatprep.mubr.msk.bf16.mxu1 %vm440_vm2, %v12032_v42 }
 0x1bb   : > { %9719 = vmatmul.mubr.msk.bf16.gmra.mrb[48].mxu1 %vm440_vm2, %v12036_v28 }
 0x1bc   : > { %9722 = vmatprep.mubr.msk.bf16.mxu1 %vm440_vm2, %v12040_v48 }
 0x1c3   : > { %9723 = vmatmul.mubr.msk.bf16.gmra.mrb[52].mxu1 %vm440_vm2, %v12044_v25 }
 0x1c4   : > { %9726 = vmatprep.mubr.msk.bf16.mxu1 %vm440_vm2, %v12048_v13 }
 0x1cb   : > { %9727 = vmatmul.mubr.msk.bf16.gmra.mrb[56].mxu1 %vm440_vm2, %v12052_v41 }
 0x1cc   : > { %9730 = vmatprep.mubr.msk.bf16.mxu1 %vm440_vm2, %v12056_v38 }
 0x1d3   : > { %9731 = vmatmul.mubr.msk.bf16.gmra.mrb[60].mxu1 %vm440_vm2, %v12060_v31 }
 0x1d4   : > { %9738 = vmatprep.mubr.msk.bf16.mxu1 %vm440_vm2, %v11887_v8  ;;  %v12100_v8 = vld [vmem:[#allocation3 + $0x80] sm:$0xff] }
 0x1db   : > { %9739 = vmatmul.mubr.msk.bf16.vlgmr.msra.gmra.mrb[32].mxu1 %vm440_vm2, %v11895_v1  ;;  %v3325_v1 = vld [vmem:[#allocation3 + $0x98] sm:$0xff] }
 0x1dc   : > { %9771 = vmatpush3.bf16.msra.mxu1 %v10875_v36  ;;  %9742 = vmatprep.mubr.msk.bf16.mxu1 %vm440_vm2, %v11927_v2  ;;  %v10878_v2 = vld [vmem:[%s13654_s4 + $0x58] sm:$0xff]   ;;  %v12143_v36 = vld [vmem:[#allocation3 + $0xe0] sm:$0xff] }
 0x1dd   : > { %9772 = vmatprep.subr.bf16.mxu1 %v10876_v49 }
 0x1e0   : > { %9773 = vmatpush3.bf16.msra.mxu1 %v10876_v49  ;;  %v12147_v49 = vld [vmem:[#allocation3 + $0xe8] sm:$0xff] }
 0x1e1   : > { %9806 = vmatprep.subr.bf16.mxu1 %v10877_v19 }
 0x1e3   : > { %9743 = vmatmul.mubr.msk.bf16.gmra.mrb[36].mxu1 %vm440_vm2, %v11933_v35  ;;  %v12108_v35 = vld [vmem:[#allocation3 + $0xa0] sm:$0xff] }
 0x1e4   : > { %9746 = vmatprep.mubr.msk.bf16.mxu1 %vm440_vm2, %v11951_v51  ;;  %v12127_v51 = vld [vmem:[#allocation3 + $0xc0] sm:$0xff] }
 0x1eb   : > { %9747 = vmatmul.mubr.msk.bf16.gmra.mrb[40].mxu1 %vm440_vm2, %v11956_v47  ;;  %v12131_v47 = vld [vmem:[#allocation3 + $0xc8] sm:$0xff] }
 0x1ec   : > { %9750 = vmatprep.mubr.msk.bf16.mxu1 %vm440_vm2, %v11960_v60 }
 0x1f3   : > { %9751 = vmatmul.mubr.msk.bf16.gmra.mrb[44].mxu1 %vm440_vm2, %v11964_v37 }
 0x1f4   : > { %9754 = vmatprep.mubr.msk.bf16.mxu1 %vm440_vm2, %v11968_v57 }
 0x1fb   : > { %9755 = vmatmul.mubr.msk.bf16.gmra.mrb[48].mxu1 %vm440_vm2, %v11972_v45 }
 0x1fc   : > { %9758 = vmatprep.mubr.msk.bf16.mxu1 %vm440_vm2, %v11976_v20 }
 0x203   : > { %9759 = vmatmul.mubr.msk.bf16.gmra.mrb[52].mxu1 %vm440_vm2, %v11980_v3 }
 0x204   : > { %9762 = vmatprep.mubr.msk.bf16.mxu1 %vm440_vm2, %v11984_v24 }
 0x20b   : > { %9763 = vmatmul.mubr.msk.bf16.gmra.mrb[56].mxu1 %vm440_vm2, %v11988_v11 }
 0x20c   : > { %9766 = vmatprep.mubr.msk.bf16.mxu1 %vm440_vm2, %v11992_v58 }
 0x213   : > { %9767 = vmatmul.mubr.msk.bf16.gmra.mrb[60].mxu1 %vm440_vm2, %v12100_v8 }
 0x214   : > { %9774 = vmatprep.mubr.msk.bf16.mxu1 %vm440_vm2, %v3325_v1  ;;  %v12155_v1 = vld [vmem:[#allocation3 + $0xf8] sm:$0xff] }
 0x21b   : > { %9775 = vmatmul.mubr.msk.bf16.vlgmr.msra.gmra.mrb[32].mxu1 %vm440_vm2, %v12108_v35 }
 0x21c   : > { %9807 = vmatpush3.bf16.msra.mxu1 %v10877_v19  ;;  %9778 = vmatprep.mubr.msk.bf16.mxu1 %vm440_vm2, %v12112_v9  ;;  %v12151_v19 = vld [vmem:[#allocation3 + $0xf0] sm:$0xff] }
 0x21d   : > { %9808 = vmatprep.subr.bf16.mxu1 %v10878_v2 }
 0x220   : > { %9809 = vmatpush3.bf16.msra.mxu1 %v10878_v2  ;;  %v12159_v2 = vld [vmem:[#allocation3 + $0x100] sm:$0xff] }
 0x221   : > { %9842 = vmatprep.subr.bf16.mxu1 %v10879_v17 }
 0x223   : > { %9779 = vmatmul.mubr.msk.bf16.gmra.mrb[36].mxu1 %vm440_vm2, %v12119_v30 }
 0x224   : > { %9782 = vmatprep.mubr.msk.bf16.mxu1 %vm440_vm2, %v12123_v16 }
 0x22b   : > { %9783 = vmatmul.mubr.msk.bf16.gmra.mrb[40].mxu1 %vm440_vm2, %v12127_v51 }
 0x22c   : > { %9786 = vmatprep.mubr.msk.bf16.mxu1 %vm440_vm2, %v12131_v47 }
 0x233   : > { %9787 = vmatmul.mubr.msk.bf16.gmra.mrb[44].mxu1 %vm440_vm2, %v12135_v6 }
 0x234   : > { %9790 = vmatprep.mubr.msk.bf16.mxu1 %vm440_vm2, %v12139_v10 }
 0x23b   : > { %9791 = vmatmul.mubr.msk.bf16.gmra.mrb[48].mxu1 %vm440_vm2, %v12143_v36 }
 0x23c   : > { %9794 = vmatprep.mubr.msk.bf16.mxu1 %vm440_vm2, %v12147_v49 }
 0x243   : > { %9795 = vmatmul.mubr.msk.bf16.gmra.mrb[52].mxu1 %vm440_vm2, %v12151_v19 }
 0x244   : > { %9798 = vmatprep.mubr.msk.bf16.mxu1 %vm440_vm2, %v12155_v1 }
 0x24b   : > { %9799 = vmatmul.mubr.msk.bf16.gmra.mrb[56].mxu1 %vm440_vm2, %v12159_v2 }
 0x24c   : > { %9802 = vmatprep.mubr.msk.bf16.mxu1 %vm440_vm2, %v12163_v32 }
 0x253   : > { %9803 = vmatmul.mubr.msk.bf16.gmra.mrb[60].mxu1 %vm440_vm2, %v12167_v12 }
 0x254   : > { %9810 = vmatprep.mubr.msk.bf16.mxu1 %vm440_vm2, %v12000_v56  ;;  %v3873_v56 = vld [vmem:[#allocation3 + $0x10] sm:$0xff] }
 0x25b   : > { %9811 = vmatmul.mubr.msk.bf16.vlgmr.msra.gmra.mrb[32].mxu1 %vm440_vm2, %v12004_v61 }
 0x25c   : > { %9843 = vmatpush3.bf16.msra.mxu1 %v10879_v17  ;;  %9814 = vmatprep.mubr.msk.bf16.mxu1 %vm440_vm2, %v12012_v23  ;;  %v10882_v17 = vld [vmem:[%s13654_s4 + $0x78] sm:$0xff]  }
 0x25d   : > { %9844 = vmatprep.subr.bf16.mxu1 %v10880_v34 }
 0x260   : > { %9845 = vmatpush3.bf16.msra.mxu1 %v10880_v34  ;;  %v12207_v34 = vld [vmem:[#allocation3 + $0x1a0] sm:$0xff] }
 0x261   : > { %9878 = vmatprep.subr.bf16.mxu1 %v10881_v43 }
 0x263   : > { %9815 = vmatmul.mubr.msk.bf16.gmra.mrb[36].mxu1 %vm440_vm2, %v12016_v53 }
 0x264   : > { %9818 = vmatprep.mubr.msk.bf16.mxu1 %vm440_vm2, %v12020_v7 }
 0x26b   : > { %9819 = vmatmul.mubr.msk.bf16.gmra.mrb[40].mxu1 %vm440_vm2, %v12024_v29 }
 0x26c   : > { %9822 = vmatprep.mubr.msk.bf16.mxu1 %vm440_vm2, %v12028_v46 }
 0x273   : > { %9823 = vmatmul.mubr.msk.bf16.gmra.mrb[44].mxu1 %vm440_vm2, %v12032_v42 }
 0x274   : > { %9826 = vmatprep.mubr.msk.bf16.mxu1 %vm440_vm2, %v12036_v28 }
 0x27b   : > { %9827 = vmatmul.mubr.msk.bf16.gmra.mrb[48].mxu1 %vm440_vm2, %v12040_v48 }
 0x27c   : > { %9830 = vmatprep.mubr.msk.bf16.mxu1 %vm440_vm2, %v12044_v25 }
 0x283   : > { %9831 = vmatmul.mubr.msk.bf16.gmra.mrb[52].mxu1 %vm440_vm2, %v12048_v13 }
 0x284   : > { %9834 = vmatprep.mubr.msk.bf16.mxu1 %vm440_vm2, %v12052_v41 }
 0x28b   : > { %9835 = vmatmul.mubr.msk.bf16.gmra.mrb[56].mxu1 %vm440_vm2, %v12056_v38 }
 0x28c   : > { %9838 = vmatprep.mubr.msk.bf16.mxu1 %vm440_vm2, %v12060_v31 }
 0x293   : > { %9839 = vmatmul.mubr.msk.bf16.gmra.mrb[60].mxu1 %vm440_vm2, %v12207_v34 }
 0x294   : > { %9846 = vmatprep.mubr.msk.bf16.mxu1 %vm440_vm2, %v3873_v56  ;;  %v3877_v56 = vld [vmem:[#allocation3 + $0x30] sm:$0xff] }
 0x29b   : > { %9847 = vmatmul.mubr.msk.bf16.vlgmr.msra.gmra.mrb[32].mxu1 %vm440_vm2, %v3874_v5  ;;  %v12311_v5 = vld [vmem:[%s13655_s5] ss:$0 sm:$0xff] }
 0x29c   : > { %9879 = vmatpush3.bf16.msra.mxu1 %v10881_v43  ;;  %9850 = vmatprep.mubr.msk.bf16.mxu1 %vm440_vm2, %v3875_v18  ;;  %v3888_v18 = vld [vmem:[#allocation3 + $0x88] sm:$0xff] }
 0x29d   : > { %9880 = vmatprep.subr.bf16.mxu1 %v10882_v17  ;;  %v10884_v43 = vld [vmem:[%s13654_s4 + $0x88] sm:$0xff]  }
 0x2a0   : > { %9881 = vmatpush3.bf16.msra.mxu1 %v10882_v17 }
 0x2a1   : > { %9914 = vmatprep.subr.bf16.mxu1 %v10883_v4 }
 0x2a3   : > { %9851 = vmatmul.mubr.msk.bf16.gmra.mrb[36].mxu1 %vm440_vm2, %v3876_v44  ;;  %v12316_v44 = vld [vmem:[%s13656_s6] ss:$0 sm:$0xff] }
 0x2a4   : > { %9854 = vmatprep.mubr.msk.bf16.mxu1 %vm440_vm2, %v3877_v56 }
 0x2ab   : > { %9855 = vmatmul.mubr.msk.bf16.gmra.mrb[40].mxu1 %vm440_vm2, %v11960_v60 }
 0x2ac   : > { %9858 = vmatprep.mubr.msk.bf16.mxu1 %vm440_vm2, %v11964_v37 }
 0x2b3   : > { %9859 = vmatmul.mubr.msk.bf16.gmra.mrb[44].mxu1 %vm440_vm2, %v11968_v57 }
 0x2b4   : > { %9862 = vmatprep.mubr.msk.bf16.mxu1 %vm440_vm2, %v11972_v45 }
 0x2bb   : > { %9863 = vmatmul.mubr.msk.bf16.gmra.mrb[48].mxu1 %vm440_vm2, %v11976_v20 }
 0x2bc   : > { %9866 = vmatprep.mubr.msk.bf16.mxu1 %vm440_vm2, %v11980_v3 }
 0x2c3   : > { %9867 = vmatmul.mubr.msk.bf16.gmra.mrb[52].mxu1 %vm440_vm2, %v11984_v24 }
 0x2c4   : > { %9870 = vmatprep.mubr.msk.bf16.mxu1 %vm440_vm2, %v11988_v11 }
 0x2cb   : > { %9871 = vmatmul.mubr.msk.bf16.gmra.mrb[56].mxu1 %vm440_vm2, %v11992_v58 }
 0x2cc   : > { %9874 = vmatprep.mubr.msk.bf16.mxu1 %vm440_vm2, %v12100_v8 }
 0x2d3   : > { %9875 = vmatmul.mubr.msk.bf16.gmra.mrb[60].mxu1 %vm440_vm2, %v3888_v18 }
 0x2d4   : > { %9882 = vmatprep.mubr.msk.bf16.mxu1 %vm440_vm2, %v12108_v35 }
 0x2db   : > { %9883 = vmatmul.mubr.msk.bf16.vlgmr.msra.gmra.mrb[32].mxu1 %vm440_vm2, %v12112_v9 }
 0x2dc   : > { %9915 = vmatpush3.bf16.msra.mxu1 %v10883_v4  ;;  %9886 = vmatprep.mubr.msk.bf16.mxu1 %vm440_vm2, %v12119_v30  ;;  %v4162_v4 = vld [vmem:[#allocation3 + $0x118] sm:$0xff] }
 0x2dd   : > { %9916 = vmatprep.subr.bf16.mxu1 %v10884_v43 }
 0x2e0   : > { %9917 = vmatpush3.bf16.msra.mxu1 %v10884_v43 }
 0x2e3   : > { %9887 = vmatmul.mubr.msk.bf16.gmra.mrb[36].mxu1 %vm440_vm2, %v12123_v16 }
 0x2e4   : > { %9890 = vmatprep.mubr.msk.bf16.mxu1 %vm440_vm2, %v12127_v51 }
 0x2eb   : > { %9891 = vmatmul.mubr.msk.bf16.gmra.mrb[40].mxu1 %vm440_vm2, %v12131_v47 }
 0x2ec   : > { %9894 = vmatprep.mubr.msk.bf16.mxu1 %vm440_vm2, %v12135_v6 }
 0x2f3   : > { %9895 = vmatmul.mubr.msk.bf16.gmra.mrb[44].mxu1 %vm440_vm2, %v12139_v10 }
 0x2f4   : > { %9898 = vmatprep.mubr.msk.bf16.mxu1 %vm440_vm2, %v12143_v36 }
 0x2fb   : > { %9899 = vmatmul.mubr.msk.bf16.gmra.mrb[48].mxu1 %vm440_vm2, %v12147_v49 }
 0x2fc   : > { %9902 = vmatprep.mubr.msk.bf16.mxu1 %vm440_vm2, %v12151_v19 }
 0x303   : > { %9903 = vmatmul.mubr.msk.bf16.gmra.mrb[52].mxu1 %vm440_vm2, %v12155_v1 }
 0x304   : > { %9906 = vmatprep.mubr.msk.bf16.mxu1 %vm440_vm2, %v12159_v2 }
 0x30b   : > { %9907 = vmatmul.mubr.msk.bf16.gmra.mrb[56].mxu1 %vm440_vm2, %v12163_v32  ;;  %v4436_v32 = vld [vmem:[#allocation3 + $0x1a8] sm:$0xff] }
 0x30c   : > { %9910 = vmatprep.mubr.msk.bf16.mxu1 %vm440_vm2, %v12167_v12 }
 0x313   : > { %9911 = vmatmul.mubr.msk.bf16.gmra.mrb[60].mxu1 %vm440_vm2, %v4162_v4 }
 0x314   : > { %9918 = vmatprep.mubr.msk.bf16.mxu1 %vm440_vm2, %v12004_v61 }
 0x31b   : > { %9919 = vmatmul.mubr.msk.bf16.vlgmr.msra.gmra.mrb[32].mxu1 %vm440_vm2, %v12012_v23 }
 0x31c   : > { %9922 = vmatprep.mubr.msk.bf16.mxu1 %vm440_vm2, %v12016_v53 }
 0x323   : > { %9923 = vmatmul.mubr.msk.bf16.gmra.mrb[36].mxu1 %vm440_vm2, %v12020_v7 }
 0x324   : > { %9926 = vmatprep.mubr.msk.bf16.mxu1 %vm440_vm2, %v12024_v29 }
 0x32b   : > { %9927 = vmatmul.mubr.msk.bf16.gmra.mrb[40].mxu1 %vm440_vm2, %v12028_v46 }
 0x32c   : > { %9930 = vmatprep.mubr.msk.bf16.mxu1 %vm440_vm2, %v12032_v42 }
 0x333   : > { %9931 = vmatmul.mubr.msk.bf16.gmra.mrb[44].mxu1 %vm440_vm2, %v12036_v28  ;;  %v10885_v28 = vld [vmem:[%s13657_s7] sm:$0xff]  }
 0x334   : > { %9934 = vmatprep.mubr.msk.bf16.mxu1 %vm440_vm2, %v12040_v48  ;;  %9950 = vmatprep.subr.bf16.mxu0 %v10885_v28 }
 0x335   : > { %9951 = vmatpush3.bf16.msra.mxu0 %v10885_v28 }
 0x33b   : > { %9935 = vmatmul.mubr.msk.bf16.gmra.mrb[48].mxu1 %vm440_vm2, %v12044_v25 }
 0x33c   : > { %9938 = vmatprep.mubr.msk.bf16.mxu1 %vm440_vm2, %v12048_v13 }
 0x343   : > { %9939 = vmatmul.mubr.msk.bf16.gmra.mrb[52].mxu1 %vm440_vm2, %v12052_v41 }
 0x344   : > { %9942 = vmatprep.mubr.msk.bf16.mxu1 %vm440_vm2, %v12056_v38 }
 0x34b   : > { %9943 = vmatmul.mubr.msk.bf16.gmra.mrb[56].mxu1 %vm440_vm2, %v12060_v31 }
 0x34c   : > { %9946 = vmatprep.mubr.msk.bf16.mxu1 %vm440_vm2, %v12207_v34 }
 0x353   : > { %9947 = vmatmul.mubr.msk.bf16.gmra.mrb[60].mxu1 %vm440_vm2, %v4436_v32 }
 0x3ee   : > { %v9920_v12 = vpop.f32.mrb[32].mxu1 }
 0x3ef   : > { %v4704_v60 = vmul.f32 %v9920_v12, %v12311_v5  ;;  %v4536_v37 = vpop.f32.mrb[33].mxu1 }
 0x3f0   : > { %v4702_v57 = vmul.f32 %v12311_v5, %v4536_v37  ;;  %v9921_v45 = vpop.f32.mrb[34].mxu1 }
 0x3f1   : > { %v4743_v20 = vadd.f32 %v12316_v44, %v4704_v60  ;;  %v4705_v3 = vmul.f32 %v9921_v45, %v12311_v5  ;;  %v4539_v24 = vpop.f32.mrb[35].mxu1 }
 0x3f2   : > { %v4741_v11 = vadd.f32 %v12316_v44, %v4702_v57  ;;  %v4703_v58 = vmul.f32 %v12311_v5, %v4539_v24 }
 0x3f3   : > { %v4807_v61 = vmul.f32 0.01, %v4743_v20  ;;  %v4744_v23 = vadd.f32 %v12316_v44, %v4705_v3  ;;  %vm4775_vm1 = vcmp.gt.f32.partialorder %v4743_v20, 0.0 }
 0x3f4   : > { %v4742_v53 = vadd.f32 %v12316_v44, %v4703_v58  ;;  %v4805_v7 = vmul.f32 0.01, %v4741_v11  ;;  %vm4773_vm4 = vcmp.gt.f32.partialorder %v4741_v11, 0.0 }
 0x3f5   : > { %vm4776_vm3 = vcmp.gt.f32.partialorder %v4744_v23, 0.0  ;;  %v4808_v29 = vmul.f32 0.01, %v4744_v23  ;;  %v12330_v13 = vsel %vm4775_vm1, %v4743_v20, %v4807_v61 }
 0x3f6   : > { %v9924_v46 = vpop.f32.mrb[36].mxu1  ;;  %vm4774_vm5 = vcmp.gt.f32.partialorder %v4742_v53, 0.0  ;;  %v4806_v42 = vmul.f32 0.01, %v4742_v53  ;;  %v12335_v8 = vsel %vm4773_vm4, %v4741_v11, %v4805_v7 }
 0x3f7   : > { %v4708_v48 = vmul.f32 %v9924_v46, %v12311_v5  ;;  %v4552_v25 = vpop.f32.mrb[37].mxu1  ;;  %v12332_v41 = vsel %vm4776_vm3, %v4744_v23, %v4808_v29 }
 0x3f8   : > { %v4706_v38 = vmul.f32 %v12311_v5, %v4552_v25  ;;  %v9925_v31 = vpop.f32.mrb[38].mxu1  ;;  %v12337_v35 = vsel %vm4774_vm5, %v4742_v53, %v4806_v42  ;;  %v5031_v9 = vpack.c.bf16 %v12332_v41, %v12330_v13 }
 0x3f9   : > { %v4747_v30 = vadd.f32 %v12316_v44, %v4708_v48  ;;  %v4709_v16 = vmul.f32 %v9925_v31, %v12311_v5  ;;  %v4555_v51 = vpop.f32.mrb[39].mxu1  ;;  %v5030_v47 = vpack.c.bf16 %v12337_v35, %v12335_v8 }
 0x3fa   : > { %v4745_v6 = vadd.f32 %v12316_v44, %v4706_v38  ;;  %v4707_v10 = vmul.f32 %v12311_v5, %v4555_v51 }
 0x3fb   : > { %v4811_v36 = vmul.f32 0.01, %v4747_v30  ;;  %v4748_v49 = vadd.f32 %v12316_v44, %v4709_v16  ;;  %5062 = vrot.lane.b32.xlu0 %v5030_v47, %s13719_s30  ;;  %vm4779_vm6 = vcmp.gt.f32.partialorder %v4747_v30, 0.0 }
 0x3fc   : > { %v4746_v19 = vadd.f32 %v12316_v44, %v4707_v10  ;;  %v4809_v1 = vmul.f32 0.01, %v4745_v6  ;;  %vm4777_vm8 = vcmp.gt.f32.partialorder %v4745_v6, 0.0 }
 0x3fd   : > { %vm4780_vm7 = vcmp.gt.f32.partialorder %v4748_v49, 0.0  ;;  %v4812_v2 = vmul.f32 0.01, %v4748_v49  ;;  %v12352_v43 = vsel %vm4779_vm6, %v4747_v30, %v4811_v36 }
 0x3fe   : > { %v9928_v34 = vpop.f32.mrb[40].mxu1  ;;  %vm4778_vm9 = vcmp.gt.f32.partialorder %v4746_v19, 0.0  ;;  %v4810_v17 = vmul.f32 0.01, %v4746_v19  ;;  %v12357_v60 = vsel %vm4777_vm8, %v4745_v6, %v4809_v1 }
 0x3ff   : > { %v4712_v56 = vmul.f32 %v9928_v34, %v12311_v5  ;;  %5064 = vrot.lane.b32.xlu0 %v5031_v9, %s13719_s30  ;;  %v4568_v18 = vpop.f32.mrb[41].mxu1  ;;  %v12354_v4 = vsel %vm4780_vm7, %v4748_v49, %v4812_v2 }
 0x400   : > { %v4710_v32 = vmul.f32 %v12311_v5, %v4568_v18  ;;  %v9929_v12 = vpop.f32.mrb[42].mxu1  ;;  %v12359_v37 = vsel %vm4778_vm9, %v4746_v19, %v4810_v17  ;;  %v5033_v57 = vpack.c.bf16 %v12354_v4, %v12352_v43 }
 0x401   : > { %v4751_v45 = vadd.f32 %v12316_v44, %v4712_v56  ;;  %v4713_v20 = vmul.f32 %v9929_v12, %v12311_v5  ;;  %v4571_v3 = vpop.f32.mrb[43].mxu1  ;;  %v5032_v24 = vpack.c.bf16 %v12359_v37, %v12357_v60 }
 0x402   : > { %v4749_v11 = vadd.f32 %v12316_v44, %v4710_v32  ;;  %v4711_v58 = vmul.f32 %v12311_v5, %v4571_v3 }
 0x403   : > { %v4815_v61 = vmul.f32 0.01, %v4751_v45  ;;  %v4752_v23 = vadd.f32 %v12316_v44, %v4713_v20  ;;  %5066 = vrot.lane.b32.xlu1 %v5032_v24, %s13719_s30  ;;  %vm4783_vm10 = vcmp.gt.f32.partialorder %v4751_v45, 0.0 }
 0x404   : > { %v4813_v53 = vmul.f32 0.01, %v4749_v11  ;;  %v4750_v7 = vadd.f32 %v12316_v44, %v4711_v58  ;;  %vm4781_vm13 = vcmp.gt.f32.partialorder %v4749_v11, 0.0 }
 0x405   : > { %vm4784_vm14 = vcmp.gt.f32.partialorder %v4752_v23, 0.0  ;;  %v4816_v29 = vmul.f32 0.01, %v4752_v23  ;;  %v12374_v25 = vsel %vm4783_vm10, %v4751_v45, %v4815_v61 }
 0x406   : > { %vm4782_vm15 = vcmp.gt.f32.partialorder %v4750_v7, 0.0  ;;  %v4814_v46 = vmul.f32 0.01, %v4750_v7  ;;  %v9932_v42 = vpop.f32.mrb[44].mxu1  ;;  %v12381_v16 = vsel %vm4781_vm13, %v4749_v11, %v4813_v53 }
 0x407   : > { %v4716_v28 = vmul.f32 %v9932_v42, %v12311_v5  ;;  %5068 = vrot.lane.b32.xlu1 %v5033_v57, %s13719_s30  ;;  %v4584_v48 = vpop.f32.mrb[45].mxu1  ;;  %v12376_v38 = vsel %vm4784_vm14, %v4752_v23, %v4816_v29 }
 0x408   : > { %v4714_v31 = vmul.f32 %v12311_v5, %v4584_v48  ;;  %v9933_v9 = vpop.f32.mrb[46].mxu1  ;;  %v5035_v30 = vpack.c.bf16 %v12376_v38, %v12374_v25  ;;  %v12383_v51 = vsel %vm4782_vm15, %v4750_v7, %v4814_v46 }
 0x409   : > { %v4755_v47 = vadd.f32 %v12316_v44, %v4716_v28  ;;  %v4717_v6 = vmul.f32 %v9933_v9, %v12311_v5  ;;  %v4587_v10 = vpop.f32.mrb[47].mxu1  ;;  %v5034_v36 = vpack.c.bf16 %v12383_v51, %v12381_v16 }
 0x40a   : > { %v4753_v49 = vadd.f32 %v12316_v44, %v4714_v31  ;;  %v4715_v19 = vmul.f32 %v12311_v5, %v4587_v10 }
 0x40b   : > { %v4819_v1 = vmul.f32 0.01, %v4755_v47  ;;  %v4756_v2 = vadd.f32 %v12316_v44, %v4717_v6  ;;  %5072 = vrot.lane.b32.xlu1 %v5035_v30, %s13719_s30  ;;  %5070 = vrot.lane.b32.xlu0 %v5034_v36, %s13719_s30  ;;  %vm4787_vm0 = vcmp.gt.f32.partialorder %v4755_v47, 0.0 }
 0x40c   : > { %v4817_v34 = vmul.f32 0.01, %v4753_v49  ;;  %v4754_v17 = vadd.f32 %v12316_v44, %v4715_v19  ;;  %vm4785_vm1 = vcmp.gt.f32.partialorder %v4753_v49, 0.0 }
 0x40d   : > { %vm4788_vm3 = vcmp.gt.f32.partialorder %v4756_v2, 0.0  ;;  %v4820_v56 = vmul.f32 0.01, %v4756_v2  ;;  %v12396_v45 = vsel %vm4787_vm0, %v4755_v47, %v4819_v1 }
 0x40e   : > { %vm4786_vm4 = vcmp.gt.f32.partialorder %v4754_v17, 0.0  ;;  %v4818_v18 = vmul.f32 0.01, %v4754_v17  ;;  %v9936_v32 = vpop.f32.mrb[48].mxu1  ;;  %v12403_v58 = vsel %vm4785_vm1, %v4753_v49, %v4817_v34 }
 0x40f   : > { %v4720_v12 = vmul.f32 %v9936_v32, %v12311_v5  ;;  %v4600_v57 = vpop.f32.mrb[49].mxu1  ;;  %v12398_v20 = vsel %vm4788_vm3, %v4756_v2, %v4820_v56 }
 0x410   : > { %v4718_v3 = vmul.f32 %v12311_v5, %v4600_v57  ;;  %v9937_v24 = vpop.f32.mrb[50].mxu1  ;;  %v5037_v11 = vpack.c.bf16 %v12398_v20, %v12396_v45  ;;  %v12405_v61 = vsel %vm4786_vm4, %v4754_v17, %v4818_v18  ;;  %vm512_vm4 = vcmask 31744  }
 0x411   : > { %v4759_v23 = vadd.f32 %v12316_v44, %v4720_v12  ;;  %v4721_v53 = vmul.f32 %v9937_v24, %v12311_v5  ;;  %v4603_v7 = vpop.f32.mrb[51].mxu1  ;;  %v5036_v29 = vpack.c.bf16 %v12405_v61, %v12403_v58 }
 0x412   : > { %v4757_v46 = vadd.f32 %v12316_v44, %v4718_v3  ;;  %v4719_v42 = vmul.f32 %v12311_v5, %v4603_v7  ;;  %5076 = vrot.lane.b32.xlu1 %v5037_v11, %s13719_s30 }
 0x413   : > { %v4823_v28 = vmul.f32 0.01, %v4759_v23  ;;  %v4760_v48 = vadd.f32 %v12316_v44, %v4721_v53  ;;  %5074 = vrot.lane.b32.xlu0 %v5036_v29, %s13719_s30  ;;  %vm4791_vm5 = vcmp.gt.f32.partialorder %v4759_v23, 0.0 }
 0x414   : > { %v4821_v31 = vmul.f32 0.01, %v4757_v46  ;;  %v4758_v9 = vadd.f32 %v12316_v44, %v4719_v42  ;;  %vm4789_vm6 = vcmp.gt.f32.partialorder %v4757_v46, 0.0 }
 0x415   : > { %vm4792_vm7 = vcmp.gt.f32.partialorder %v4760_v48, 0.0  ;;  %v4824_v30 = vmul.f32 0.01, %v4760_v48  ;;  %v12418_v49 = vsel %vm4791_vm5, %v4759_v23, %v4823_v28 }
 0x416   : > { %vm4790_vm8 = vcmp.gt.f32.partialorder %v4758_v9, 0.0  ;;  %v4822_v47 = vmul.f32 0.01, %v4758_v9  ;;  %v9940_v6 = vpop.f32.mrb[52].mxu1  ;;  %v12425_v17 = vsel %vm4789_vm6, %v4757_v46, %v4821_v31 }
 0x417   : > { %v4724_v10 = vmul.f32 %v9940_v6, %v12311_v5  ;;  %v4616_v36 = vpop.f32.mrb[53].mxu1  ;;  %v12420_v19 = vsel %vm4792_vm7, %v4760_v48, %v4824_v30 }
 0x418   : > { %v4722_v1 = vmul.f32 %v12311_v5, %v4616_v36  ;;  %v9941_v2 = vpop.f32.mrb[54].mxu1  ;;  %v5039_v34 = vpack.c.bf16 %v12420_v19, %v12418_v49  ;;  %v12427_v56 = vsel %vm4790_vm8, %v4758_v9, %v4822_v47 }
 0x419   : > { %v4763_v18 = vadd.f32 %v12316_v44, %v4724_v10  ;;  %v4725_v32 = vmul.f32 %v9941_v2, %v12311_v5  ;;  %v4619_v12 = vpop.f32.mrb[55].mxu1  ;;  %v5038_v57 = vpack.c.bf16 %v12427_v56, %v12425_v17 }
 0x41a   : > { %v4761_v3 = vadd.f32 %v12316_v44, %v4722_v1  ;;  %v4723_v24 = vmul.f32 %v12311_v5, %v4619_v12  ;;  %5080 = vrot.lane.b32.xlu1 %v5039_v34, %s13719_s30 }
 0x41b   : > { %v4827_v11 = vmul.f32 0.01, %v4763_v18  ;;  %v4764_v23 = vadd.f32 %v12316_v44, %v4725_v32  ;;  %5078 = vrot.lane.b32.xlu0 %v5038_v57, %s13719_s30  ;;  %vm4795_vm9 = vcmp.gt.f32.partialorder %v4763_v18, 0.0 }
 0x41c   : > { %v4825_v53 = vmul.f32 0.01, %v4761_v3  ;;  %v4762_v7 = vadd.f32 %v12316_v44, %v4723_v24  ;;  %vm4793_vm10 = vcmp.gt.f32.partialorder %v4761_v3, 0.0 }
 0x41d   : > { %vm4796_vm13 = vcmp.gt.f32.partialorder %v4764_v23, 0.0  ;;  %v4828_v29 = vmul.f32 0.01, %v4764_v23  ;;  %v12440_v31 = vsel %vm4795_vm9, %v4763_v18, %v4827_v11  ;;  %vm5110_vm9 = vcmask 130112  }
 0x41e   : > { %vm4794_vm14 = vcmp.gt.f32.partialorder %v4762_v7, 0.0  ;;  %v4826_v46 = vmul.f32 0.01, %v4762_v7  ;;  %v9944_v42 = vpop.f32.mrb[56].mxu1  ;;  %v12447_v10 = vsel %vm4793_vm10, %v4761_v3, %v4825_v53  ;;  %vm5151_vm10 = vcmask 130048  }
 0x41f   : > { %v4728_v28 = vmul.f32 %v9944_v42, %v12311_v5  ;;  %v4632_v48 = vpop.f32.mrb[57].mxu1  ;;  %v12442_v9 = vsel %vm4796_vm13, %v4764_v23, %v4828_v29  ;;  %vm4997_vm13 = vcmask 97312  }
 0x420   : > { %v4726_v30 = vmul.f32 %v12311_v5, %v4632_v48  ;;  %v9945_v47 = vpop.f32.mrb[58].mxu1  ;;  %v5041_v6 = vpack.c.bf16 %v12442_v9, %v12440_v31  ;;  %v12449_v36 = vsel %vm4794_vm14, %v4762_v7, %v4826_v46 }
 0x421   : > { %v4767_v1 = vadd.f32 %v12316_v44, %v4728_v28  ;;  %v4729_v2 = vmul.f32 %v9945_v47, %v12311_v5  ;;  %v4635_v34 = vpop.f32.mrb[59].mxu1  ;;  %v5040_v18 = vpack.c.bf16 %v12449_v36, %v12447_v10 }
 0x422   : > { %v4765_v32 = vadd.f32 %v12316_v44, %v4726_v30  ;;  %v4727_v12 = vmul.f32 %v12311_v5, %v4635_v34  ;;  %5084 = vrot.lane.b32.xlu1 %v5041_v6, %s13719_s30 }
 0x423   : > { %v4831_v57 = vmul.f32 0.01, %v4767_v1  ;;  %v4768_v3 = vadd.f32 %v12316_v44, %v4729_v2  ;;  %5082 = vrot.lane.b32.xlu0 %v5040_v18, %s13719_s30  ;;  %vm4799_vm15 = vcmp.gt.f32.partialorder %v4767_v1, 0.0 }
 0x424   : > { %vm4797_vm0 = vcmp.gt.f32.partialorder %v4765_v32, 0.0  ;;  %v4829_v24 = vmul.f32 0.01, %v4765_v32  ;;  %v4766_v11 = vadd.f32 %v12316_v44, %v4727_v12 }
 0x425   : > { %vm4800_vm1 = vcmp.gt.f32.partialorder %v4768_v3, 0.0  ;;  %v4832_v23 = vmul.f32 0.01, %v4768_v3  ;;  %v12462_v42 = vsel %vm4799_vm15, %v4767_v1, %v4831_v57 }
 0x426   : > { %vm4798_vm3 = vcmp.gt.f32.partialorder %v4766_v11, 0.0  ;;  %v4830_v53 = vmul.f32 0.01, %v4766_v11  ;;  %v9948_v7 = vpop.f32.mrb[60].mxu1  ;;  %v12466_v48 = vsel %vm4797_vm0, %v4765_v32, %v4829_v24 }
 0x427   : > { %v4732_v29 = vmul.f32 %v9948_v7, %v12311_v5  ;;  %v4648_v46 = vpop.f32.mrb[61].mxu1  ;;  %v12464_v28 = vsel %vm4800_vm1, %v4768_v3, %v4832_v23  ;;  %v13788_v23 = vld [vmem:[#allocation9_spill] sm:$0xff]  ;;  %v13790_v7 = vld [vmem:[#allocation11_spill] sm:$0xff] }
 0x428   : > { %v4730_v30 = vmul.f32 %v12311_v5, %v4648_v46  ;;  %v9949_v47 = vpop.f32.mrb[62].mxu1  ;;  %v5043_v6 = vpack.c.bf16 %v12464_v28, %v12462_v42  ;;  %v12471_v2 = vsel %vm4798_vm3, %v4766_v11, %v4830_v53  ;;  %v13786_v11 = vld [vmem:[#allocation8_spill] sm:$0xff]  ;;  %515 = vst.msk [vmem:[%s12485_s20 + $0x10] sm:$0xff] %vm512_vm4, %v13788_v23  ;;  %v13789_v53 = vld [vmem:[#allocation10_spill] sm:$0xff]  ;;  %517 = vst.msk [vmem:[%s12485_s20 + $0x20] sm:$0xff] %vm512_vm4, %v13790_v7 }
 0x429   : > { %v4771_v34 = vadd.f32 %v12316_v44, %v4732_v29  ;;  %v4733_v18 = vmul.f32 %v9949_v47, %v12311_v5  ;;  %v4651_v1 = vpop.f32.mrb[63].mxu1  ;;  %v5042_v12 = vpack.c.bf16 %v12471_v2, %v12466_v48  ;;  %514 = vst.msk [vmem:[%s12485_s20 + $0x8] sm:$0xff] %vm512_vm4, %v13786_v11  ;;  %516 = vst.msk [vmem:[%s12485_s20 + $0x18] sm:$0xff] %vm512_vm4, %v13789_v53  ;;  %v13791_v29 = vld [vmem:[#allocation12_spill] sm:$0xff]  ;;  %v13792_v46 = vld [vmem:[#allocation13_spill] sm:$0xff] }
 0x42a   : > { %v4769_v32 = vadd.f32 %v12316_v44, %v4730_v30  ;;  %v4731_v57 = vmul.f32 %v12311_v5, %v4651_v1  ;;  %5088 = vrot.lane.b32.xlu1 %v5043_v6, %s13719_s30  ;;  %v13787_v5 = vld [vmem:[#allocation7_spill] sm:$0xff]  ;;  %518 = vst.msk [vmem:[%s12485_s20 + $0x28] sm:$0xff] %vm512_vm4, %v13791_v29  ;;  %519 = vst.msk [vmem:[%s12485_s20 + $0x30] sm:$0xff] %vm512_vm4, %v13792_v46  ;;  %v13793_v30 = vld [vmem:[#allocation14_spill] sm:$0xff] }
 0x42b   : > { %v4835_v3 = vmul.f32 0.01, %v4771_v34  ;;  %v4772_v24 = vadd.f32 %v12316_v44, %v4733_v18  ;;  %5086 = vrot.lane.b32.xlu0 %v5042_v12, %s13719_s30  ;;  %513 = vst.msk [vmem:[%s12485_s20] sm:$0xff] %vm512_vm4, %v13787_v5  ;;  %520 = vst.msk [vmem:[%s12485_s20 + $0x38] sm:$0xff] %vm512_vm4, %v13793_v30  ;;  %v13794_v47 = vld [vmem:[#allocation15_spill] sm:$0xff]  ;;  %v13795_v6 = vld [vmem:[#allocation16_spill] sm:$0xff] }
 0x42c   : > { %521 = vst.msk [vmem:[%s12485_s20 + $0x40] sm:$0xff] %vm512_vm4, %v13794_v47  ;;  %522 = vst.msk [vmem:[%s12485_s20 + $0x48] sm:$0xff] %vm512_vm4, %v13795_v6  ;;  %v13796_v18 = vld [vmem:[#allocation17_spill] sm:$0xff]  ;;  %v13797_v1 = vld [vmem:[#allocation18_spill] sm:$0xff]  ;;  %vm4803_vm5 = vcmp.gt.f32.partialorder %v4771_v34, 0.0  ;;  %vm4801_vm6 = vcmp.gt.f32.partialorder %v4769_v32, 0.0 }
 0x42d   : > { %523 = vst.msk [vmem:[%s12485_s20 + $0x50] sm:$0xff] %vm512_vm4, %v13796_v18  ;;  %524 = vst.msk [vmem:[%s12485_s20 + $0x58] sm:$0xff] %vm512_vm4, %v13797_v1  ;;  %v13798_v12 = vld [vmem:[#allocation19_spill] sm:$0xff]  ;;  %v13799_v11 = vld [vmem:[#allocation20_spill] sm:$0xff]  ;;  %vm4804_vm7 = vcmp.gt.f32.partialorder %v4772_v24, 0.0 }
 0x42e   : > { %525 = vst.msk [vmem:[%s12485_s20 + $0x60] sm:$0xff] %vm512_vm4, %v13798_v12  ;;  %526 = vst.msk [vmem:[%s12485_s20 + $0x68] sm:$0xff] %vm512_vm4, %v13799_v11  ;;  %v13800_v5 = vld [vmem:[#allocation21_spill] sm:$0xff]  ;;  %v13801_v23 = vld [vmem:[#allocation22_spill] sm:$0xff] }
 0x42f   : > { %527 = vst.msk [vmem:[%s12485_s20 + $0x70] sm:$0xff] %vm512_vm4, %v13800_v5  ;;  %528 = vst.msk [vmem:[%s12485_s20 + $0x78] sm:$0xff] %vm512_vm4, %v13801_v23  ;;  %v13802_v53 = vld [vmem:[#allocation23_spill] sm:$0xff]  ;;  %v13803_v7 = vld [vmem:[#allocation24_spill] sm:$0xff] }
 0x430   : > { %529 = vst.msk [vmem:[%s12485_s20 + $0x80] sm:$0xff] %vm512_vm4, %v13802_v53  ;;  %530 = vst.msk [vmem:[%s12485_s20 + $0x88] sm:$0xff] %vm512_vm4, %v13803_v7  ;;  %v13804_v29 = vld [vmem:[#allocation25_spill] sm:$0xff]  ;;  %v13805_v46 = vld [vmem:[#allocation26_spill] sm:$0xff] }
 0x431   : > { %531 = vst.msk [vmem:[%s12485_s20 + $0x90] sm:$0xff] %vm512_vm4, %v13804_v29  ;;  %532 = vst.msk [vmem:[%s12485_s20 + $0x98] sm:$0xff] %vm512_vm4, %v13805_v46  ;;  %v13806_v30 = vld [vmem:[#allocation27_spill] sm:$0xff]  ;;  %v13807_v47 = vld [vmem:[#allocation28_spill] sm:$0xff]  ;;  %v4833_v46 = vmul.f32 0.01, %v4769_v32 }
 0x432   : > { %533 = vst.msk [vmem:[%s12485_s20 + $0xa0] sm:$0xff] %vm512_vm4, %v13806_v30  ;;  %534 = vst.msk [vmem:[%s12485_s20 + $0xa8] sm:$0xff] %vm512_vm4, %v13807_v47  ;;  %v13808_v6 = vld [vmem:[#allocation29_spill] sm:$0xff]  ;;  %v13809_v18 = vld [vmem:[#allocation30_spill] sm:$0xff]  ;;  %v4770_v30 = vadd.f32 %v12316_v44, %v4731_v57  ;;  %v4836_v47 = vmul.f32 0.01, %v4772_v24 }
 0x433   : > { %535 = vst.msk [vmem:[%s12485_s20 + $0xb0] sm:$0xff] %vm512_vm4, %v13808_v6  ;;  %536 = vst.msk [vmem:[%s12485_s20 + $0xb8] sm:$0xff] %vm512_vm4, %v13809_v18  ;;  %v13810_v1 = vld [vmem:[#allocation31_spill] sm:$0xff]  ;;  %v13811_v12 = vld [vmem:[#allocation32_spill] sm:$0xff]  ;;  %v4867_v18 = vsel %vm4803_vm5, %v4771_v34, %v4835_v3 }
 0x434   : > { %537 = vst.msk [vmem:[%s12485_s20 + $0xc0] sm:$0xff] %vm512_vm4, %v13810_v1  ;;  %538 = vst.msk [vmem:[%s12485_s20 + $0xc8] sm:$0xff] %vm512_vm4, %v13811_v12  ;;  %v13812_v11 = vld [vmem:[#allocation33_spill] sm:$0xff]  ;;  %v13813_v5 = vld [vmem:[#allocation34_spill] sm:$0xff]  ;;  %vm4802_vm8 = vcmp.gt.f32.partialorder %v4770_v30, 0.0  ;;  %v4868_v1 = vsel %vm4804_vm7, %v4772_v24, %v4836_v47 }
 0x435   : > { %539 = vst.msk [vmem:[%s12485_s20 + $0xd0] sm:$0xff] %vm512_vm4, %v13812_v11  ;;  %540 = vst.msk [vmem:[%s12485_s20 + $0xd8] sm:$0xff] %vm512_vm4, %v13813_v5  ;;  %v13814_v23 = vld [vmem:[#allocation35_spill] sm:$0xff]  ;;  %v13815_v53 = vld [vmem:[#allocation36_spill] sm:$0xff]  ;;  %v4834_v6 = vmul.f32 0.01, %v4770_v30  ;;  %v5045_v12 = vpack.c.bf16 %v4868_v1, %v4867_v18  ;;  %v4865_v11 = vsel %vm4801_vm6, %v4769_v32, %v4833_v46 }
 0x436   : > { %541 = vst.msk [vmem:[%s12485_s20 + $0xe0] sm:$0xff] %vm512_vm4, %v13814_v23  ;;  %542 = vst.msk [vmem:[%s12485_s20 + $0xe8] sm:$0xff] %vm512_vm4, %v13815_v53  ;;  %v13816_v7 = vld [vmem:[#allocation37_spill] sm:$0xff]  ;;  %v13817_v29 = vld [vmem:[#allocation38_spill] sm:$0xff] }
 0x437   : > { %543 = vst.msk [vmem:[%s12485_s20 + $0xf0] sm:$0xff] %vm512_vm4, %v13816_v7  ;;  %544 = vst.msk [vmem:[%s12485_s20 + $0xf8] sm:$0xff] %vm512_vm4, %v13817_v29  ;;  %v4866_v5 = vsel %vm4802_vm8, %v4770_v30, %v4834_v6  ;;  %5092 = vrot.lane.b32.xlu1 %v5045_v12, %s13719_s30  ;;  %v10886_v44 = vld [vmem:[%s13660_s10 + $0x10] sm:$0xff]  }
 0x438   : > { %v5044_v23 = vpack.c.bf16 %v4866_v5, %v4865_v11  ;;  %9984 = vmatprep.subr.bf16.mxu0 %v10886_v44 }
 0x43a   : > { %5090 = vrot.lane.b32.xlu0 %v5044_v23, %s13719_s30  ;;  %s8697_s30 = sshll.u32 %s12485_s20, 4  ;;  %s13602_s30 = int_to_ptr.vmem [resolvable:$true] %s8697_s30 }
 0x43b   : > { %4903 = vrot.lane.b32.xlu1 %v12337_v35, %s10972_s21 }
 0x43e   : > { %4901 = vrot.lane.b32.xlu0 %v12335_v8, %s10972_s21 }
 0x43f   : > { %4907 = vrot.lane.b32.xlu1 %v12332_v41, %s10972_s21 }
 0x442   : > { %4905 = vrot.lane.b32.xlu0 %v12330_v13, %s10972_s21 }
 0x443   : > { %4911 = vrot.lane.b32.xlu1 %v12359_v37, %s10972_s21 }
 0x446   : > { %4909 = vrot.lane.b32.xlu0 %v12357_v60, %s10972_s21 }
 0x447   : > { %4915 = vrot.lane.b32.xlu1 %v12354_v4, %s10972_s21 }
 0x44a   : > { %4913 = vrot.lane.b32.xlu0 %v12352_v43, %s10972_s21  ;;  %v10887_v43 = vld [vmem:[%s13660_s10 + $0x18] sm:$0xff]  }
 0x44b   : > { %4919 = vrot.lane.b32.xlu1 %v12383_v51, %s10972_s21 }
 0x44e   : > { %4917 = vrot.lane.b32.xlu0 %v12381_v16, %s10972_s21 }
 0x44f   : > { %4923 = vrot.lane.b32.xlu1 %v12376_v38, %s10972_s21 }
 0x452   : > { %4921 = vrot.lane.b32.xlu0 %v12374_v25, %s10972_s21 }
 0x453   : > { %4927 = vrot.lane.b32.xlu1 %v12405_v61, %s10972_s21 }
 0x456   : > { %4925 = vrot.lane.b32.xlu0 %v12403_v58, %s10972_s21 }
 0x457   : > { %4931 = vrot.lane.b32.xlu1 %v12398_v20, %s10972_s21 }
 0x45a   : > { %4929 = vrot.lane.b32.xlu0 %v12396_v45, %s10972_s21 }
 0x45b   : > { %4935 = vrot.lane.b32.xlu1 %v12427_v56, %s10972_s21 }
 0x45e   : > { %4933 = vrot.lane.b32.xlu0 %v12425_v17, %s10972_s21 }
 0x45f   : > { %4939 = vrot.lane.b32.xlu1 %v12420_v19, %s10972_s21 }
 0x462   : > { %4937 = vrot.lane.b32.xlu0 %v12418_v49, %s10972_s21 }
 0x463   : > { %4943 = vrot.lane.b32.xlu1 %v12449_v36, %s10972_s21 }
 0x466   : > { %4941 = vrot.lane.b32.xlu0 %v12447_v10, %s10972_s21 }
 0x467   : > { %4947 = vrot.lane.b32.xlu1 %v12442_v9, %s10972_s21 }
 0x46a   : > { %4945 = vrot.lane.b32.xlu0 %v12440_v31, %s10972_s21 }
 0x46b   : > { %4951 = vrot.lane.b32.xlu1 %v12471_v2, %s10972_s21 }
 0x46d   : > { %v5063_v13 = vpop.permute.xlu0 %5062 }
 0x46e   : > { %4949 = vrot.lane.b32.xlu0 %v12466_v48, %s10972_s21  ;;  %5111 = vst.msk [vmem:[#allocation2] sm:$0xff] %vm5110_vm9, %v5063_v13 }
 0x46f   : > { %4955 = vrot.lane.b32.xlu1 %v12464_v28, %s10972_s21 }
 0x471   : > { %v5065_v41 = vpop.permute.xlu0 %5064 }
 0x472   : > { %4953 = vrot.lane.b32.xlu0 %v12462_v42, %s10972_s21  ;;  %5112 = vst.msk [vmem:[#allocation2 + $0x8] sm:$0xff] %vm5110_vm9, %v5065_v41 }
 0x473   : > { %4959 = vrot.lane.b32.xlu1 %v4866_v5, %s10972_s21 }
 0x475   : > { %v5067_v8 = vpop.permute.xlu1 %5066  ;;  %v5127_v35 = vld [vmem:[#allocation2] sm:$0xff] }
 0x476   : > { %4957 = vrot.lane.b32.xlu0 %v4865_v11, %s10972_s21  ;;  %5113 = vst.msk [vmem:[#allocation2 + $0x10] sm:$0xff] %vm5110_vm9, %v5067_v8  ;;  %9952 = vmatprep.mubr.msk.bf16.mxu0 %vm5151_vm10, %v5127_v35 }
 0x477   : > { %4963 = vrot.lane.b32.xlu1 %v4868_v1, %s10972_s21 }
 0x479   : > { %v5069_v4 = vpop.permute.xlu1 %5068  ;;  %v5128_v60 = vld [vmem:[#allocation2 + $0x8] sm:$0xff] }
 0x47a   : > { %4961 = vrot.lane.b32.xlu0 %v4867_v18, %s10972_s21  ;;  %5114 = vst.msk [vmem:[#allocation2 + $0x18] sm:$0xff] %vm5110_vm9, %v5069_v4  ;;  %9953 = vmatmul.mubr.msk.bf16.vlgmr.msra.gmra.mrb[0].mxu0 %vm5151_vm10, %v5128_v60  ;;  %s10908_s21 = sshll.u32 %s10974_s16, 4  ;;  %s10909_s21 = int_to_ptr.vmem [resolvable:$false] %s10908_s21 }
 0x47b   : > { %9985 = vmatpush3.bf16.msra.mxu0 %v10886_v44  ;;  %s10910_s22 = scalar_lea.vmem %s10909_s21, 8192  ;;  %p10911_p0 = scmp.lt.s32.totalorder %s13602_s30, %s10909_s21 }
 0x47c   : > { %9986 = vmatprep.subr.bf16.mxu0 %v10887_v43 }
 0x47d   : > { %v5073_v37 = vpop.permute.xlu1 %5072  ;;  %v5071_v25 = vpop.permute.xlu0 %5070  ;;  %v5129_v38 = vld [vmem:[#allocation2 + $0x10] sm:$0xff] }
 0x47e   : > { %5116 = vst.msk [vmem:[#allocation2 + $0x28] sm:$0xff] %vm5110_vm9, %v5073_v37  ;;  %5115 = vst.msk [vmem:[#allocation2 + $0x20] sm:$0xff] %vm5110_vm9, %v5071_v25  ;;  %9956 = vmatprep.mubr.msk.bf16.mxu0 %vm5151_vm10, %v5129_v38 }
 0x47f   : > { %9987 = vmatpush3.bf16.msra.mxu0 %v10887_v43 }
 0x481   : > { %v5130_v16 = vld [vmem:[#allocation2 + $0x18] sm:$0xff] }
 0x482   : > { %9957 = vmatmul.mubr.msk.bf16.gmra.mrb[4].mxu0 %vm5151_vm10, %v5130_v16 }
 0x484   : > { %v5077_v51 = vpop.permute.xlu1 %5076 }
 0x485   : > { %5118 = vst.msk [vmem:[#allocation2 + $0x38] sm:$0xff] %vm5110_vm9, %v5077_v51  ;;  %v5075_v45 = vpop.permute.xlu0 %5074  ;;  %v5131_v20 = vld [vmem:[#allocation2 + $0x20] sm:$0xff]  ;;  %v5132_v58 = vld [vmem:[#allocation2 + $0x28] sm:$0xff] }
 0x486   : > { %5117 = vst.msk [vmem:[#allocation2 + $0x30] sm:$0xff] %vm5110_vm9, %v5075_v45  ;;  %9960 = vmatprep.mubr.msk.bf16.mxu0 %vm5151_vm10, %v5131_v20 }
 0x48a   : > { %9961 = vmatmul.mubr.msk.bf16.gmra.mrb[8].mxu0 %vm5151_vm10, %v5132_v58 }
 0x48c   : > { %v5081_v61 = vpop.permute.xlu1 %5080  ;;  %v5134_v17 = vld [vmem:[#allocation2 + $0x38] sm:$0xff] }
 0x48d   : > { %5120 = vst.msk [vmem:[#allocation2 + $0x48] sm:$0xff] %vm5110_vm9, %v5081_v61  ;;  %v5079_v49 = vpop.permute.xlu0 %5078  ;;  %v5133_v19 = vld [vmem:[#allocation2 + $0x30] sm:$0xff] }
 0x48e   : > { %5119 = vst.msk [vmem:[#allocation2 + $0x40] sm:$0xff] %vm5110_vm9, %v5079_v49  ;;  %9964 = vmatprep.mubr.msk.bf16.mxu0 %vm5151_vm10, %v5133_v19 }
 0x492   : > { %9965 = vmatmul.mubr.msk.bf16.gmra.mrb[12].mxu0 %vm5151_vm10, %v5134_v17  ;;  %v5967_v17 = vld [vmem:[#allocation3 + $0x90] sm:$0xff] }
 0x494   : > { %v5085_v56 = vpop.permute.xlu1 %5084  ;;  %v5136_v10 = vld [vmem:[#allocation2 + $0x48] sm:$0xff] }
 0x495   : > { %5122 = vst.msk [vmem:[#allocation2 + $0x58] sm:$0xff] %vm5110_vm9, %v5085_v56  ;;  %v5083_v31 = vpop.permute.xlu0 %5082  ;;  %v5135_v9 = vld [vmem:[#allocation2 + $0x40] sm:$0xff] }
 0x496   : > { %5121 = vst.msk [vmem:[#allocation2 + $0x50] sm:$0xff] %vm5110_vm9, %v5083_v31  ;;  %9968 = vmatprep.mubr.msk.bf16.mxu0 %vm5151_vm10, %v5135_v9  ;;  %v12751_v56 = vld [vmem:[%s13660_s10] sm:$0xff]  }
 0x497   : > { %10020 = vmatprep.subr.bf16.mxu0 %v12751_v56  ;;  %v12758_v31 = vld [vmem:[%s13658_s8] ss:$0 sm:$0xff] }
 0x49a   : > { %9969 = vmatmul.mubr.msk.bf16.gmra.mrb[16].mxu0 %vm5151_vm10, %v5136_v10  ;;  %v12763_v10 = vld [vmem:[%s13659_s9] ss:$0 sm:$0xff] }
 0x49c   : > { %v5089_v36 = vpop.permute.xlu1 %5088  ;;  %v5138_v48 = vld [vmem:[#allocation2 + $0x58] sm:$0xff] }
 0x49d   : > { %5124 = vst.msk [vmem:[#allocation2 + $0x68] sm:$0xff] %vm5110_vm9, %v5089_v36  ;;  %v5087_v42 = vpop.permute.xlu0 %5086  ;;  %v5137_v28 = vld [vmem:[#allocation2 + $0x50] sm:$0xff] }
 0x49e   : > { %5123 = vst.msk [vmem:[#allocation2 + $0x60] sm:$0xff] %vm5110_vm9, %v5087_v42  ;;  %9972 = vmatprep.mubr.msk.bf16.mxu0 %vm5151_vm10, %v5137_v28 }
 0x4a2   : > { %9973 = vmatmul.mubr.msk.bf16.gmra.mrb[20].mxu0 %vm5151_vm10, %v5138_v48 }
 0x4a4   : > { %v5140_v24 = vld [vmem:[#allocation2 + $0x68] sm:$0xff] }
 0x4a5   : > { %v5139_v32 = vld [vmem:[#allocation2 + $0x60] sm:$0xff] }
 0x4a6   : > { %9976 = vmatprep.mubr.msk.bf16.mxu0 %vm5151_vm10, %v5139_v32 }
 0x4a9   : > { %v5093_v2 = vpop.permute.xlu1 %5092 }
 0x4aa   : > { %5126 = vst.msk [vmem:[#allocation2 + $0x78] sm:$0xff] %vm5110_vm9, %v5093_v2  ;;  %9977 = vmatmul.mubr.msk.bf16.gmra.mrb[24].mxu0 %vm5151_vm10, %v5140_v24 }
 0x4ac   : > { %v5091_v34 = vpop.permute.xlu0 %5090 }
 0x4ad   : > { %5125 = vst.msk [vmem:[#allocation2 + $0x70] sm:$0xff] %vm5110_vm9, %v5091_v34  ;;  %v4904_v57 = vpop.permute.xlu1 %4903 }
 0x4ae   : > { %4999 = vst.msk [vmem:[%s12485_s20 + $0x8] sm:$0xff] %vm4997_vm13, %v4904_v57 }
 0x4b0   : > { %v4902_v3 = vpop.permute.xlu0 %4901 }
 0x4b1   : > { %4998 = vst.msk [vmem:[%s12485_s20] sm:$0xff] %vm4997_vm13, %v4902_v3  ;;  %v4908_v53 = vpop.permute.xlu1 %4907  ;;  %v5142_v47 = vld [vmem:[#allocation2 + $0x78] sm:$0xff] }
 0x4b2   : > { %5001 = vst.msk [vmem:[%s12485_s20 + $0x18] sm:$0xff] %vm4997_vm13, %v4908_v53 }
 0x4b4   : > { %v4906_v7 = vpop.permute.xlu0 %4905  ;;  %v5141_v29 = vld [vmem:[#allocation2 + $0x70] sm:$0xff] }
 0x4b5   : > { %5000 = vst.msk [vmem:[%s12485_s20 + $0x10] sm:$0xff] %vm4997_vm13, %v4906_v7  ;;  %9980 = vmatprep.mubr.msk.bf16.mxu0 %vm5151_vm10, %v5141_v29  ;;  %v4912_v46 = vpop.permute.xlu1 %4911 }
 0x4b6   : > { %5003 = vst.msk [vmem:[%s12485_s20 + $0x28] sm:$0xff] %vm4997_vm13, %v4912_v46  ;;  %9981 = vmatmul.mubr.msk.bf16.gmra.mrb[28].mxu0 %vm5151_vm10, %v5142_v47  ;;  %v5567_v46 = vld [vmem:[#allocation3 + $0x90] sm:$0x80] }
 0x4b7   : > { %9988 = vmatprep.mubr.msk.bf16.mxu0 %vm440_vm2, %v5967_v17 }
 0x4b8   : > { %v4910_v30 = vpop.permute.xlu0 %4909 }
 0x4b9   : > { %5002 = vst.msk [vmem:[%s12485_s20 + $0x20] sm:$0xff] %vm4997_vm13, %v4910_v30  ;;  %v4916_v6 = vpop.permute.xlu1 %4915 }
 0x4ba   : > { %5005 = vst.msk [vmem:[%s12485_s20 + $0x38] sm:$0xff] %vm4997_vm13, %v4916_v6 }
 0x4bc   : > { %v4914_v18 = vpop.permute.xlu0 %4913 }
 0x4bd   : > { %5004 = vst.msk [vmem:[%s12485_s20 + $0x30] sm:$0xff] %vm4997_vm13, %v4914_v18  ;;  %v4920_v1 = vpop.permute.xlu1 %4919 }
 0x4be   : > { %5007 = vst.msk [vmem:[%s12485_s20 + $0x48] sm:$0xff] %vm4997_vm13, %v4920_v1 }
 0x4c0   : > { %v4918_v12 = vpop.permute.xlu0 %4917 }
 0x4c1   : > { %5006 = vst.msk [vmem:[%s12485_s20 + $0x40] sm:$0xff] %vm4997_vm13, %v4918_v12  ;;  %v4924_v11 = vpop.permute.xlu1 %4923 }
 0x4c2   : > { %5009 = vst.msk [vmem:[%s12485_s20 + $0x58] sm:$0xff] %vm4997_vm13, %v4924_v11 }
 0x4c4   : > { %v4922_v5 = vpop.permute.xlu0 %4921 }
 0x4c5   : > { %5008 = vst.msk [vmem:[%s12485_s20 + $0x50] sm:$0xff] %vm4997_vm13, %v4922_v5  ;;  %v4928_v23 = vpop.permute.xlu1 %4927  ;;  %v13818_v5 = vld [vmem:[#allocation39_spill] sm:$0xff] }
 0x4c6   : > { %5011 = vst.msk [vmem:[%s12485_s20 + $0x68] sm:$0xff] %vm4997_vm13, %v4928_v23  ;;  %v5584_v23 = vmul.bf16 %v5567_v46, %v13818_v5 }
 0x4c8   : > { %v4926_v44 = vpop.permute.xlu0 %4925 }
 0x4c9   : > { %5010 = vst.msk [vmem:[%s12485_s20 + $0x60] sm:$0xff] %vm4997_vm13, %v4926_v44  ;;  %v4932_v13 = vpop.permute.xlu1 %4931 }
 0x4ca   : > { %5013 = vst.msk [vmem:[%s12485_s20 + $0x78] sm:$0xff] %vm4997_vm13, %v4932_v13 }
 0x4cc   : > { %v4930_v41 = vpop.permute.xlu0 %4929 }
 0x4cd   : > { %5012 = vst.msk [vmem:[%s12485_s20 + $0x70] sm:$0xff] %vm4997_vm13, %v4930_v41  ;;  %v4936_v8 = vpop.permute.xlu1 %4935 }
 0x4ce   : > { %5015 = vst.msk [vmem:[%s12485_s20 + $0x88] sm:$0xff] %vm4997_vm13, %v4936_v8 }
 0x4d0   : > { %v4934_v35 = vpop.permute.xlu0 %4933 }
 0x4d1   : > { %5014 = vst.msk [vmem:[%s12485_s20 + $0x80] sm:$0xff] %vm4997_vm13, %v4934_v35  ;;  %v4940_v43 = vpop.permute.xlu1 %4939 }
 0x4d2   : > { %5017 = vst.msk [vmem:[%s12485_s20 + $0x98] sm:$0xff] %vm4997_vm13, %v4940_v43 }
 0x4d4   : > { %v4938_v4 = vpop.permute.xlu0 %4937 }
 0x4d5   : > { %5016 = vst.msk [vmem:[%s12485_s20 + $0x90] sm:$0xff] %vm4997_vm13, %v4938_v4  ;;  %v4944_v60 = vpop.permute.xlu1 %4943 }
 0x4d6   : > { %5019 = vst.msk [vmem:[%s12485_s20 + $0xa8] sm:$0xff] %vm4997_vm13, %v4944_v60 }
 0x4d8   : > { %v4942_v37 = vpop.permute.xlu0 %4941 }
 0x4d9   : > { %5018 = vst.msk [vmem:[%s12485_s20 + $0xa0] sm:$0xff] %vm4997_vm13, %v4942_v37  ;;  %v4948_v25 = vpop.permute.xlu1 %4947 }
 0x4da   : > { %5021 = vst.msk [vmem:[%s12485_s20 + $0xb8] sm:$0xff] %vm4997_vm13, %v4948_v25 }
 0x4dc   : > { %v4946_v38 = vpop.permute.xlu0 %4945 }
 0x4dd   : > { %5020 = vst.msk [vmem:[%s12485_s20 + $0xb0] sm:$0xff] %vm4997_vm13, %v4946_v38  ;;  %v4952_v16 = vpop.permute.xlu1 %4951 }
 0x4de   : > { %5023 = vst.msk [vmem:[%s12485_s20 + $0xc8] sm:$0xff] %vm4997_vm13, %v4952_v16  ;;  %v5601_v16 = vld [vmem:[#allocation3 + $0x118] sm:$0x1] }
 0x4e0   : > { %v4950_v51 = vpop.permute.xlu0 %4949 }
 0x4e1   : > { %5022 = vst.msk [vmem:[%s12485_s20 + $0xc0] sm:$0xff] %vm4997_vm13, %v4950_v51  ;;  %v4956_v45 = vpop.permute.xlu1 %4955 }
 0x4e2   : > { %5025 = vst.msk [vmem:[%s12485_s20 + $0xd8] sm:$0xff] %vm4997_vm13, %v4956_v45 }
 0x4e4   : > { %v4954_v20 = vpop.permute.xlu0 %4953 }
 0x4e5   : > { %5024 = vst.msk [vmem:[%s12485_s20 + $0xd0] sm:$0xff] %vm4997_vm13, %v4954_v20  ;;  %v4960_v58 = vpop.permute.xlu1 %4959  ;;  %v12783_v20 = vshrl.u32 %v5584_v23, 16 }
 0x4e6   : > { %5027 = vst.msk [vmem:[%s12485_s20 + $0xe8] sm:$0xff] %vm4997_vm13, %v4960_v58 }
 0x4e8   : > { %v4958_v61 = vpop.permute.xlu0 %4957 }
 0x4e9   : > { %5026 = vst.msk [vmem:[%s12485_s20 + $0xe0] sm:$0xff] %vm4997_vm13, %v4958_v61  ;;  %v4964_v49 = vpop.permute.xlu1 %4963 }
 0x4ea   : > { %5029 = vst.msk [vmem:[%s12485_s20 + $0xf8] sm:$0xff] %vm4997_vm13, %v4964_v49 }
 0x4ec   : > { %v4962_v19 = vpop.permute.xlu0 %4961 }
 0x4ed   : > { %5028 = vst.msk [vmem:[%s12485_s20 + $0xf0] sm:$0xff] %vm4997_vm13, %v4962_v19  ;;  %v5618_v19 = vmul.bf16 %v5601_v16, %v11544_v55 }
 0x54d   : > { %v9954_v9 = vpop.f32.mrb[0].mxu0 }
 0x54e   : > { %v5370_v36 = vmul.f32 %v9954_v9, %v12758_v31  ;;  %v5234_v42 = vpop.f32.mrb[1].mxu0 }
 0x54f   : > { %v5368_v28 = vmul.f32 %v12758_v31, %v5234_v42  ;;  %v9955_v48 = vpop.f32.mrb[2].mxu0 }
 0x550   : > { %v5409_v2 = vadd.f32 %v12763_v10, %v5370_v36  ;;  %v5371_v34 = vmul.f32 %v9955_v48, %v12758_v31  ;;  %v5237_v32 = vpop.f32.mrb[3].mxu0 }
 0x551   : > { %v5407_v57 = vadd.f32 %v12763_v10, %v5368_v28  ;;  %v5369_v3 = vmul.f32 %v12758_v31, %v5237_v32 }
 0x552   : > { %v5473_v24 = vmul.f32 0.01, %v5409_v2  ;;  %v5410_v53 = vadd.f32 %v12763_v10, %v5371_v34  ;;  %vm5441_vm14 = vcmp.gt.f32.partialorder %v5409_v2, 0.0 }
 0x553   : > { %v5471_v7 = vmul.f32 0.01, %v5407_v57  ;;  %v5408_v29 = vadd.f32 %v12763_v10, %v5369_v3  ;;  %vm5439_vm15 = vcmp.gt.f32.partialorder %v5407_v57, 0.0 }
 0x554   : > { %vm5442_vm0 = vcmp.gt.f32.partialorder %v5410_v53, 0.0  ;;  %v5474_v30 = vmul.f32 0.01, %v5410_v53  ;;  %v5505_v18 = vsel %vm5441_vm14, %v5409_v2, %v5473_v24  ;;  %v5622_v2 = vrot.slane %v12783_v20, 7 }
 0x555   : > { %vm5440_vm1 = vcmp.gt.f32.partialorder %v5408_v29, 0.0  ;;  %v5472_v47 = vmul.f32 0.01, %v5408_v29  ;;  %v9958_v6 = vpop.f32.mrb[4].mxu0  ;;  %v5503_v44 = vsel %vm5439_vm15, %v5407_v57, %v5471_v7 }
 0x556   : > { %v5506_v1 = vsel %vm5442_vm0, %v5410_v53, %v5474_v30  ;;  %v5374_v12 = vmul.f32 %v9958_v6, %v12758_v31  ;;  %v5250_v11 = vpop.f32.mrb[5].mxu0  ;;  %v10889_v30 = vld [vmem:[%s13660_s10 + $0x8] sm:$0xff]  }
 0x557   : > { %v5536_v13 = vpack.c.bf16 %v5506_v1, %v5505_v18  ;;  %v5504_v41 = vsel %vm5440_vm1, %v5408_v29, %v5472_v47  ;;  %v5372_v8 = vmul.f32 %v12758_v31, %v5250_v11  ;;  %v9959_v35 = vpop.f32.mrb[6].mxu0  ;;  %v12795_v47 = vshll.u32 %v5618_v19, 16 }
 0x558   : > { %v5535_v43 = vpack.c.bf16 %v5504_v41, %v5503_v44  ;;  %v5413_v4 = vadd.f32 %v12763_v10, %v5374_v12  ;;  %v5375_v60 = vmul.f32 %v9959_v35, %v12758_v31  ;;  %v5253_v37 = vpop.f32.mrb[7].mxu0  ;;  %v12818_v35 = vld [vmem:[%s13660_s10 + $0x20] sm:$0xff]  }
 0x559   : > { %5552 = vst.msk [vmem:[#allocation3 + $0xa0] sm:$0xff] %vm440_vm2, %v5536_v13  ;;  %v5411_v25 = vadd.f32 %v12763_v10, %v5372_v8  ;;  %v5373_v38 = vmul.f32 %v12758_v31, %v5253_v37 }
 0x55a   : > { %5551 = vst.msk [vmem:[#allocation3 + $0x98] sm:$0xff] %vm440_vm2, %v5535_v43  ;;  %v5477_v51 = vmul.f32 0.01, %v5413_v4  ;;  %v5414_v45 = vadd.f32 %v12763_v10, %v5375_v60  ;;  %vm5445_vm3 = vcmp.gt.f32.partialorder %v5413_v4, 0.0 }
 0x55b   : > { %v5475_v58 = vmul.f32 0.01, %v5411_v25  ;;  %v5412_v61 = vadd.f32 %v12763_v10, %v5373_v38  ;;  %vm5443_vm4 = vcmp.gt.f32.partialorder %v5411_v25, 0.0 }
 0x55c   : > { %vm5446_vm5 = vcmp.gt.f32.partialorder %v5414_v45, 0.0  ;;  %v5478_v49 = vmul.f32 0.01, %v5414_v45  ;;  %v5509_v36 = vsel %vm5445_vm3, %v5413_v4, %v5477_v51 }
 0x55d   : > { %vm5444_vm6 = vcmp.gt.f32.partialorder %v5412_v61, 0.0  ;;  %v5476_v17 = vmul.f32 0.01, %v5412_v61  ;;  %v9962_v9 = vpop.f32.mrb[8].mxu0  ;;  %v5507_v34 = vsel %vm5443_vm4, %v5411_v25, %v5475_v58 }
 0x55e   : > { %v5510_v42 = vsel %vm5446_vm5, %v5414_v45, %v5478_v49  ;;  %v5378_v28 = vmul.f32 %v9962_v9, %v12758_v31  ;;  %v5266_v48 = vpop.f32.mrb[9].mxu0 }
 0x55f   : > { %v5538_v32 = vpack.c.bf16 %v5510_v42, %v5509_v36  ;;  %v5508_v57 = vsel %vm5444_vm6, %v5412_v61, %v5476_v17  ;;  %v5376_v3 = vmul.f32 %v12758_v31, %v5266_v48  ;;  %v9963_v24 = vpop.f32.mrb[10].mxu0 }
 0x560   : > { %v5537_v53 = vpack.c.bf16 %v5508_v57, %v5507_v34  ;;  %v5417_v7 = vadd.f32 %v12763_v10, %v5378_v28  ;;  %v5379_v55 = vmul.f32 %v9963_v24, %v12758_v31  ;;  %v5269_v29 = vpop.f32.mrb[11].mxu0  ;;  %v5969_v46 = vld [vmem:[#allocation3 + $0xa0] sm:$0xff]  ;;  %v13819_v24 = vld [vmem:[#allocation42_spill] sm:$0xff] }
 0x561   : > { %5554 = vst.msk [vmem:[#allocation3 + $0xb0] sm:$0xff] %vm440_vm2, %v5538_v32  ;;  %v5415_v6 = vadd.f32 %v12763_v10, %v5376_v3  ;;  %v5377_v18 = vmul.f32 %v12758_v31, %v5269_v29  ;;  %v12800_v1 = vld [vmem:[#allocation3 + $0x98] sm:$0xff]  ;;  %v5586_v12 = vmul.bf16 %v5969_v46, %v11327_v0  ;;  %v12804_v11 = vmul.bf16 %v5969_v46, %v11340_v54 }
 0x562   : > { %5553 = vst.msk [vmem:[#allocation3 + $0xa8] sm:$0xff] %vm440_vm2, %v5537_v53  ;;  %vm5449_vm7 = vcmp.gt.f32.partialorder %v5417_v7, 0.0  ;;  %v5481_v5 = vmul.f32 0.01, %v5417_v7  ;;  %v5418_v23 = vadd.f32 %v12763_v10, %v5379_v55  ;;  %9989 = vmatmul.mubr.msk.bf16.vlgmr.msra.gmra.mrb[32].mxu0 %vm440_vm2, %v12800_v1  ;;  %v5585_v44 = vmul.bf16 %v12800_v1, %v11352_v59 }
 0x563   : > { %vm5447_vm8 = vcmp.gt.f32.partialorder %v5415_v6, 0.0  ;;  %v5479_v13 = vmul.f32 0.01, %v5415_v6  ;;  %v5416_v41 = vadd.f32 %v12763_v10, %v5377_v18  ;;  %10021 = vmatpush3.bf16.msra.mxu0 %v12751_v56  ;;  %9992 = vmatprep.mubr.msk.bf16.mxu0 %vm440_vm2, %v5969_v46  ;;  %v5632_v0 = vshrl.u32 %v5586_v12, 16 }
 0x564   : > { %v5513_v54 = vsel %vm5449_vm7, %v5417_v7, %v5481_v5  ;;  %vm5450_vm9 = vcmp.gt.f32.partialorder %v5418_v23, 0.0  ;;  %v5482_v8 = vmul.f32 0.01, %v5418_v23  ;;  %10022 = vmatprep.subr.bf16.mxu0 %v10889_v30  ;;  %v5624_v43 = vshrl.u32 %v5585_v44, 16  ;;  %v13820_v5 = vld [vmem:[#allocation41_spill] sm:$0xff] }
 0x565   : > { %v5511_v59 = vsel %vm5447_vm8, %v5415_v6, %v5479_v13  ;;  %vm5448_vm10 = vcmp.gt.f32.partialorder %v5416_v41, 0.0  ;;  %v5480_v4 = vmul.f32 0.01, %v5416_v41  ;;  %v9966_v60 = vpop.f32.mrb[12].mxu0  ;;  %v5627_v37 = vshll.u32 %v5585_v44, 16 }
 0x566   : > { %v5514_v25 = vsel %vm5450_vm9, %v5418_v23, %v5482_v8  ;;  %v5382_v56 = vmul.f32 %v9966_v60, %v12758_v31  ;;  %v5282_v38 = vpop.f32.mrb[13].mxu0  ;;  %v5626_v16 = vrot.slane %v5624_v43, 7  ;;  %v12821_v51 = vrot.slane %v5632_v0, 7 }
 0x567   : > { %v5540_v45 = vpack.c.bf16 %v5514_v25, %v5513_v54  ;;  %v5512_v58 = vsel %vm5448_vm10, %v5416_v41, %v5480_v4  ;;  %v5380_v61 = vmul.f32 %v12758_v31, %v5282_v38  ;;  %v9967_v49 = vpop.f32.mrb[14].mxu0  ;;  %10023 = vmatpush3.bf16.msra.mxu0 %v10889_v30  ;;  %v5635_v19 = vshll.u32 %v5586_v12, 16 }
 0x568   : > { %v5539_v17 = vpack.c.bf16 %v5512_v58, %v5511_v59  ;;  %v5421_v9 = vadd.f32 %v12763_v10, %v5382_v56  ;;  %v5383_v36 = vmul.f32 %v9967_v49, %v12758_v31  ;;  %v5285_v42 = vpop.f32.mrb[15].mxu0  ;;  %v12826_v28 = vld [vmem:[#allocation3 + $0xb0] sm:$0xff]  ;;  %10056 = vmatprep.subr.bf16.mxu0 %v12818_v35  ;;  %v5629_v48 = vor.u32 %v5627_v37, %v5626_v16 }
 0x569   : > { %5556 = vst.msk [vmem:[#allocation3 + $0xc0] sm:$0xff] %vm440_vm2, %v5540_v45  ;;  %v5419_v34 = vadd.f32 %v12763_v10, %v5380_v61  ;;  %v5381_v32 = vmul.f32 %v12758_v31, %v5285_v42  ;;  %v12832_v57 = vld [vmem:[#allocation3 + $0xa8] sm:$0xff]  ;;  %v5637_v3 = vor.u32 %v5635_v19, %v12821_v51  ;;  %v5588_v53 = vmul.bf16 %v12826_v28, %v13819_v24 }
 0x56a   : > { %5555 = vst.msk [vmem:[#allocation3 + $0xb8] sm:$0xff] %vm440_vm2, %v5539_v17  ;;  %vm5453_vm13 = vcmp.gt.f32.partialorder %v5421_v9, 0.0  ;;  %v5485_v7 = vmul.f32 0.01, %v5421_v9  ;;  %v5422_v55 = vadd.f32 %v12763_v10, %v5383_v36  ;;  %9993 = vmatmul.mubr.msk.bf16.gmra.mrb[36].mxu0 %vm440_vm2, %v12832_v57  ;;  %v5630_v29 = vsel %vm1803_vm12, %v5622_v2, %v5629_v48 }
 0x56b   : > { %vm5451_vm14 = vcmp.gt.f32.partialorder %v5419_v34, 0.0  ;;  %v5483_v46 = vmul.f32 0.01, %v5419_v34  ;;  %v5420_v30 = vadd.f32 %v12763_v10, %v5381_v32  ;;  %9996 = vmatprep.mubr.msk.bf16.mxu0 %vm440_vm2, %v12826_v28  ;;  %5767 = vst.msk [vmem:[#allocation3 + $0x8] sm:$0xff] %vm440_vm2, %v5630_v29  ;;  %v5638_v6 = vsel %vm1803_vm12, %v5626_v16, %v5637_v3 }
 0x56c   : > { %v5517_v18 = vsel %vm5453_vm13, %v5421_v9, %v5485_v7  ;;  %vm5454_vm15 = vcmp.gt.f32.partialorder %v5422_v55, 0.0  ;;  %v5486_v12 = vmul.f32 0.01, %v5422_v55  ;;  %5768 = vst.msk [vmem:[#allocation3 + $0x10] sm:$0xff] %vm440_vm2, %v5638_v6  ;;  %v5587_v20 = vmul.bf16 %v12832_v57, %v13820_v5  ;;  %v13821_v5 = vld [vmem:[#allocation43_spill] sm:$0xff] }
 0x56d   : > { %v5515_v2 = vsel %vm5451_vm14, %v5419_v34, %v5483_v46  ;;  %vm5452_vm0 = vcmp.gt.f32.partialorder %v5420_v30, 0.0  ;;  %v5484_v23 = vmul.f32 0.01, %v5420_v30  ;;  %v9970_v44 = vpop.f32.mrb[16].mxu0  ;;  %v5648_v13 = vshrl.u32 %v5588_v53, 16 }
 0x56e   : > { %v5518_v41 = vsel %vm5454_vm15, %v5422_v55, %v5486_v12  ;;  %v5386_v0 = vmul.f32 %v9970_v44, %v12758_v31  ;;  %v5298_v54 = vpop.f32.mrb[17].mxu0  ;;  %v5640_v8 = vshrl.u32 %v5587_v20, 16  ;;  %v5643_v43 = vshll.u32 %v5587_v20, 16 }
 0x56f   : > { %v5542_v59 = vpack.c.bf16 %v5518_v41, %v5517_v18  ;;  %v5516_v4 = vsel %vm5452_vm0, %v5420_v30, %v5484_v23  ;;  %v5384_v60 = vmul.f32 %v12758_v31, %v5298_v54  ;;  %v9971_v37 = vpop.f32.mrb[18].mxu0  ;;  %v12854_v25 = vrot.slane %v5648_v13, 7 }
 0x570   : > { %v5541_v56 = vpack.c.bf16 %v5516_v4, %v5515_v2  ;;  %v5425_v38 = vadd.f32 %v12763_v10, %v5386_v0  ;;  %v5387_v16 = vmul.f32 %v9971_v37, %v12758_v31  ;;  %v5301_v45 = vpop.f32.mrb[19].mxu0  ;;  %v12858_v58 = vld [vmem:[#allocation3 + $0xc0] sm:$0xff]  ;;  %v5642_v61 = vrot.slane %v5640_v8, 7 }
 0x571   : > { %5558 = vst.msk [vmem:[#allocation3 + $0xd0] sm:$0xff] %vm440_vm2, %v5542_v59  ;;  %v5423_v49 = vadd.f32 %v12763_v10, %v5384_v60  ;;  %v5385_v19 = vmul.f32 %v12758_v31, %v5301_v45  ;;  %v12863_v17 = vld [vmem:[#allocation3 + $0xb8] sm:$0xff]  ;;  %v5651_v9 = vshll.u32 %v5588_v53, 16  ;;  %v5590_v36 = vmul.bf16 %v12858_v58, %v11383_v63 }
 0x572   : > { %5557 = vst.msk [vmem:[#allocation3 + $0xc8] sm:$0xff] %vm440_vm2, %v5541_v56  ;;  %vm5457_vm1 = vcmp.gt.f32.partialorder %v5425_v38, 0.0  ;;  %v5489_v42 = vmul.f32 0.01, %v5425_v38  ;;  %v5426_v48 = vadd.f32 %v12763_v10, %v5387_v16  ;;  %9997 = vmatmul.mubr.msk.bf16.gmra.mrb[40].mxu0 %vm440_vm2, %v12863_v17  ;;  %v5645_v34 = vor.u32 %v5643_v43, %v5642_v61 }
 0x573   : > { %vm5455_vm3 = vcmp.gt.f32.partialorder %v5423_v49, 0.0  ;;  %v5487_v32 = vmul.f32 0.01, %v5423_v49  ;;  %v5424_v3 = vadd.f32 %v12763_v10, %v5385_v19  ;;  %10000 = vmatprep.mubr.msk.bf16.mxu0 %vm440_vm2, %v12858_v58  ;;  %v5653_v24 = vor.u32 %v5651_v9, %v12854_v25 }
 0x574   : > { %v5521_v63 = vsel %vm5457_vm1, %v5425_v38, %v5489_v42  ;;  %vm5458_vm4 = vcmp.gt.f32.partialorder %v5426_v48, 0.0  ;;  %v5490_v53 = vmul.f32 0.01, %v5426_v48  ;;  %v5646_v7 = vsel %vm1803_vm12, %v12821_v51, %v5645_v34 }
 0x575   : > { %v5519_v55 = vsel %vm5455_vm3, %v5423_v49, %v5487_v32  ;;  %vm5456_vm5 = vcmp.gt.f32.partialorder %v5424_v3, 0.0  ;;  %v5488_v29 = vmul.f32 0.01, %v5424_v3  ;;  %v9974_v46 = vpop.f32.mrb[20].mxu0  ;;  %5769 = vst.msk [vmem:[#allocation3 + $0x18] sm:$0xff] %vm440_vm2, %v5646_v7  ;;  %v5654_v30 = vsel %vm1803_vm12, %v5642_v61, %v5653_v24 }
 0x576   : > { %v5522_v6 = vsel %vm5458_vm4, %v5426_v48, %v5490_v53  ;;  %v5390_v18 = vmul.f32 %v9974_v46, %v12758_v31  ;;  %v5314_v12 = vpop.f32.mrb[21].mxu0  ;;  %5770 = vst.msk [vmem:[#allocation3 + $0x20] sm:$0xff] %vm440_vm2, %v5654_v30  ;;  %v5589_v20 = vmul.bf16 %v12863_v17, %v13821_v5  ;;  %v5664_v2 = vshrl.u32 %v5590_v36, 16  ;;  %v13822_v46 = vld [vmem:[#allocation45_spill] sm:$0xff] }
 0x577   : > { %v5544_v23 = vpack.c.bf16 %v5522_v6, %v5521_v63  ;;  %v5520_v51 = vsel %vm5456_vm5, %v5424_v3, %v5488_v29  ;;  %v5388_v44 = vmul.f32 %v12758_v31, %v5314_v12  ;;  %v9975_v13 = vpop.f32.mrb[22].mxu0  ;;  %v5667_v41 = vshll.u32 %v5590_v36, 16 }
 0x578   : > { %v5543_v0 = vpack.c.bf16 %v5520_v51, %v5519_v55  ;;  %v5429_v54 = vadd.f32 %v12763_v10, %v5390_v18  ;;  %v5391_v8 = vmul.f32 %v9975_v13, %v12758_v31  ;;  %v5317_v43 = vpop.f32.mrb[23].mxu0  ;;  %v5656_v59 = vshrl.u32 %v5589_v20, 16  ;;  %v12897_v61 = vld [vmem:[#allocation3 + $0xd0] sm:$0xff] }
 0x579   : > { %5560 = vst.msk [vmem:[#allocation3 + $0xe0] sm:$0xff] %vm440_vm2, %v5544_v23  ;;  %v5427_v4 = vadd.f32 %v12763_v10, %v5388_v44  ;;  %v5389_v60 = vmul.f32 %v12758_v31, %v5317_v43  ;;  %v12889_v37 = vld [vmem:[#allocation3 + $0xc8] sm:$0xff]  ;;  %v5659_v56 = vshll.u32 %v5589_v20, 16  ;;  %v12891_v38 = vrot.slane %v5664_v2, 7  ;;  %v13823_v20 = vld [vmem:[#allocation44_spill] sm:$0xff] }
 0x57a   : > { %5559 = vst.msk [vmem:[#allocation3 + $0xd8] sm:$0xff] %vm440_vm2, %v5543_v0  ;;  %vm5461_vm6 = vcmp.gt.f32.partialorder %v5429_v54, 0.0  ;;  %v5493_v16 = vmul.f32 0.01, %v5429_v54  ;;  %v5430_v45 = vadd.f32 %v12763_v10, %v5391_v8  ;;  %10001 = vmatmul.mubr.msk.bf16.gmra.mrb[44].mxu0 %vm440_vm2, %v12889_v37  ;;  %v5658_v49 = vrot.slane %v5656_v59, 7 }
 0x57b   : > { %vm5459_vm7 = vcmp.gt.f32.partialorder %v5427_v4, 0.0  ;;  %v5491_v19 = vmul.f32 0.01, %v5427_v4  ;;  %v5428_v9 = vadd.f32 %v12763_v10, %v5389_v60  ;;  %10004 = vmatprep.mubr.msk.bf16.mxu0 %vm440_vm2, %v12897_v61  ;;  %v5669_v36 = vor.u32 %v5667_v41, %v12891_v38 }
 0x57c   : > { %v5525_v42 = vsel %vm5461_vm6, %v5429_v54, %v5493_v16  ;;  %vm5462_vm8 = vcmp.gt.f32.partialorder %v5430_v45, 0.0  ;;  %v5494_v48 = vmul.f32 0.01, %v5430_v45  ;;  %v5661_v34 = vor.u32 %v5659_v56, %v5658_v49 }
 0x57d   : > { %v5523_v32 = vsel %vm5459_vm7, %v5427_v4, %v5491_v19  ;;  %vm5460_vm9 = vcmp.gt.f32.partialorder %v5428_v9, 0.0  ;;  %v5492_v3 = vmul.f32 0.01, %v5428_v9  ;;  %v9978_v24 = vpop.f32.mrb[24].mxu0  ;;  %v5670_v63 = vsel %vm1803_vm12, %v5658_v49, %v5669_v36 }
 0x57e   : > { %v5526_v53 = vsel %vm5462_vm8, %v5430_v45, %v5494_v48  ;;  %v5394_v7 = vmul.f32 %v9978_v24, %v12758_v31  ;;  %v5330_v55 = vpop.f32.mrb[25].mxu0  ;;  %v5662_v29 = vsel %vm1803_vm12, %v12854_v25, %v5661_v34  ;;  %5772 = vst.msk [vmem:[#allocation3 + $0x30] sm:$0xff] %vm440_vm2, %v5670_v63  ;;  %v5591_v30 = vmul.bf16 %v12889_v37, %v13822_v46 }
 0x57f   : > { %v5546_v6 = vpack.c.bf16 %v5526_v53, %v5525_v42  ;;  %v5524_v18 = vsel %vm5460_vm9, %v5428_v9, %v5492_v3  ;;  %v5392_v12 = vmul.f32 %v12758_v31, %v5330_v55  ;;  %v9979_v5 = vpop.f32.mrb[26].mxu0  ;;  %5771 = vst.msk [vmem:[#allocation3 + $0x28] sm:$0xff] %vm440_vm2, %v5662_v29  ;;  %v5592_v2 = vmul.bf16 %v12897_v61, %v13823_v20 }
 0x580   : > { %v5545_v23 = vpack.c.bf16 %v5524_v18, %v5523_v32  ;;  %v5433_v51 = vadd.f32 %v12763_v10, %v5394_v7  ;;  %v5395_v25 = vmul.f32 %v9979_v5, %v12758_v31  ;;  %v5333_v44 = vpop.f32.mrb[27].mxu0  ;;  %v5672_v13 = vshrl.u32 %v5591_v30, 16  ;;  %v12925_v60 = vld [vmem:[#allocation3 + $0xe0] sm:$0xff]  ;;  %v13824_v7 = vld [vmem:[#allocation47_spill] sm:$0xff] }
 0x581   : > { %5562 = vst.msk [vmem:[#allocation3 + $0xf0] sm:$0xff] %vm440_vm2, %v5546_v6  ;;  %v5431_v41 = vadd.f32 %v12763_v10, %v5392_v12  ;;  %v5393_v0 = vmul.f32 %v12758_v31, %v5333_v44  ;;  %v12919_v54 = vld [vmem:[#allocation3 + $0xd8] sm:$0xff]  ;;  %v5675_v8 = vshll.u32 %v5591_v30, 16  ;;  %v5680_v43 = vshrl.u32 %v5592_v2, 16 }
 0x582   : > { %5561 = vst.msk [vmem:[#allocation3 + $0xe8] sm:$0xff] %vm440_vm2, %v5545_v23  ;;  %vm5465_vm10 = vcmp.gt.f32.partialorder %v5433_v51, 0.0  ;;  %v5497_v59 = vmul.f32 0.01, %v5433_v51  ;;  %v5434_v4 = vadd.f32 %v12763_v10, %v5395_v25  ;;  %10005 = vmatmul.mubr.msk.bf16.gmra.mrb[48].mxu0 %vm440_vm2, %v12919_v54  ;;  %v5674_v56 = vrot.slane %v5672_v13, 7 }
 0x583   : > { %vm5463_vm13 = vcmp.gt.f32.partialorder %v5431_v41, 0.0  ;;  %v5495_v16 = vmul.f32 0.01, %v5431_v41  ;;  %v5432_v45 = vadd.f32 %v12763_v10, %v5393_v0  ;;  %10008 = vmatprep.mubr.msk.bf16.mxu0 %vm440_vm2, %v12925_v60  ;;  %v5682_v49 = vrot.slane %v5680_v43, 7 }
 0x584   : > { %v5529_v19 = vsel %vm5465_vm10, %v5433_v51, %v5497_v59  ;;  %vm5466_vm14 = vcmp.gt.f32.partialorder %v5434_v4, 0.0  ;;  %v5498_v9 = vmul.f32 0.01, %v5434_v4  ;;  %v5677_v36 = vor.u32 %v5675_v8, %v5674_v56 }
 0x585   : > { %v5527_v42 = vsel %vm5463_vm13, %v5431_v41, %v5495_v16  ;;  %vm5464_vm15 = vcmp.gt.f32.partialorder %v5432_v45, 0.0  ;;  %v5496_v48 = vmul.f32 0.01, %v5432_v45  ;;  %v5683_v32 = vshll.u32 %v5592_v2, 16 }
 0x586   : > { %v5530_v3 = vsel %vm5466_vm14, %v5434_v4, %v5498_v9  ;;  %v5678_v53 = vsel %vm1803_vm12, %v12891_v38, %v5677_v36  ;;  %v5593_v55 = vmul.bf16 %v12919_v54, %v13824_v7  ;;  %v13825_v4 = vld [vmem:[#allocation46_spill] sm:$0xff] }
 0x587   : > { %v5548_v29 = vpack.c.bf16 %v5530_v3, %v5529_v19  ;;  %v5528_v46 = vsel %vm5464_vm15, %v5432_v45, %v5496_v48  ;;  %5773 = vst.msk [vmem:[#allocation3 + $0x38] sm:$0xff] %vm440_vm2, %v5678_v53  ;;  %v5685_v18 = vor.u32 %v5683_v32, %v5682_v49 }
 0x588   : > { %v5547_v12 = vpack.c.bf16 %v5528_v46, %v5527_v42  ;;  %v5688_v23 = vshrl.u32 %v5593_v55, 16  ;;  %v5691_v13 = vshll.u32 %v5593_v55, 16  ;;  %v12949_v8 = vld [vmem:[#allocation3 + $0xf0] sm:$0xff] }
 0x589   : > { %v9982_v34 = vpop.f32.mrb[28].mxu0  ;;  %5564 = vst.msk [vmem:[#allocation3 + $0x100] sm:$0xff] %vm440_vm2, %v5548_v29  ;;  %v12942_v25 = vld [vmem:[#allocation3 + $0xe8] sm:$0xff]  ;;  %v5686_v44 = vsel %vm1803_vm12, %v5674_v56, %v5685_v18  ;;  %v5594_v56 = vmul.bf16 %v12925_v60, %v13825_v4  ;;  %v5596_v53 = vmul.bf16 %v12949_v8, %v11418_v15  ;;  %v5604_v4 = vmul.bf16 %v12832_v57, %v11476_v21 }
 0x58a   : > { %v5398_v24 = vmul.f32 %v9982_v34, %v12758_v31  ;;  %v5346_v63 = vpop.f32.mrb[29].mxu0  ;;  %5563 = vst.msk [vmem:[#allocation3 + $0xf8] sm:$0xff] %vm440_vm2, %v5547_v12  ;;  %10009 = vmatmul.mubr.msk.bf16.gmra.mrb[52].mxu0 %vm440_vm2, %v12942_v25  ;;  %5774 = vst.msk [vmem:[#allocation3 + $0x40] sm:$0xff] %vm440_vm2, %v5686_v44  ;;  %v5690_v43 = vrot.slane %v5688_v23, 7  ;;  %v5605_v21 = vmul.bf16 %v12826_v28, %v11496_v62 }
 0x58b   : > { %v5396_v30 = vmul.f32 %v12758_v31, %v5346_v63  ;;  %v9983_v6 = vpop.f32.mrb[30].mxu0  ;;  %10012 = vmatprep.mubr.msk.bf16.mxu0 %vm440_vm2, %v12949_v8  ;;  %v5696_v42 = vshrl.u32 %v5594_v56, 16  ;;  %v5699_v32 = vshll.u32 %v5594_v56, 16  ;;  %v5712_v18 = vshrl.u32 %v5596_v53, 16 }
 0x58c   : > { %v5437_v5 = vadd.f32 %v12763_v10, %v5398_v24  ;;  %v5399_v20 = vmul.f32 %v9983_v6, %v12758_v31  ;;  %v5349_v2 = vpop.f32.mrb[31].mxu0  ;;  %v5693_v19 = vor.u32 %v5691_v13, %v5690_v43  ;;  %v5715_v12 = vshll.u32 %v5596_v53, 16 }
 0x58d   : > { %v5435_v38 = vadd.f32 %v12763_v10, %v5396_v30  ;;  %v5397_v51 = vmul.f32 %v12758_v31, %v5349_v2  ;;  %v5698_v63 = vrot.slane %v5696_v42, 7  ;;  %v13826_v30 = vld [vmem:[#allocation40_spill] sm:$0xff]  ;;  %v5799_v42 = vshll.u32 %v5604_v4, 16 }
 0x58e   : > { %vm5469_vm0 = vcmp.gt.f32.partialorder %v5437_v5, 0.0  ;;  %v5501_v41 = vmul.f32 0.01, %v5437_v5  ;;  %v5438_v0 = vadd.f32 %v12763_v10, %v5399_v20  ;;  %v5694_v34 = vsel %vm1803_vm12, %v5682_v49, %v5693_v19 }
 0x58f   : > { %vm5467_vm1 = vcmp.gt.f32.partialorder %v5435_v38, 0.0  ;;  %v5499_v31 = vmul.f32 0.01, %v5435_v38  ;;  %v5436_v59 = vadd.f32 %v12763_v10, %v5397_v51  ;;  %v5595_v10 = vmul.bf16 %v12942_v25, %v11421_v40  ;;  %5775 = vst.msk [vmem:[#allocation3 + $0x48] sm:$0xff] %vm440_vm2, %v5694_v34 }
 0x590   : > { %v5533_v16 = vsel %vm5469_vm0, %v5437_v5, %v5501_v41  ;;  %vm5470_vm3 = vcmp.gt.f32.partialorder %v5438_v0, 0.0  ;;  %v5502_v45 = vmul.f32 0.01, %v5438_v0  ;;  %v12963_v55 = vld [vmem:[#allocation3 + $0x100] sm:$0xff]  ;;  %v5602_v49 = vmul.bf16 %v12800_v1, %v13826_v30 }
 0x591   : > { %v5531_v9 = vsel %vm5467_vm1, %v5435_v38, %v5499_v31  ;;  %vm5468_vm4 = vcmp.gt.f32.partialorder %v5436_v59, 0.0  ;;  %v5500_v36 = vmul.f32 0.01, %v5436_v59  ;;  %v5704_v29 = vshrl.u32 %v5595_v10, 16  ;;  %v12968_v6 = vld [vmem:[#allocation3 + $0xf8] sm:$0xff] }
 0x592   : > { %v5534_v48 = vsel %vm5470_vm3, %v5438_v0, %v5502_v45  ;;  %v5707_v46 = vshll.u32 %v5595_v10, 16  ;;  %v5701_v40 = vor.u32 %v5699_v32, %v5698_v63  ;;  %v5598_v5 = vmul.bf16 %v12963_v55, %v11424_v52  ;;  %10013 = vmatmul.mubr.msk.bf16.gmra.mrb[56].mxu0 %vm440_vm2, %v12968_v6 }
 0x593   : > { %v5550_v3 = vpack.c.bf16 %v5534_v48, %v5533_v16  ;;  %v5532_v24 = vsel %vm5468_vm4, %v5436_v59, %v5500_v36  ;;  %v5706_v15 = vrot.slane %v5704_v29, 7  ;;  %v5597_v20 = vmul.bf16 %v12968_v6, %v11433_v50  ;;  %10016 = vmatprep.mubr.msk.bf16.mxu0 %vm440_vm2, %v12963_v55  ;;  %v5947_v48 = vld [vmem:[#allocation3] sm:$0xff] }
 0x594   : > { %v5549_v7 = vpack.c.bf16 %v5532_v24, %v5531_v9  ;;  %v5784_v1 = vshrl.u32 %v5602_v49, 16  ;;  %v5786_v2 = vshll.u32 %v5602_v49, 16  ;;  %v5702_v23 = vsel %vm1803_vm12, %v5690_v43, %v5701_v40 }
 0x595   : > { %5566 = vst.msk [vmem:[#allocation3 + $0x110] sm:$0xff] %vm440_vm2, %v5550_v3  ;;  %v5714_v38 = vrot.slane %v5712_v18, 7  ;;  %v5728_v51 = vshrl.u32 %v5598_v5, 16  ;;  %v5731_v44 = vshll.u32 %v5598_v5, 16  ;;  %5776 = vst.msk [vmem:[#allocation3 + $0x50] sm:$0xff] %vm440_vm2, %v5702_v23  ;;  %v5709_v52 = vor.u32 %v5707_v46, %v5706_v15 }
 0x596   : > { %5565 = vst.msk [vmem:[#allocation3 + $0x108] sm:$0xff] %vm440_vm2, %v5549_v7  ;;  %v5720_v13 = vshrl.u32 %v5597_v20, 16  ;;  %v5723_v41 = vshll.u32 %v5597_v20, 16  ;;  %v5788_v0 = vrot.slane %v5786_v2, 1  ;;  %v5791_v50 = vshll.u32 %v12804_v11, 16 }
 0x597   : > { %v5717_v31 = vor.u32 %v5715_v12, %v5714_v38  ;;  %v12981_v59 = vrot.slane %v5728_v51, 7  ;;  %v5710_v56 = vsel %vm1803_vm12, %v5698_v63, %v5709_v52  ;;  %v5795_v45 = vshrl.u32 %v12804_v11, 16 }
 0x598   : > { %v5722_v43 = vrot.slane %v5720_v13, 7  ;;  %v5789_v16 = vor.u32 %v5788_v0, %v5784_v1  ;;  %5777 = vst.msk [vmem:[#allocation3 + $0x58] sm:$0xff] %vm440_vm2, %v5710_v56  ;;  %v5793_v36 = vrot.slane %v5791_v50, 1  ;;  %v5803_v57 = vshrl.u32 %v5604_v4, 16  ;;  %v10891_v13 = vld [vmem:[%s13660_s10 + $0x28] sm:$0xff]  }
 0x599   : > { %v5718_v19 = vsel %vm1803_vm12, %v5706_v15, %v5717_v31  ;;  %v5733_v9 = vor.u32 %v5731_v44, %v12981_v59  ;;  %v5606_v32 = vmul.bf16 %v12863_v17, %v11509_v22  ;;  %v5801_v63 = vrot.slane %v5799_v42, 1  ;;  %v13028_v50 = vld [vmem:[#allocation3 + $0x8] sm:$0xff] }
 0x59a   : > { %5778 = vst.msk [vmem:[#allocation3 + $0x60] sm:$0xff] %vm440_vm2, %v5718_v19  ;;  %v5725_v34 = vor.u32 %v5723_v41, %v5722_v43  ;;  %v5794_v3 = vsel %vm1640_vm11, %v5789_v16, %v5793_v36  ;;  %v5797_v24 = vor.u32 %v5795_v45, %v5793_v36  ;;  %v5807_v22 = vshll.u32 %v5605_v21, 16  ;;  %v13034_v16 = vld [vmem:[#allocation3 + $0x10] sm:$0xff] }
 0x59b   : > { %v5734_v10 = vsel %vm1803_vm12, %v5722_v43, %v5733_v9  ;;  %5931 = vst.msk [vmem:[#allocation3 + $0x128] sm:$0xff] %vm440_vm2, %v5794_v3  ;;  %v5811_v28 = vshrl.u32 %v5605_v21, 16  ;;  %v5805_v29 = vor.u32 %v5803_v57, %v5801_v63  ;;  %v5815_v46 = vshll.u32 %v5606_v32, 16  ;;  %v13827_v9 = vld [vmem:[#allocation51_spill] sm:$0xff]  ;;  %v13828_v21 = vld [vmem:[#allocation53_spill] sm:$0xff] }
 0x59c   : > { %v5726_v53 = vsel %vm1803_vm12, %v5714_v38, %v5725_v34  ;;  %5780 = vst.msk [vmem:[#allocation3 + $0x70] sm:$0xff] %vm440_vm2, %v5734_v10  ;;  %v5802_v7 = vsel %vm1640_vm11, %v5797_v24, %v5801_v63  ;;  %v5607_v30 = vmul.bf16 %v12858_v58, %v11512_v27  ;;  %v5819_v18 = vshrl.u32 %v5606_v32, 16  ;;  %v13051_v57 = vld [vmem:[%s13660_s10 + $0x30] sm:$0xff]  }
 0x59d   : > { %v12996_v11 = vld [vmem:[#allocation3 + $0x108] sm:$0xff]  ;;  %5779 = vst.msk [vmem:[#allocation3 + $0x68] sm:$0xff] %vm440_vm2, %v5726_v53  ;;  %5932 = vst.msk [vmem:[#allocation3 + $0x130] sm:$0xff] %vm440_vm2, %v5802_v7  ;;  %v5817_v12 = vrot.slane %v5815_v46, 1  ;;  %v5608_v15 = vmul.bf16 %v12889_v37, %v11518_v39  ;;  %v5609_v27 = vmul.bf16 %v12897_v61, %v13782_v14  ;;  %v5610_v31 = vmul.bf16 %v12919_v54, %v13783_v26  ;;  %v13829_v53 = vld [vmem:[#allocation52_spill] sm:$0xff] }
 0x59e   : > { %10017 = vmatmul.mubr.msk.bf16.gmra.mrb[60].mxu0 %vm440_vm2, %v12996_v11  ;;  %v5599_v62 = vmul.bf16 %v12996_v11, %v11472_v33  ;;  %v5809_v33 = vrot.slane %v5807_v22, 1  ;;  %v5823_v5 = vshll.u32 %v5607_v30, 16  ;;  %v5827_v20 = vshrl.u32 %v5607_v30, 16  ;;  %v13830_v46 = vld [vmem:[#allocation55_spill] sm:$0xff] }
 0x59f   : > { %10024 = vmatprep.mubr.msk.bf16.mxu0 %vm440_vm2, %v5947_v48  ;;  %v5821_v38 = vor.u32 %v5819_v18, %v5817_v12  ;;  %v5831_v44 = vshll.u32 %v5608_v15, 16  ;;  %v5835_v52 = vshrl.u32 %v5608_v15, 16  ;;  %v5839_v0 = vshll.u32 %v5609_v27, 16  ;;  %v13831_v18 = vld [vmem:[#allocation54_spill] sm:$0xff] }
 0x5a0   : > { %v5736_v49 = vshrl.u32 %v5599_v62, 16  ;;  %v5739_v40 = vshll.u32 %v5599_v62, 16  ;;  %v5810_v2 = vsel %vm1640_vm11, %v5805_v29, %v5809_v33  ;;  %v5813_v23 = vor.u32 %v5811_v28, %v5809_v33 }
 0x5a1   : > { %5933 = vst.msk [vmem:[#allocation3 + $0x138] sm:$0xff] %vm440_vm2, %v5810_v2  ;;  %v5825_v51 = vrot.slane %v5823_v5, 1  ;;  %v5833_v56 = vrot.slane %v5831_v44, 1  ;;  %v5843_v43 = vshrl.u32 %v5609_v27, 16  ;;  %v5841_v26 = vrot.slane %v5839_v0, 1  ;;  %v13064_v5 = vld [vmem:[#allocation3 + $0x110] sm:$0xff] }
 0x5a2   : > { %v13015_v1 = vrot.slane %v5736_v49, 7  ;;  %v5818_v41 = vsel %vm1640_vm11, %v5813_v23, %v5817_v12  ;;  %v5847_v19 = vshll.u32 %v5610_v31, 16  ;;  %v5611_v36 = vmul.bf16 %v12925_v60, %v13827_v9  ;;  %v13068_v27 = vld [vmem:[#allocation3 + $0x18] sm:$0xff] }
 0x5a3   : > { %5934 = vst.msk [vmem:[#allocation3 + $0x140] sm:$0xff] %vm440_vm2, %v5818_v41  ;;  %v5826_v14 = vsel %vm1640_vm11, %v5821_v38, %v5825_v51  ;;  %v5829_v4 = vor.u32 %v5827_v20, %v5825_v51  ;;  %v5837_v48 = vor.u32 %v5835_v52, %v5833_v56  ;;  %v5851_v34 = vshrl.u32 %v5610_v31, 16  ;;  %v13832_v52 = vld [vmem:[#allocation57_spill] sm:$0xff] }
 0x5a4   : > { %v5741_v39 = vor.u32 %v5739_v40, %v13015_v1  ;;  %5935 = vst.msk [vmem:[#allocation3 + $0x148] sm:$0xff] %vm440_vm2, %v5826_v14  ;;  %v5849_v32 = vrot.slane %v5847_v19, 1  ;;  %v5855_v10 = vshll.u32 %v5611_v36, 16  ;;  %v5859_v3 = vshrl.u32 %v5611_v36, 16  ;;  %v13833_v14 = vld [vmem:[#allocation56_spill] sm:$0xff] }
 0x5a5   : > { %v5834_v42 = vsel %vm1640_vm11, %v5829_v4, %v5833_v56  ;;  %v5842_v24 = vsel %vm1640_vm11, %v5837_v48, %v5841_v26  ;;  %v5613_v62 = vmul.bf16 %v12949_v8, %v13829_v53  ;;  %v5614_v30 = vmul.bf16 %v12968_v6, %v13830_v46  ;;  %v13834_v36 = vld [vmem:[#allocation48_spill] sm:$0xff] }
 0x5a6   : > { %10025 = vmatmul.mubr.msk.bf16.vlgmr.msra.gmra.mrb[32].mxu0 %vm440_vm2, %v13028_v50  ;;  %v5742_v45 = vsel %vm1803_vm12, %v12981_v59, %v5741_v39  ;;  %v5612_v59 = vmul.bf16 %v12942_v25, %v13828_v21  ;;  %5936 = vst.msk [vmem:[#allocation3 + $0x150] sm:$0xff] %vm440_vm2, %v5834_v42  ;;  %5937 = vst.msk [vmem:[#allocation3 + $0x158] sm:$0xff] %vm440_vm2, %v5842_v24  ;;  %v5853_v7 = vor.u32 %v5851_v34, %v5849_v32  ;;  %v13075_v39 = vld [vmem:[#allocation3 + $0x20] sm:$0xff] }
 0x5a7   : > { %10057 = vmatpush3.bf16.msra.mxu0 %v12818_v35  ;;  %10028 = vmatprep.mubr.msk.bf16.mxu0 %vm440_vm2, %v13034_v16  ;;  %5781 = vst.msk [vmem:[#allocation3 + $0x78] sm:$0xff] %vm440_vm2, %v5742_v45  ;;  %v5845_v35 = vor.u32 %v5843_v43, %v5841_v26  ;;  %v5857_v29 = vrot.slane %v5855_v10, 1  ;;  %v5871_v40 = vshll.u32 %v5613_v62, 16  ;;  %v5875_v33 = vshrl.u32 %v5613_v62, 16 }
 0x5a8   : > { %10058 = vmatprep.subr.bf16.mxu0 %v10891_v13  ;;  %v5863_v63 = vshll.u32 %v5612_v59, 16  ;;  %v5867_v22 = vshrl.u32 %v5612_v59, 16  ;;  %v5615_v12 = vmul.bf16 %v12963_v55, %v13831_v18  ;;  %v5879_v2 = vshll.u32 %v5614_v30, 16  ;;  %v13117_v18 = vld [vmem:[#allocation3 + $0x48] sm:$0xff] }
 0x5a9   : > { %v5850_v28 = vsel %vm1640_vm11, %v5845_v35, %v5849_v32  ;;  %v5858_v15 = vsel %vm1640_vm11, %v5853_v7, %v5857_v29  ;;  %v5861_v20 = vor.u32 %v5859_v3, %v5857_v29  ;;  %v5883_v23 = vshrl.u32 %v5614_v30, 16  ;;  %v13099_v29 = vld [vmem:[#allocation3 + $0x30] sm:$0xff] }
 0x5aa   : > { %5938 = vst.msk [vmem:[#allocation3 + $0x160] sm:$0xff] %vm440_vm2, %v5850_v28  ;;  %v5865_v49 = vrot.slane %v5863_v63, 1  ;;  %5939 = vst.msk [vmem:[#allocation3 + $0x168] sm:$0xff] %vm440_vm2, %v5858_v15  ;;  %v5873_v51 = vrot.slane %v5871_v40, 1  ;;  %v5887_v44 = vshll.u32 %v5615_v12, 16  ;;  %v5881_v0 = vrot.slane %v5879_v2, 1 }
 0x5ab   : > { %10059 = vmatpush3.bf16.msra.mxu0 %v10891_v13  ;;  %v5616_v13 = vmul.bf16 %v12996_v11, %v13832_v52  ;;  %v5891_v31 = vshrl.u32 %v5615_v12, 16  ;;  %v5617_v4 = vmul.bf16 %v13064_v5, %v13833_v14  ;;  %v5600_v42 = vmul.bf16 %v13064_v5, %v13834_v36  ;;  %v13094_v28 = vld [vmem:[#allocation3 + $0x28] sm:$0xff]  ;;  %v13109_v40 = vld [vmem:[#allocation3 + $0x38] sm:$0xff]  ;;  %v13121_v12 = vld [vmem:[#allocation3 + $0x50] sm:$0xff] }
 0x5ac   : > { %10092 = vmatprep.subr.bf16.mxu0 %v13051_v57  ;;  %v5869_v38 = vor.u32 %v5867_v22, %v5865_v49  ;;  %v5866_v41 = vsel %vm1640_vm11, %v5861_v20, %v5865_v49  ;;  %v5877_v43 = vor.u32 %v5875_v33, %v5873_v51  ;;  %v5889_v45 = vrot.slane %v5887_v44, 1  ;;  %v13113_v33 = vld [vmem:[#allocation3 + $0x40] sm:$0xff]  ;;  %v13133_v20 = vld [vmem:[#allocation3 + $0x68] sm:$0xff]  ;;  %v13137_v2 = vld [vmem:[#allocation3 + $0x70] sm:$0xff] }
 0x5ad   : > { %5940 = vst.msk [vmem:[#allocation3 + $0x170] sm:$0xff] %vm440_vm2, %v5866_v41  ;;  %v5895_v26 = vshll.u32 %v5616_v13, 16  ;;  %v5885_v19 = vor.u32 %v5883_v23, %v5881_v0  ;;  %v5903_v9 = vshll.u32 %v5617_v4, 16  ;;  %v5913_v48 = vrot.slane %v12795_v47, 1  ;;  %v13129_v15 = vld [vmem:[#allocation3 + $0x60] sm:$0xff]  ;;  %v13149_v44 = vld [vmem:[#allocation3 + $0x128] sm:$0xff] }
 0x5ae   : > { %10029 = vmatmul.mubr.msk.bf16.gmra.mrb[36].mxu0 %vm440_vm2, %v13068_v27  ;;  %v5874_v56 = vsel %vm1640_vm11, %v5869_v38, %v5873_v51  ;;  %v5882_v34 = vsel %vm1640_vm11, %v5877_v43, %v5881_v0  ;;  %v5893_v21 = vor.u32 %v5891_v31, %v5889_v45  ;;  %v5899_v35 = vshrl.u32 %v5616_v13, 16  ;;  %v6430_v23 = vld [vmem:[#allocation3 + $0x120] sm:$0xff]  ;;  %v13141_v38 = vld [vmem:[#allocation3 + $0x78] sm:$0xff]  ;;  %v13153_v52 = vld [vmem:[#allocation3 + $0x130] sm:$0xff] }
 0x5af   : > { %10032 = vmatprep.mubr.msk.bf16.mxu0 %vm440_vm2, %v13075_v39  ;;  %5941 = vst.msk [vmem:[#allocation3 + $0x178] sm:$0xff] %vm440_vm2, %v5874_v56  ;;  %v5897_v59 = vrot.slane %v5895_v26, 1  ;;  %5942 = vst.msk [vmem:[#allocation3 + $0x180] sm:$0xff] %vm440_vm2, %v5882_v34  ;;  %v5890_v32 = vsel %vm1640_vm11, %v5885_v19, %v5889_v45  ;;  %v5905_v10 = vrot.slane %v5903_v9, 1  ;;  %v5744_v3 = vshrl.u32 %v5600_v42, 16  ;;  %v10893_v51 = vld [vmem:[%s13660_s10 + $0x38] sm:$0xff]  }
 0x5b0   : > { %v5907_v24 = vshrl.u32 %v5617_v4, 16  ;;  %5943 = vst.msk [vmem:[#allocation3 + $0x188] sm:$0xff] %vm440_vm2, %v5890_v32  ;;  %v5747_v62 = vshll.u32 %v5600_v42, 16  ;;  %v10894_v13 = vld [vmem:[%s13660_s10 + $0x40] sm:$0xff]   ;;  %v13161_v41 = vld [vmem:[#allocation3 + $0x138] sm:$0xff]  ;;  %v13173_v31 = vld [vmem:[#allocation3 + $0x150] sm:$0xff] }
 0x5b1   : > { %v5898_v63 = vsel %vm1640_vm11, %v5893_v21, %v5897_v59  ;;  %v5901_v53 = vor.u32 %v5899_v35, %v5897_v59  ;;  %v5746_v47 = vrot.slane %v5744_v3, 7  ;;  %v13165_v0 = vld [vmem:[#allocation3 + $0x140] sm:$0xff]  ;;  %v13177_v14 = vld [vmem:[#allocation3 + $0x158] sm:$0xff]  ;;  %v13185_v56 = vld [vmem:[#allocation3 + $0x168] sm:$0xff] }
 0x5b2   : > { %5944 = vst.msk [vmem:[#allocation3 + $0x190] sm:$0xff] %vm440_vm2, %v5898_v63  ;;  %v5909_v22 = vor.u32 %v5907_v24, %v5905_v10  ;;  %v13181_v4 = vld [vmem:[#allocation3 + $0x160] sm:$0xff]  ;;  %v10895_v42 = vld [vmem:[%s13660_s10 + $0x48] sm:$0xff]   ;;  %v6978_v34 = vld [vmem:[#allocation3 + $0x98] sm:$0xff] }
 0x5b3   : > { %v5906_v7 = vsel %vm1640_vm11, %v5901_v53, %v5905_v10  ;;  %v5749_v46 = vor.u32 %v5747_v62, %v5746_v47  ;;  %v10897_v21 = vld [vmem:[%s13660_s10 + $0x58] sm:$0xff]   ;;  %v13257_v59 = vld [vmem:[#allocation3 + $0xa0] sm:$0xff]  ;;  %v13261_v35 = vld [vmem:[#allocation3 + $0xa8] sm:$0xff] }
 0x5b4   : > { %5945 = vst.msk [vmem:[#allocation3 + $0x198] sm:$0xff] %vm440_vm2, %v5906_v7  ;;  %v5914_v30 = vsel %vm1640_vm11, %v5909_v22, %v5913_v48  ;;  %v13189_v43 = vld [vmem:[#allocation3 + $0x170] sm:$0xff]  ;;  %v10898_v32 = vld [vmem:[%s13660_s10 + $0x60] sm:$0xff]   ;;  %v7811_v24 = vld [vmem:[#allocation3 + $0xf8] sm:$0xff] }
 0x5b5   : > { %5946 = vst.msk [vmem:[#allocation3 + $0x1a0] sm:$0xff] %vm440_vm2, %v5914_v30  ;;  %v5750_v49 = vsel %vm1803_vm12, %v13015_v1, %v5749_v46  ;;  %v13125_v1 = vld [vmem:[#allocation3 + $0x58] sm:$0xff]  ;;  %v10896_v48 = vld [vmem:[%s13660_s10 + $0x50] sm:$0xff]   ;;  %v7812_v63 = vld [vmem:[#allocation3 + $0x100] sm:$0xff] }
 0x5b6   : > { %10033 = vmatmul.mubr.msk.bf16.gmra.mrb[40].mxu0 %vm440_vm2, %v13094_v28  ;;  %5782 = vst.msk [vmem:[#allocation3 + $0x80] sm:$0xff] %vm440_vm2, %v5750_v49  ;;  %v13193_v45 = vld [vmem:[#allocation3 + $0x178] sm:$0xff]  ;;  %v13197_v26 = vld [vmem:[#allocation3 + $0x180] sm:$0xff]  ;;  %v13268_v10 = vld [vmem:[#allocation3 + $0xb0] sm:$0xff] }
 0x5b7   : > { %10036 = vmatprep.mubr.msk.bf16.mxu0 %vm440_vm2, %v13099_v29  ;;  %v13201_v19 = vld [vmem:[#allocation3 + $0x188] sm:$0xff]  ;;  %v7810_v3 = vld [vmem:[#allocation3 + $0xf0] sm:$0xff]  ;;  %v7815_v47 = vld [vmem:[#allocation3 + $0x118] sm:$0xff] }
 0x5b8   : > { %v7813_v53 = vld [vmem:[#allocation3 + $0x108] sm:$0xff]  ;;  %v13430_v62 = vld [vmem:[%s13661_s11] ss:$0 sm:$0xff] }
 0x5b9   : > { %v13205_v9 = vld [vmem:[#allocation3 + $0x190] sm:$0xff] }
 0x5bb   : > { %v13209_v36 = vld [vmem:[#allocation3 + $0x198] sm:$0xff] }
 0x5be   : > { %10037 = vmatmul.mubr.msk.bf16.gmra.mrb[44].mxu0 %vm440_vm2, %v13109_v40 }
 0x5bf   : > { %10040 = vmatprep.mubr.msk.bf16.mxu0 %vm440_vm2, %v13113_v33 }
 0x5c6   : > { %10041 = vmatmul.mubr.msk.bf16.gmra.mrb[48].mxu0 %vm440_vm2, %v13117_v18 }
 0x5c7   : > { %10044 = vmatprep.mubr.msk.bf16.mxu0 %vm440_vm2, %v13121_v12 }
 0x5ce   : > { %10045 = vmatmul.mubr.msk.bf16.gmra.mrb[52].mxu0 %vm440_vm2, %v13125_v1 }
 0x5cf   : > { %10048 = vmatprep.mubr.msk.bf16.mxu0 %vm440_vm2, %v13129_v15 }
 0x5d6   : > { %10049 = vmatmul.mubr.msk.bf16.gmra.mrb[56].mxu0 %vm440_vm2, %v13133_v20 }
 0x5d7   : > { %10052 = vmatprep.mubr.msk.bf16.mxu0 %vm440_vm2, %v13137_v2 }
 0x5de   : > { %10053 = vmatmul.mubr.msk.bf16.gmra.mrb[60].mxu0 %vm440_vm2, %v13141_v38 }
 0x5df   : > { %10060 = vmatprep.mubr.msk.bf16.mxu0 %vm440_vm2, %v6430_v23 }
 0x5e6   : > { %10061 = vmatmul.mubr.msk.bf16.vlgmr.msra.gmra.mrb[32].mxu0 %vm440_vm2, %v13149_v44 }
 0x5e7   : > { %10093 = vmatpush3.bf16.msra.mxu0 %v13051_v57  ;;  %10064 = vmatprep.mubr.msk.bf16.mxu0 %vm440_vm2, %v13153_v52  ;;  %v13169_v57 = vld [vmem:[#allocation3 + $0x148] sm:$0xff] }
 0x5e8   : > { %10094 = vmatprep.subr.bf16.mxu0 %v10893_v51 }
 0x5eb   : > { %10095 = vmatpush3.bf16.msra.mxu0 %v10893_v51 }
 0x5ec   : > { %10128 = vmatprep.subr.bf16.mxu0 %v10894_v13 }
 0x5ee   : > { %10065 = vmatmul.mubr.msk.bf16.gmra.mrb[36].mxu0 %vm440_vm2, %v13161_v41 }
 0x5ef   : > { %10068 = vmatprep.mubr.msk.bf16.mxu0 %vm440_vm2, %v13165_v0 }
 0x5f6   : > { %10069 = vmatmul.mubr.msk.bf16.gmra.mrb[40].mxu0 %vm440_vm2, %v13169_v57 }
 0x5f7   : > { %10072 = vmatprep.mubr.msk.bf16.mxu0 %vm440_vm2, %v13173_v31 }
 0x5fe   : > { %10073 = vmatmul.mubr.msk.bf16.gmra.mrb[44].mxu0 %vm440_vm2, %v13177_v14 }
 0x5ff   : > { %10076 = vmatprep.mubr.msk.bf16.mxu0 %vm440_vm2, %v13181_v4 }
 0x606   : > { %10077 = vmatmul.mubr.msk.bf16.gmra.mrb[48].mxu0 %vm440_vm2, %v13185_v56 }
 0x607   : > { %10080 = vmatprep.mubr.msk.bf16.mxu0 %vm440_vm2, %v13189_v43 }
 0x60e   : > { %10081 = vmatmul.mubr.msk.bf16.gmra.mrb[52].mxu0 %vm440_vm2, %v13193_v45 }
 0x60f   : > { %10084 = vmatprep.mubr.msk.bf16.mxu0 %vm440_vm2, %v13197_v26 }
 0x616   : > { %10085 = vmatmul.mubr.msk.bf16.gmra.mrb[56].mxu0 %vm440_vm2, %v13201_v19 }
 0x617   : > { %10088 = vmatprep.mubr.msk.bf16.mxu0 %vm440_vm2, %v13205_v9 }
 0x61e   : > { %10089 = vmatmul.mubr.msk.bf16.gmra.mrb[60].mxu0 %vm440_vm2, %v13209_v36 }
 0x61f   : > { %10096 = vmatprep.mubr.msk.bf16.mxu0 %vm440_vm2, %v13028_v50  ;;  %v13249_v50 = vld [vmem:[#allocation3 + $0x80] sm:$0xff] }
 0x626   : > { %10097 = vmatmul.mubr.msk.bf16.vlgmr.msra.gmra.mrb[32].mxu0 %vm440_vm2, %v13034_v16 }
 0x627   : > { %10129 = vmatpush3.bf16.msra.mxu0 %v10894_v13  ;;  %10100 = vmatprep.mubr.msk.bf16.mxu0 %vm440_vm2, %v13068_v27 }
 0x628   : > { %10130 = vmatprep.subr.bf16.mxu0 %v10895_v42 }
 0x62b   : > { %10131 = vmatpush3.bf16.msra.mxu0 %v10895_v42 }
 0x62c   : > { %10164 = vmatprep.subr.bf16.mxu0 %v10896_v48 }
 0x62e   : > { %10101 = vmatmul.mubr.msk.bf16.gmra.mrb[36].mxu0 %vm440_vm2, %v13075_v39 }
 0x62f   : > { %10104 = vmatprep.mubr.msk.bf16.mxu0 %vm440_vm2, %v13094_v28 }
 0x636   : > { %10105 = vmatmul.mubr.msk.bf16.gmra.mrb[40].mxu0 %vm440_vm2, %v13099_v29 }
 0x637   : > { %10108 = vmatprep.mubr.msk.bf16.mxu0 %vm440_vm2, %v13109_v40 }
 0x63e   : > { %10109 = vmatmul.mubr.msk.bf16.gmra.mrb[44].mxu0 %vm440_vm2, %v13113_v33 }
 0x63f   : > { %10112 = vmatprep.mubr.msk.bf16.mxu0 %vm440_vm2, %v13117_v18 }
 0x646   : > { %10113 = vmatmul.mubr.msk.bf16.gmra.mrb[48].mxu0 %vm440_vm2, %v13121_v12 }
 0x647   : > { %10116 = vmatprep.mubr.msk.bf16.mxu0 %vm440_vm2, %v13125_v1 }
 0x64e   : > { %10117 = vmatmul.mubr.msk.bf16.gmra.mrb[52].mxu0 %vm440_vm2, %v13129_v15 }
 0x64f   : > { %10120 = vmatprep.mubr.msk.bf16.mxu0 %vm440_vm2, %v13133_v20 }
 0x656   : > { %10121 = vmatmul.mubr.msk.bf16.gmra.mrb[56].mxu0 %vm440_vm2, %v13137_v2 }
 0x657   : > { %10124 = vmatprep.mubr.msk.bf16.mxu0 %vm440_vm2, %v13141_v38 }
 0x65e   : > { %10125 = vmatmul.mubr.msk.bf16.gmra.mrb[60].mxu0 %vm440_vm2, %v13249_v50 }
 0x65f   : > { %10132 = vmatprep.mubr.msk.bf16.mxu0 %vm440_vm2, %v6978_v34 }
 0x666   : > { %10133 = vmatmul.mubr.msk.bf16.vlgmr.msra.gmra.mrb[32].mxu0 %vm440_vm2, %v13257_v59 }
 0x667   : > { %10165 = vmatpush3.bf16.msra.mxu0 %v10896_v48  ;;  %10136 = vmatprep.mubr.msk.bf16.mxu0 %vm440_vm2, %v13261_v35 }
 0x668   : > { %10166 = vmatprep.subr.bf16.mxu0 %v10897_v21 }
 0x66b   : > { %10167 = vmatpush3.bf16.msra.mxu0 %v10897_v21 }
 0x66c   : > { %10200 = vmatprep.subr.bf16.mxu0 %v10898_v32 }
 0x66e   : > { %10137 = vmatmul.mubr.msk.bf16.gmra.mrb[36].mxu0 %vm440_vm2, %v13268_v10 }
 0x66f   : > { %10140 = vmatprep.mubr.msk.bf16.mxu0 %vm440_vm2, %v12863_v17  ;;  %v10900_v17 = vld [vmem:[%s13660_s10 + $0x70] sm:$0xff]  }
 0x676   : > { %10141 = vmatmul.mubr.msk.bf16.gmra.mrb[40].mxu0 %vm440_vm2, %v12858_v58  ;;  %v10899_v58 = vld [vmem:[%s13660_s10 + $0x68] sm:$0xff]  }
 0x677   : > { %10144 = vmatprep.mubr.msk.bf16.mxu0 %vm440_vm2, %v12889_v37  ;;  %v13332_v37 = vld [vmem:[#allocation3 + $0x1a0] sm:$0xff] }
 0x67e   : > { %10145 = vmatmul.mubr.msk.bf16.gmra.mrb[44].mxu0 %vm440_vm2, %v12897_v61  ;;  %v10901_v61 = vld [vmem:[%s13660_s10 + $0x78] sm:$0xff]  }
 0x67f   : > { %10148 = vmatprep.mubr.msk.bf16.mxu0 %vm440_vm2, %v12919_v54  ;;  %v10902_v54 = vld [vmem:[%s13660_s10 + $0x80] sm:$0xff]  }
 0x686   : > { %10149 = vmatmul.mubr.msk.bf16.gmra.mrb[48].mxu0 %vm440_vm2, %v12925_v60  ;;  %v7541_v60 = vld [vmem:[#allocation3 + $0x88] sm:$0xff] }
 0x687   : > { %10152 = vmatprep.mubr.msk.bf16.mxu0 %vm440_vm2, %v12942_v25  ;;  %v10903_v25 = vld [vmem:[%s13660_s10 + $0x88] sm:$0xff]  }
 0x68e   : > { %10153 = vmatmul.mubr.msk.bf16.gmra.mrb[52].mxu0 %vm440_vm2, %v12949_v8  ;;  %v7803_v8 = vld [vmem:[#allocation3 + $0xb8] sm:$0xff] }
 0x68f   : > { %10156 = vmatprep.mubr.msk.bf16.mxu0 %vm440_vm2, %v12968_v6  ;;  %v7805_v6 = vld [vmem:[#allocation3 + $0xc8] sm:$0xff] }
 0x696   : > { %10157 = vmatmul.mubr.msk.bf16.gmra.mrb[56].mxu0 %vm440_vm2, %v12963_v55  ;;  %v7804_v55 = vld [vmem:[#allocation3 + $0xc0] sm:$0xff] }
 0x697   : > { %10160 = vmatprep.mubr.msk.bf16.mxu0 %vm440_vm2, %v12996_v11  ;;  %v7806_v11 = vld [vmem:[#allocation3 + $0xd0] sm:$0xff] }
 0x69e   : > { %10161 = vmatmul.mubr.msk.bf16.gmra.mrb[60].mxu0 %vm440_vm2, %v13064_v5 }
 0x69f   : > { %10168 = vmatprep.mubr.msk.bf16.mxu0 %vm440_vm2, %v13149_v44 }
 0x6a6   : > { %10169 = vmatmul.mubr.msk.bf16.vlgmr.msra.gmra.mrb[32].mxu0 %vm440_vm2, %v13153_v52 }
 0x6a7   : > { %10201 = vmatpush3.bf16.msra.mxu0 %v10898_v32  ;;  %10172 = vmatprep.mubr.msk.bf16.mxu0 %vm440_vm2, %v13161_v41 }
 0x6a8   : > { %10202 = vmatprep.subr.bf16.mxu0 %v10899_v58 }
 0x6ab   : > { %10203 = vmatpush3.bf16.msra.mxu0 %v10899_v58 }
 0x6ac   : > { %10236 = vmatprep.subr.bf16.mxu0 %v10900_v17 }
 0x6ae   : > { %10173 = vmatmul.mubr.msk.bf16.gmra.mrb[36].mxu0 %vm440_vm2, %v13165_v0 }
 0x6af   : > { %10176 = vmatprep.mubr.msk.bf16.mxu0 %vm440_vm2, %v13169_v57 }
 0x6b6   : > { %10177 = vmatmul.mubr.msk.bf16.gmra.mrb[40].mxu0 %vm440_vm2, %v13173_v31 }
 0x6b7   : > { %10180 = vmatprep.mubr.msk.bf16.mxu0 %vm440_vm2, %v13177_v14 }
 0x6be   : > { %10181 = vmatmul.mubr.msk.bf16.gmra.mrb[44].mxu0 %vm440_vm2, %v13181_v4 }
 0x6bf   : > { %10184 = vmatprep.mubr.msk.bf16.mxu0 %vm440_vm2, %v13185_v56 }
 0x6c6   : > { %10185 = vmatmul.mubr.msk.bf16.gmra.mrb[48].mxu0 %vm440_vm2, %v13189_v43 }
 0x6c7   : > { %10188 = vmatprep.mubr.msk.bf16.mxu0 %vm440_vm2, %v13193_v45 }
 0x6ce   : > { %10189 = vmatmul.mubr.msk.bf16.gmra.mrb[52].mxu0 %vm440_vm2, %v13197_v26 }
 0x6cf   : > { %10192 = vmatprep.mubr.msk.bf16.mxu0 %vm440_vm2, %v13201_v19 }
 0x6d6   : > { %10193 = vmatmul.mubr.msk.bf16.gmra.mrb[56].mxu0 %vm440_vm2, %v13205_v9 }
 0x6d7   : > { %10196 = vmatprep.mubr.msk.bf16.mxu0 %vm440_vm2, %v13209_v36 }
 0x6de   : > { %10197 = vmatmul.mubr.msk.bf16.gmra.mrb[60].mxu0 %vm440_vm2, %v13332_v37 }
 0x6df   : > { %10204 = vmatprep.mubr.msk.bf16.mxu0 %vm440_vm2, %v13034_v16  ;;  %v7807_v16 = vld [vmem:[#allocation3 + $0xd8] sm:$0xff] }
 0x6e6   : > { %10205 = vmatmul.mubr.msk.bf16.vlgmr.msra.gmra.mrb[32].mxu0 %vm440_vm2, %v13068_v27  ;;  %v7808_v27 = vld [vmem:[#allocation3 + $0xe0] sm:$0xff] }
 0x6e7   : > { %10237 = vmatpush3.bf16.msra.mxu0 %v10900_v17  ;;  %10208 = vmatprep.mubr.msk.bf16.mxu0 %vm440_vm2, %v13075_v39  ;;  %v7809_v39 = vld [vmem:[#allocation3 + $0xe8] sm:$0xff] }
 0x6e8   : > { %10238 = vmatprep.subr.bf16.mxu0 %v10901_v61 }
 0x6eb   : > { %10239 = vmatpush3.bf16.msra.mxu0 %v10901_v61 }
 0x6ec   : > { %10272 = vmatprep.subr.bf16.mxu0 %v10902_v54 }
 0x6ee   : > { %10209 = vmatmul.mubr.msk.bf16.gmra.mrb[36].mxu0 %vm440_vm2, %v13094_v28  ;;  %v13435_v28 = vld [vmem:[%s13662_s12] ss:$0 sm:$0xff] }
 0x6ef   : > { %10212 = vmatprep.mubr.msk.bf16.mxu0 %vm440_vm2, %v13099_v29 }
 0x6f6   : > { %10213 = vmatmul.mubr.msk.bf16.gmra.mrb[40].mxu0 %vm440_vm2, %v13109_v40 }
 0x6f7   : > { %10216 = vmatprep.mubr.msk.bf16.mxu0 %vm440_vm2, %v13113_v33 }
 0x6fe   : > { %10217 = vmatmul.mubr.msk.bf16.gmra.mrb[44].mxu0 %vm440_vm2, %v13117_v18 }
 0x6ff   : > { %10220 = vmatprep.mubr.msk.bf16.mxu0 %vm440_vm2, %v13121_v12 }
 0x706   : > { %10221 = vmatmul.mubr.msk.bf16.gmra.mrb[48].mxu0 %vm440_vm2, %v13125_v1 }
 0x707   : > { %10224 = vmatprep.mubr.msk.bf16.mxu0 %vm440_vm2, %v13129_v15 }
 0x70e   : > { %10225 = vmatmul.mubr.msk.bf16.gmra.mrb[52].mxu0 %vm440_vm2, %v13133_v20 }
 0x70f   : > { %10228 = vmatprep.mubr.msk.bf16.mxu0 %vm440_vm2, %v13137_v2 }
 0x716   : > { %10229 = vmatmul.mubr.msk.bf16.gmra.mrb[56].mxu0 %vm440_vm2, %v13141_v38 }
 0x717   : > { %10232 = vmatprep.mubr.msk.bf16.mxu0 %vm440_vm2, %v13249_v50 }
 0x71e   : > { %10233 = vmatmul.mubr.msk.bf16.gmra.mrb[60].mxu0 %vm440_vm2, %v7541_v60 }
 0x71f   : > { %10240 = vmatprep.mubr.msk.bf16.mxu0 %vm440_vm2, %v13257_v59 }
 0x726   : > { %10241 = vmatmul.mubr.msk.bf16.vlgmr.msra.gmra.mrb[32].mxu0 %vm440_vm2, %v13261_v35 }
 0x727   : > { %10273 = vmatpush3.bf16.msra.mxu0 %v10902_v54  ;;  %10244 = vmatprep.mubr.msk.bf16.mxu0 %vm440_vm2, %v13268_v10 }
 0x728   : > { %10274 = vmatprep.subr.bf16.mxu0 %v10903_v25 }
 0x72b   : > { %10275 = vmatpush3.bf16.msra.mxu0 %v10903_v25 }
 0x72e   : > { %10245 = vmatmul.mubr.msk.bf16.gmra.mrb[36].mxu0 %vm440_vm2, %v7803_v8 }
 0x72f   : > { %10248 = vmatprep.mubr.msk.bf16.mxu0 %vm440_vm2, %v7804_v55 }
 0x736   : > { %10249 = vmatmul.mubr.msk.bf16.gmra.mrb[40].mxu0 %vm440_vm2, %v7805_v6 }
 0x737   : > { %10252 = vmatprep.mubr.msk.bf16.mxu0 %vm440_vm2, %v7806_v11 }
 0x73e   : > { %10253 = vmatmul.mubr.msk.bf16.gmra.mrb[44].mxu0 %vm440_vm2, %v7807_v16 }
 0x73f   : > { %10256 = vmatprep.mubr.msk.bf16.mxu0 %vm440_vm2, %v7808_v27 }
 0x746   : > { %10257 = vmatmul.mubr.msk.bf16.gmra.mrb[48].mxu0 %vm440_vm2, %v7809_v39 }
 0x747   : > { %10260 = vmatprep.mubr.msk.bf16.mxu0 %vm440_vm2, %v7810_v3 }
 0x74e   : > { %10261 = vmatmul.mubr.msk.bf16.gmra.mrb[52].mxu0 %vm440_vm2, %v7811_v24 }
 0x74f   : > { %10264 = vmatprep.mubr.msk.bf16.mxu0 %vm440_vm2, %v7812_v63 }
 0x756   : > { %10265 = vmatmul.mubr.msk.bf16.gmra.mrb[56].mxu0 %vm440_vm2, %v7813_v53 }
 0x757   : > { %10268 = vmatprep.mubr.msk.bf16.mxu0 %vm440_vm2, %v13064_v5  ;;  %v8089_v5 = vld [vmem:[#allocation3 + $0x1a8] sm:$0xff] }
 0x75e   : > { %10269 = vmatmul.mubr.msk.bf16.gmra.mrb[60].mxu0 %vm440_vm2, %v7815_v47 }
 0x75f   : > { %10276 = vmatprep.mubr.msk.bf16.mxu0 %vm440_vm2, %v13153_v52 }
 0x766   : > { %10277 = vmatmul.mubr.msk.bf16.vlgmr.msra.gmra.mrb[32].mxu0 %vm440_vm2, %v13161_v41 }
 0x767   : > { %10280 = vmatprep.mubr.msk.bf16.mxu0 %vm440_vm2, %v13165_v0 }
 0x76e   : > { %10281 = vmatmul.mubr.msk.bf16.gmra.mrb[36].mxu0 %vm440_vm2, %v13169_v57 }
 0x76f   : > { %10284 = vmatprep.mubr.msk.bf16.mxu0 %vm440_vm2, %v13173_v31 }
 0x776   : > { %10285 = vmatmul.mubr.msk.bf16.gmra.mrb[40].mxu0 %vm440_vm2, %v13177_v14 }
 0x777   : > { %10288 = vmatprep.mubr.msk.bf16.mxu0 %vm440_vm2, %v13181_v4 }
 0x77e   : > { %10289 = vmatmul.mubr.msk.bf16.gmra.mrb[44].mxu0 %vm440_vm2, %v13185_v56 }
 0x77f   : > { %10292 = vmatprep.mubr.msk.bf16.mxu0 %vm440_vm2, %v13189_v43 }
 0x786   : > { %10293 = vmatmul.mubr.msk.bf16.gmra.mrb[48].mxu0 %vm440_vm2, %v13193_v45 }
 0x787   : > { %10296 = vmatprep.mubr.msk.bf16.mxu0 %vm440_vm2, %v13197_v26 }
 0x78e   : > { %10297 = vmatmul.mubr.msk.bf16.gmra.mrb[52].mxu0 %vm440_vm2, %v13201_v19 }
 0x78f   : > { %10300 = vmatprep.mubr.msk.bf16.mxu0 %vm440_vm2, %v13205_v9 }
 0x796   : > { %10301 = vmatmul.mubr.msk.bf16.gmra.mrb[56].mxu0 %vm440_vm2, %v13209_v36 }
 0x797   : > { %10304 = vmatprep.mubr.msk.bf16.mxu0 %vm440_vm2, %v13332_v37 }
 0x79e   : > { %10305 = vmatmul.mubr.msk.bf16.gmra.mrb[60].mxu0 %vm440_vm2, %v8089_v5 }
 0x839   : > { %v10278_v22 = vpop.f32.mrb[32].mxu0 }
 0x83a   : > { %v8357_v7 = vmul.f32 %v10278_v22, %v13430_v62  ;;  %v8189_v29 = vpop.f32.mrb[33].mxu0 }
 0x83b   : > { %v8355_v46 = vmul.f32 %v13430_v62, %v8189_v29  ;;  %v10279_v30 = vpop.f32.mrb[34].mxu0 }
 0x83c   : > { %v8396_v49 = vadd.f32 %v13435_v28, %v8357_v7  ;;  %v8358_v40 = vmul.f32 %v10279_v30, %v13430_v62  ;;  %v8192_v33 = vpop.f32.mrb[35].mxu0 }
 0x83d   : > { %v8394_v18 = vadd.f32 %v13435_v28, %v8355_v46  ;;  %v8356_v12 = vmul.f32 %v13430_v62, %v8192_v33 }
 0x83e   : > { %v8397_v1 = vadd.f32 %v13435_v28, %v8358_v40  ;;  %vm8428_vm2 = vcmp.gt.f32.partialorder %v8396_v49, 0.0  ;;  %v8460_v15 = vmul.f32 0.01, %v8396_v49 }
 0x83f   : > { %v8395_v20 = vadd.f32 %v13435_v28, %v8356_v12  ;;  %v8458_v38 = vmul.f32 0.01, %v8394_v18  ;;  %vm8426_vm12 = vcmp.gt.f32.partialorder %v8394_v18, 0.0 }
 0x840   : > { %v8492_v2 = vsel %vm8428_vm2, %v8396_v49, %v8460_v15  ;;  %vm8429_vm11 = vcmp.gt.f32.partialorder %v8397_v1, 0.0  ;;  %v8461_v23 = vmul.f32 0.01, %v8397_v1 }
 0x841   : > { %8558 = vrot.lane.b32.xlu0 %v8492_v2, %s10973_s24  ;;  %v10282_v51 = vpop.f32.mrb[36].mxu0  ;;  %v8459_v41 = vmul.f32 0.01, %v8395_v20  ;;  %vm8427_vm5 = vcmp.gt.f32.partialorder %v8395_v20, 0.0  ;;  %v8490_v56 = vsel %vm8426_vm12, %v8394_v18, %v8458_v38 }
 0x842   : > { %v8361_v44 = vmul.f32 %v10282_v51, %v13430_v62  ;;  %v8205_v52 = vpop.f32.mrb[37].mxu0  ;;  %v8493_v13 = vsel %vm8429_vm11, %v8397_v1, %v8461_v23 }
 0x843   : > { %v8359_v0 = vmul.f32 %v13430_v62, %v8205_v52  ;;  %8560 = vrot.lane.b32.xlu1 %v8493_v13, %s10973_s24  ;;  %v10283_v57 = vpop.f32.mrb[38].mxu0  ;;  %v8491_v19 = vsel %vm8427_vm5, %v8395_v20, %v8459_v41 }
 0x844   : > { %v8400_v31 = vadd.f32 %v13435_v28, %v8361_v44  ;;  %v8362_v14 = vmul.f32 %v10283_v57, %v13430_v62  ;;  %v8208_v4 = vpop.f32.mrb[39].mxu0 }
 0x845   : > { %v8398_v43 = vadd.f32 %v13435_v28, %v8359_v0  ;;  %v8360_v45 = vmul.f32 %v13430_v62, %v8208_v4  ;;  %8554 = vrot.lane.b32.xlu0 %v8490_v56, %s10973_s24 }
 0x846   : > { %v8401_v26 = vadd.f32 %v13435_v28, %v8362_v14  ;;  %vm8432_vm6 = vcmp.gt.f32.partialorder %v8400_v31, 0.0  ;;  %v8464_v9 = vmul.f32 0.01, %v8400_v31 }
 0x847   : > { %v8399_v36 = vadd.f32 %v13435_v28, %v8360_v45  ;;  %8556 = vrot.lane.b32.xlu1 %v8491_v19, %s10973_s24  ;;  %v8462_v50 = vmul.f32 0.01, %v8398_v43  ;;  %vm8430_vm8 = vcmp.gt.f32.partialorder %v8398_v43, 0.0 }
 0x848   : > { %v8496_v42 = vsel %vm8432_vm6, %v8400_v31, %v8464_v9  ;;  %vm8433_vm7 = vcmp.gt.f32.partialorder %v8401_v26, 0.0  ;;  %v8465_v48 = vmul.f32 0.01, %v8401_v26 }
 0x849   : > { %8566 = vrot.lane.b32.xlu0 %v8496_v42, %s10973_s24  ;;  %v10286_v34 = vpop.f32.mrb[40].mxu0  ;;  %v8463_v32 = vmul.f32 0.01, %v8399_v36  ;;  %vm8431_vm9 = vcmp.gt.f32.partialorder %v8399_v36, 0.0  ;;  %v8494_v54 = vsel %vm8430_vm8, %v8398_v43, %v8462_v50 }
 0x84a   : > { %v8365_v21 = vmul.f32 %v10286_v34, %v13430_v62  ;;  %v8221_v59 = vpop.f32.mrb[41].mxu0  ;;  %v8497_v35 = vsel %vm8433_vm7, %v8401_v26, %v8465_v48 }
 0x84b   : > { %v8363_v10 = vmul.f32 %v13430_v62, %v8221_v59  ;;  %8568 = vrot.lane.b32.xlu1 %v8497_v35, %s10973_s24  ;;  %v10287_v58 = vpop.f32.mrb[42].mxu0  ;;  %v8495_v55 = vsel %vm8431_vm9, %v8399_v36, %v8463_v32 }
 0x84c   : > { %v8404_v17 = vadd.f32 %v13435_v28, %v8365_v21  ;;  %v8366_v37 = vmul.f32 %v10287_v58, %v13430_v62  ;;  %v8224_v61 = vpop.f32.mrb[43].mxu0 }
 0x84d   : > { %v8402_v60 = vadd.f32 %v13435_v28, %v8363_v10  ;;  %v8364_v25 = vmul.f32 %v13430_v62, %v8224_v61  ;;  %8562 = vrot.lane.b32.xlu0 %v8494_v54, %s10973_s24 }
 0x84e   : > { %v8405_v8 = vadd.f32 %v13435_v28, %v8366_v37  ;;  %vm8436_vm10 = vcmp.gt.f32.partialorder %v8404_v17, 0.0  ;;  %v8468_v6 = vmul.f32 0.01, %v8404_v17 }
 0x84f   : > { %v8403_v11 = vadd.f32 %v13435_v28, %v8364_v25  ;;  %8564 = vrot.lane.b32.xlu1 %v8495_v55, %s10973_s24  ;;  %v8466_v39 = vmul.f32 0.01, %v8402_v60  ;;  %vm8434_vm14 = vcmp.gt.f32.partialorder %v8402_v60, 0.0 }
 0x850   : > { %v8500_v16 = vsel %vm8436_vm10, %v8404_v17, %v8468_v6  ;;  %vm8437_vm13 = vcmp.gt.f32.partialorder %v8405_v8, 0.0  ;;  %v8469_v27 = vmul.f32 0.01, %v8405_v8 }
 0x851   : > { %8574 = vrot.lane.b32.xlu0 %v8500_v16, %s10973_s24  ;;  %v10290_v3 = vpop.f32.mrb[44].mxu0  ;;  %v8467_v47 = vmul.f32 0.01, %v8403_v11  ;;  %vm8435_vm15 = vcmp.gt.f32.partialorder %v8403_v11, 0.0  ;;  %v8498_v30 = vsel %vm8434_vm14, %v8402_v60, %v8466_v39 }
 0x852   : > { %v8369_v24 = vmul.f32 %v10290_v3, %v13430_v62  ;;  %v8237_v63 = vpop.f32.mrb[45].mxu0  ;;  %v8501_v53 = vsel %vm8437_vm13, %v8405_v8, %v8469_v27 }
 0x853   : > { %v8367_v5 = vmul.f32 %v13430_v62, %v8237_v63  ;;  %8576 = vrot.lane.b32.xlu1 %v8501_v53, %s10973_s24  ;;  %v10291_v22 = vpop.f32.mrb[46].mxu0  ;;  %v8499_v18 = vsel %vm8435_vm15, %v8403_v11, %v8467_v47 }
 0x854   : > { %v8408_v7 = vadd.f32 %v13435_v28, %v8369_v24  ;;  %v8370_v29 = vmul.f32 %v10291_v22, %v13430_v62  ;;  %v8240_v46 = vpop.f32.mrb[47].mxu0 }
 0x855   : > { %v8406_v49 = vadd.f32 %v13435_v28, %v8367_v5  ;;  %v8368_v40 = vmul.f32 %v13430_v62, %v8240_v46  ;;  %8570 = vrot.lane.b32.xlu0 %v8498_v30, %s10973_s24 }
 0x856   : > { %v8409_v33 = vadd.f32 %v13435_v28, %v8370_v29  ;;  %vm8440_vm0 = vcmp.gt.f32.partialorder %v8408_v7, 0.0  ;;  %v8472_v12 = vmul.f32 0.01, %v8408_v7 }
 0x857   : > { %v8407_v1 = vadd.f32 %v13435_v28, %v8368_v40  ;;  %8572 = vrot.lane.b32.xlu1 %v8499_v18, %s10973_s24  ;;  %v8470_v2 = vmul.f32 0.01, %v8406_v49  ;;  %vm8438_vm3 = vcmp.gt.f32.partialorder %v8406_v49, 0.0 }
 0x858   : > { %v8504_v15 = vsel %vm8440_vm0, %v8408_v7, %v8472_v12  ;;  %vm8441_vm1 = vcmp.gt.f32.partialorder %v8409_v33, 0.0  ;;  %v8473_v20 = vmul.f32 0.01, %v8409_v33 }
 0x859   : > { %8582 = vrot.lane.b32.xlu0 %v8504_v15, %s10973_s24  ;;  %v10294_v23 = vpop.f32.mrb[48].mxu0  ;;  %v8471_v52 = vmul.f32 0.01, %v8407_v1  ;;  %vm8439_vm4 = vcmp.gt.f32.partialorder %v8407_v1, 0.0  ;;  %v8502_v14 = vsel %vm8438_vm3, %v8406_v49, %v8470_v2 }
 0x85a   : > { %v8373_v38 = vmul.f32 %v10294_v23, %v13430_v62  ;;  %v8253_v51 = vpop.f32.mrb[49].mxu0  ;;  %v8505_v44 = vsel %vm8441_vm1, %v8409_v33, %v8473_v20 }
 0x85b   : > { %v8371_v13 = vmul.f32 %v13430_v62, %v8253_v51  ;;  %8584 = vrot.lane.b32.xlu1 %v8505_v44, %s10973_s24  ;;  %v10295_v41 = vpop.f32.mrb[50].mxu0  ;;  %v8503_v45 = vsel %vm8439_vm4, %v8407_v1, %v8471_v52 }
 0x85c   : > { %v8412_v0 = vadd.f32 %v13435_v28, %v8373_v38  ;;  %v8374_v57 = vmul.f32 %v10295_v41, %v13430_v62  ;;  %v8256_v31 = vpop.f32.mrb[51].mxu0 }
 0x85d   : > { %v8410_v4 = vadd.f32 %v13435_v28, %v8371_v13  ;;  %v8372_v56 = vmul.f32 %v13430_v62, %v8256_v31  ;;  %8578 = vrot.lane.b32.xlu0 %v8502_v14, %s10973_s24 }
 0x85e   : > { %v8413_v43 = vadd.f32 %v13435_v28, %v8374_v57  ;;  %vm8444_vm2 = vcmp.gt.f32.partialorder %v8412_v0, 0.0  ;;  %v8476_v26 = vmul.f32 0.01, %v8412_v0 }
 0x85f   : > { %v8411_v19 = vadd.f32 %v13435_v28, %v8372_v56  ;;  %8580 = vrot.lane.b32.xlu1 %v8503_v45, %s10973_s24  ;;  %v8474_v42 = vmul.f32 0.01, %v8410_v4  ;;  %vm8442_vm12 = vcmp.gt.f32.partialorder %v8410_v4, 0.0 }
 0x860   : > { %v8508_v9 = vsel %vm8444_vm2, %v8412_v0, %v8476_v26  ;;  %vm8445_vm11 = vcmp.gt.f32.partialorder %v8413_v43, 0.0  ;;  %v8477_v36 = vmul.f32 0.01, %v8413_v43  ;;  %vm8650_vm2 = vcmask 162912  }
 0x861   : > { %8590 = vrot.lane.b32.xlu0 %v8508_v9, %s10973_s24  ;;  %v10298_v48 = vpop.f32.mrb[52].mxu0  ;;  %v8475_v59 = vmul.f32 0.01, %v8411_v19  ;;  %vm8443_vm5 = vcmp.gt.f32.partialorder %v8411_v19, 0.0  ;;  %v8506_v37 = vsel %vm8442_vm12, %v8410_v4, %v8474_v42 }
 0x862   : > { %v8377_v50 = vmul.f32 %v10298_v48, %v13430_v62  ;;  %v8269_v34 = vpop.f32.mrb[53].mxu0  ;;  %v8509_v21 = vsel %vm8445_vm11, %v8413_v43, %v8477_v36 }
 0x863   : > { %v8375_v35 = vmul.f32 %v13430_v62, %v8269_v34  ;;  %8592 = vrot.lane.b32.xlu1 %v8509_v21, %s10973_s24  ;;  %v10299_v32 = vpop.f32.mrb[54].mxu0  ;;  %v8507_v25 = vsel %vm8443_vm5, %v8411_v19, %v8475_v59 }
 0x864   : > { %v8416_v10 = vadd.f32 %v13435_v28, %v8377_v50  ;;  %v8378_v58 = vmul.f32 %v10299_v32, %v13430_v62  ;;  %v8272_v17 = vpop.f32.mrb[55].mxu0 }
 0x865   : > { %v8414_v61 = vadd.f32 %v13435_v28, %v8375_v35  ;;  %v8376_v54 = vmul.f32 %v13430_v62, %v8272_v17  ;;  %8586 = vrot.lane.b32.xlu0 %v8506_v37, %s10973_s24 }
 0x866   : > { %v8417_v60 = vadd.f32 %v13435_v28, %v8378_v58  ;;  %vm8448_vm6 = vcmp.gt.f32.partialorder %v8416_v10, 0.0  ;;  %v8480_v8 = vmul.f32 0.01, %v8416_v10 }
 0x867   : > { %v8415_v55 = vadd.f32 %v13435_v28, %v8376_v54  ;;  %8588 = vrot.lane.b32.xlu1 %v8507_v25, %s10973_s24  ;;  %v8478_v16 = vmul.f32 0.01, %v8414_v61  ;;  %vm8446_vm8 = vcmp.gt.f32.partialorder %v8414_v61, 0.0 }
 0x868   : > { %v8512_v6 = vsel %vm8448_vm6, %v8416_v10, %v8480_v8  ;;  %vm8449_vm7 = vcmp.gt.f32.partialorder %v8417_v60, 0.0  ;;  %v8481_v11 = vmul.f32 0.01, %v8417_v60 }
 0x869   : > { %8598 = vrot.lane.b32.xlu0 %v8512_v6, %s10973_s24  ;;  %v10302_v27 = vpop.f32.mrb[56].mxu0  ;;  %v8479_v63 = vmul.f32 0.01, %v8415_v55  ;;  %vm8447_vm9 = vcmp.gt.f32.partialorder %v8415_v55, 0.0  ;;  %v8510_v29 = vsel %vm8446_vm8, %v8414_v61, %v8478_v16 }
 0x86a   : > { %v8381_v39 = vmul.f32 %v10302_v27, %v13430_v62  ;;  %v8285_v3 = vpop.f32.mrb[57].mxu0  ;;  %v8513_v24 = vsel %vm8449_vm7, %v8417_v60, %v8481_v11 }
 0x86b   : > { %v8379_v53 = vmul.f32 %v13430_v62, %v8285_v3  ;;  %8600 = vrot.lane.b32.xlu1 %v8513_v24, %s10973_s24  ;;  %v10303_v47 = vpop.f32.mrb[58].mxu0  ;;  %v8511_v40 = vsel %vm8447_vm9, %v8415_v55, %v8479_v63 }
 0x86c   : > { %v8420_v5 = vadd.f32 %v13435_v28, %v8381_v39  ;;  %v8382_v22 = vmul.f32 %v10303_v47, %v13430_v62  ;;  %v8288_v7 = vpop.f32.mrb[59].mxu0 }
 0x86d   : > { %v8418_v46 = vadd.f32 %v13435_v28, %v8379_v53  ;;  %v8380_v30 = vmul.f32 %v13430_v62, %v8288_v7  ;;  %8594 = vrot.lane.b32.xlu0 %v8510_v29, %s10973_s24 }
 0x86e   : > { %v8421_v49 = vadd.f32 %v13435_v28, %v8382_v22  ;;  %vm8452_vm10 = vcmp.gt.f32.partialorder %v8420_v5, 0.0  ;;  %v8484_v33 = vmul.f32 0.01, %v8420_v5 }
 0x86f   : > { %v8419_v18 = vadd.f32 %v13435_v28, %v8380_v30  ;;  %8596 = vrot.lane.b32.xlu1 %v8511_v40, %s10973_s24  ;;  %v8482_v15 = vmul.f32 0.01, %v8418_v46  ;;  %vm8450_vm14 = vcmp.gt.f32.partialorder %v8418_v46, 0.0 }
 0x870   : > { %v8516_v12 = vsel %vm8452_vm10, %v8420_v5, %v8484_v33  ;;  %vm8453_vm13 = vcmp.gt.f32.partialorder %v8421_v49, 0.0  ;;  %v8485_v1 = vmul.f32 0.01, %v8421_v49 }
 0x871   : > { %8606 = vrot.lane.b32.xlu0 %v8516_v12, %s10973_s24  ;;  %v10306_v20 = vpop.f32.mrb[60].mxu0  ;;  %v8483_v51 = vmul.f32 0.01, %v8419_v18  ;;  %vm8451_vm15 = vcmp.gt.f32.partialorder %v8419_v18, 0.0  ;;  %v8514_v0 = vsel %vm8450_vm14, %v8418_v46, %v8482_v15 }
 0x872   : > { %v8385_v2 = vmul.f32 %v10306_v20, %v13430_v62  ;;  %v8301_v23 = vpop.f32.mrb[61].mxu0  ;;  %v8517_v38 = vsel %vm8453_vm13, %v8421_v49, %v8485_v1 }
 0x873   : > { %v8383_v44 = vmul.f32 %v13430_v62, %v8301_v23  ;;  %8608 = vrot.lane.b32.xlu1 %v8517_v38, %s10973_s24  ;;  %v10307_v52 = vpop.f32.mrb[62].mxu0  ;;  %v8515_v4 = vsel %vm8451_vm15, %v8419_v18, %v8483_v51 }
 0x874   : > { %v8386_v13 = vmul.f32 %v10307_v52, %v13430_v62  ;;  %v8304_v41 = vpop.f32.mrb[63].mxu0  ;;  %v8424_v57 = vadd.f32 %v13435_v28, %v8385_v2 }
 0x875   : > { %v8422_v31 = vadd.f32 %v13435_v28, %v8383_v44  ;;  %v8384_v14 = vmul.f32 %v13430_v62, %v8304_v41  ;;  %8602 = vrot.lane.b32.xlu0 %v8514_v0, %s10973_s24 }
 0x876   : > { %v8425_v56 = vadd.f32 %v13435_v28, %v8386_v13  ;;  %v8488_v9 = vmul.f32 0.01, %v8424_v57  ;;  %vm8456_vm3 = vcmp.gt.f32.partialorder %v8424_v57, 0.0 }
 0x877   : > { %v8423_v43 = vadd.f32 %v13435_v28, %v8384_v14  ;;  %8604 = vrot.lane.b32.xlu1 %v8515_v4, %s10973_s24  ;;  %vm8454_vm0 = vcmp.gt.f32.partialorder %v8422_v31, 0.0  ;;  %v8486_v45 = vmul.f32 0.01, %v8422_v31 }
 0x878   : > { %v8489_v36 = vmul.f32 0.01, %v8425_v56  ;;  %vm8457_vm4 = vcmp.gt.f32.partialorder %v8425_v56, 0.0  ;;  %v8520_v28 = vsel %vm8456_vm3, %v8424_v57, %v8488_v9 }
 0x879   : > { %v8518_v26 = vsel %vm8454_vm0, %v8422_v31, %v8486_v45  ;;  %vm8455_vm1 = vcmp.gt.f32.partialorder %v8423_v43, 0.0  ;;  %v8487_v19 = vmul.f32 0.01, %v8423_v43 }
 0x87a   : > { %8610 = vrot.lane.b32.xlu0 %v8518_v26, %s10973_s24  ;;  %v8521_v42 = vsel %vm8457_vm4, %v8425_v56, %v8489_v36 }
 0x87b   : > { %v8519_v62 = vsel %vm8455_vm1, %v8423_v43, %v8487_v19 }
 0x87c   : > { %8612 = vrot.lane.b32.xlu1 %v8519_v62, %s10973_s24 }
 0x87e   : > { %8614 = vrot.lane.b32.xlu0 %v8520_v28, %s10973_s24 }
 0x880   : > { %8616 = vrot.lane.b32.xlu1 %v8521_v42, %s10973_s24  ;;  %s10904_s24 = scalar_lea.vmem %s13602_s30, 4096 }
 0x881   : > { %p10905_p11 = scmp.ne.s32.totalorder %s13602_s30, %s10904_s24  ;;  %p10912_p1 = scmp.lt.s32.totalorder %s10910_s22, %s10904_s24 }
 0x883   : > { %p10906_p12 = pnand %p10905_p11, %p11084_p5  ;;  %p10913_p2 = por %p10912_p1, %p10911_p0 }
 0x885   : > { %p10907_p13 = pneg %p10906_p12 }
 0x887   : > { %p10914_p3 = pnand %p10913_p2, %p10907_p13 }
 0x8b3   : > { %v8559_v48 = vpop.permute.xlu0 %8558 }
 0x8b4   : > { %8653 = vst.msk [vmem:[%s12485_s20 + $0x10] sm:$0xff] %vm8650_vm2, %v8559_v48 }
 0x8b5   : > { %v8561_v50 = vpop.permute.xlu1 %8560 }
 0x8b6   : > { %8654 = vst.msk [vmem:[%s12485_s20 + $0x18] sm:$0xff] %vm8650_vm2, %v8561_v50 }
 0x8b7   : > { %v8555_v34 = vpop.permute.xlu0 %8554 }
 0x8b8   : > { %8651 = vst.msk [vmem:[%s12485_s20] sm:$0xff] %vm8650_vm2, %v8555_v34 }
 0x8b9   : > { %v8557_v21 = vpop.permute.xlu1 %8556 }
 0x8ba   : > { %8652 = vst.msk [vmem:[%s12485_s20 + $0x8] sm:$0xff] %vm8650_vm2, %v8557_v21 }
 0x8bb   : > { %v8567_v59 = vpop.permute.xlu0 %8566 }
 0x8bc   : > { %8657 = vst.msk [vmem:[%s12485_s20 + $0x30] sm:$0xff] %vm8650_vm2, %v8567_v59 }
 0x8bd   : > { %v8569_v35 = vpop.permute.xlu1 %8568 }
 0x8be   : > { %8658 = vst.msk [vmem:[%s12485_s20 + $0x38] sm:$0xff] %vm8650_vm2, %v8569_v35 }
 0x8bf   : > { %v8563_v32 = vpop.permute.xlu0 %8562 }
 0x8c0   : > { %8655 = vst.msk [vmem:[%s12485_s20 + $0x20] sm:$0xff] %vm8650_vm2, %v8563_v32 }
 0x8c1   : > { %v8565_v10 = vpop.permute.xlu1 %8564 }
 0x8c2   : > { %8656 = vst.msk [vmem:[%s12485_s20 + $0x28] sm:$0xff] %vm8650_vm2, %v8565_v10 }
 0x8c3   : > { %v8575_v58 = vpop.permute.xlu0 %8574 }
 0x8c4   : > { %8661 = vst.msk [vmem:[%s12485_s20 + $0x50] sm:$0xff] %vm8650_vm2, %v8575_v58 }
 0x8c5   : > { %v8577_v17 = vpop.permute.xlu1 %8576 }
 0x8c6   : > { %8662 = vst.msk [vmem:[%s12485_s20 + $0x58] sm:$0xff] %vm8650_vm2, %v8577_v17 }
 0x8c7   : > { %v8571_v37 = vpop.permute.xlu0 %8570 }
 0x8c8   : > { %8659 = vst.msk [vmem:[%s12485_s20 + $0x40] sm:$0xff] %vm8650_vm2, %v8571_v37 }
 0x8c9   : > { %v8573_v61 = vpop.permute.xlu1 %8572 }
 0x8ca   : > { %8660 = vst.msk [vmem:[%s12485_s20 + $0x48] sm:$0xff] %vm8650_vm2, %v8573_v61 }
 0x8cb   : > { %v8583_v54 = vpop.permute.xlu0 %8582 }
 0x8cc   : > { %8665 = vst.msk [vmem:[%s12485_s20 + $0x70] sm:$0xff] %vm8650_vm2, %v8583_v54 }
 0x8cd   : > { %v8585_v60 = vpop.permute.xlu1 %8584 }
 0x8ce   : > { %8666 = vst.msk [vmem:[%s12485_s20 + $0x78] sm:$0xff] %vm8650_vm2, %v8585_v60 }
 0x8cf   : > { %v8579_v25 = vpop.permute.xlu0 %8578 }
 0x8d0   : > { %8663 = vst.msk [vmem:[%s12485_s20 + $0x60] sm:$0xff] %vm8650_vm2, %v8579_v25 }
 0x8d1   : > { %v8581_v8 = vpop.permute.xlu1 %8580 }
 0x8d2   : > { %8664 = vst.msk [vmem:[%s12485_s20 + $0x68] sm:$0xff] %vm8650_vm2, %v8581_v8 }
 0x8d3   : > { %v8591_v55 = vpop.permute.xlu0 %8590 }
 0x8d4   : > { %8669 = vst.msk [vmem:[%s12485_s20 + $0x90] sm:$0xff] %vm8650_vm2, %v8591_v55 }
 0x8d5   : > { %v8593_v6 = vpop.permute.xlu1 %8592 }
 0x8d6   : > { %8670 = vst.msk [vmem:[%s12485_s20 + $0x98] sm:$0xff] %vm8650_vm2, %v8593_v6 }
 0x8d7   : > { %v8587_v11 = vpop.permute.xlu0 %8586 }
 0x8d8   : > { %8667 = vst.msk [vmem:[%s12485_s20 + $0x80] sm:$0xff] %vm8650_vm2, %v8587_v11 }
 0x8d9   : > { %v8589_v16 = vpop.permute.xlu1 %8588 }
 0x8da   : > { %8668 = vst.msk [vmem:[%s12485_s20 + $0x88] sm:$0xff] %vm8650_vm2, %v8589_v16 }
 0x8db   : > { %v8599_v27 = vpop.permute.xlu0 %8598 }
 0x8dc   : > { %8673 = vst.msk [vmem:[%s12485_s20 + $0xb0] sm:$0xff] %vm8650_vm2, %v8599_v27 }
 0x8dd   : > { %v8601_v39 = vpop.permute.xlu1 %8600 }
 0x8de   : > { %8674 = vst.msk [vmem:[%s12485_s20 + $0xb8] sm:$0xff] %vm8650_vm2, %v8601_v39 }
 0x8df   : > { %v8595_v3 = vpop.permute.xlu0 %8594 }
 0x8e0   : > { %8671 = vst.msk [vmem:[%s12485_s20 + $0xa0] sm:$0xff] %vm8650_vm2, %v8595_v3 }
 0x8e1   : > { %v8597_v24 = vpop.permute.xlu1 %8596 }
 0x8e2   : > { %8672 = vst.msk [vmem:[%s12485_s20 + $0xa8] sm:$0xff] %vm8650_vm2, %v8597_v24 }
 0x8e3   : > { %v8607_v63 = vpop.permute.xlu0 %8606 }
 0x8e4   : > { %8677 = vst.msk [vmem:[%s12485_s20 + $0xd0] sm:$0xff] %vm8650_vm2, %v8607_v63 }
 0x8e5   : > { %v8609_v53 = vpop.permute.xlu1 %8608 }
 0x8e6   : > { %8678 = vst.msk [vmem:[%s12485_s20 + $0xd8] sm:$0xff] %vm8650_vm2, %v8609_v53 }
 0x8e7   : > { %v8603_v47 = vpop.permute.xlu0 %8602 }
 0x8e8   : > { %8675 = vst.msk [vmem:[%s12485_s20 + $0xc0] sm:$0xff] %vm8650_vm2, %v8603_v47 }
 0x8e9   : > { %v8605_v5 = vpop.permute.xlu1 %8604 }
 0x8ea   : > { %8676 = vst.msk [vmem:[%s12485_s20 + $0xc8] sm:$0xff] %vm8650_vm2, %v8605_v5 }
 0x8ec   : > { %v8611_v22 = vpop.permute.xlu0 %8610 }
 0x8ed   : > { %8679 = vst.msk [vmem:[%s12485_s20 + $0xe0] sm:$0xff] %vm8650_vm2, %v8611_v22 }
 0x8ee   : > { %v8613_v7 = vpop.permute.xlu1 %8612 }
 0x8ef   : > { %8680 = vst.msk [vmem:[%s12485_s20 + $0xe8] sm:$0xff] %vm8650_vm2, %v8613_v7 }
 0x8f0   : > { %v8615_v29 = vpop.permute.xlu0 %8614 }
 0x8f1   : > { %8681 = vst.msk [vmem:[%s12485_s20 + $0xf0] sm:$0xff] %vm8650_vm2, %v8615_v29 }
 0x8f2   : > { %v8617_v46 = vpop.permute.xlu1 %8616 }
 0x8f3   : > { %8682 = vst.msk [vmem:[%s12485_s20 + $0xf8] sm:$0xff] %vm8650_vm2, %v8617_v46 }
 0x8f4   : > { %10917 = shalt.err (!%p10914_p3)
}
 0x8f5   : > { %s10918_s15 = scalar_lea.hbm %s13598_s23, 4096  ;;  %s10922_s16 = scalar_lea.hbm %s13663_s13, 8192 }
 0x8f6   : > { %p10919_p4 = scmp.ne.s32.totalorder %s13598_s23, %s10918_s15  ;;  %p10923_p9 = scmp.lt.u32.totalorder %s13598_s23, %s13663_s13 }
 0x8f7   : > { %p10924_p10 = scmp.lt.u32.totalorder %s10922_s16, %s10918_s15  ;;  %p10926_p12 = scmp.lt.u32.totalorder %s10918_s15, %s13598_s23 }
 0x8f8   : > { %p10920_p7 = pnand %p10919_p4, %p11084_p5 }
 0x8f9   : > { %p10925_p11 = por %p10924_p10, %p10923_p9 }
 0x8fa   : > { %p10921_p8 = pneg %p10920_p7 }
 0x8fb   : > { %p10927_p13 = por %p10926_p12, %p10925_p11 }
 0x8fd   : > { %p10928_p0 = pnand %p10927_p13, %p10921_p8 }
 0x8ff   : > { %10931 = shalt.err (!%p10928_p0)
}
 0x900   : > { %s10975_s24 = smov 128   ;;  %s13835_s22 = smov 8  }
 0x901   : > { %10821 = dma.vmem_to_hbm [thread:$0]  (%p11084_p5), %s13602_s30, 4096, %s13598_s23, %s13608_s29, %s10975_s24, %s10975_s24, %s13835_s22  }
 0x902 PF: > { %p10827_p1 = scmp.ge.s32.totalorder %s10966_s28, 2  ;;  %s8712_s0 = sand.u32 1, %s10954_s25  }
 0x903   : > { %s8713_s1 = scalar_lea.sflag [#allocation5], %s8712_s0 }
 0x904   : > { %p10824_p2 = pnand %p10827_p1, %p11088_p6 }
 0x906   : > { %10949 = dma.done.wait (!%p10824_p2), %s8713_s1, 4096  }
 0x907   : > { %10951 = vsyncadd (!%p10824_p2), %s8713_s1, 4294963200  ;;  %p23_p3 = scmp.ge.s32.totalorder %s11071_s14, 4   ;;  %s13836_s25 = smov %s10958_s26 }
 0x908   : > { %s13837_s26 = smov %s10962_s27  ;;  %s13838_s27 = smov %s11082_s17 }
 0x909   : > { %s13839_s28 = smov %s11071_s14  ;;  %25 = sbr.rel (!%p23_p3) target bundleno = 6 (0x6), region = 125 }
 0x910   :  { %8718 = vsyncpa [#allocation5], 1 }
 0x911   :  { %8720 = vsyncpa [#allocation5 + $0x1], 1 }

</bundles_post_ra>
